<compile_context>
chip_gen: v7x
topology: tpu7x:2x2x1
jax: 0.10.0
libtpu: 0.0.40
codegen_flags: <defaults>
</compile_context>

<pallas_src>
import functools

import jax
import jax.numpy as jnp
from jax.experimental import pallas as pl
from jax.experimental.pallas import tpu as pltpu

_VMEM = pl.BlockSpec(memory_space=pltpu.MemorySpace.VMEM)
_LEAKY_SLOPE = 0.01
_BN_EPS = 1e-5


# ----------------------------------------------------------------------------
# In-kernel building blocks (operate on loaded values).
# ----------------------------------------------------------------------------
def _leaky_relu(x):
    return jnp.where(x >= 0, x, _LEAKY_SLOPE * x)


def _fc_block(x, w, b, gamma, beta):
    """Conv1d(k=1) + BatchNorm1d(batch stats) + LeakyReLU (+ Dropout=identity).

    x: [rows, C_in]; w: [C_in, C_out]; b/gamma/beta: [1, C_out].
    rows = batch x spatial, so per-column batch statistics match
    BatchNorm1d(track_running_stats=False).
    """
    y = jnp.dot(x, w, preferred_element_type=jnp.float32) + b
    mean = jnp.mean(y, axis=0, keepdims=True)
    var = jnp.mean((y - mean) ** 2, axis=0, keepdims=True)  # biased, as PyTorch
    y = (y - mean) * jax.lax.rsqrt(var + _BN_EPS) * gamma + beta
    # TODO(synk): nn.Dropout treated as eval-mode identity (no RNG mask).
    return _leaky_relu(y)


def _identity_block(x, w1, b1, g1, be1, w2, b2):
    x1 = _fc_block(x, w1, b1, g1, be1)
    x1 = jnp.dot(x1, w2, preferred_element_type=jnp.float32) + b2
    return _leaky_relu(x + x1)


def _sort_rows_ascending(z):
    """Ascending sort of each row along the last (lane) axis.

    Odd-even transposition network: T passes of disjoint compare-exchanges,
    implemented with min/max + iota masks (VPU only, no gathers).
    """
    t = z.shape[-1]
    idx = jax.lax.broadcasted_iota(jnp.int32, z.shape, dimension=z.ndim - 1)
    for p in range(t):
        off = p % 2
        nxt = jnp.concatenate([z[:, 1:], z[:, :1]], axis=-1)    # z[i+1] (wrap)
        prv = jnp.concatenate([z[:, -1:], z[:, :-1]], axis=-1)  # z[i-1] (wrap)
        is_lo = ((idx % 2) == off) & (idx + 1 < t)
        is_hi = ((idx % 2) == (1 - off)) & (idx >= off + 1)
        z = jnp.where(is_lo, jnp.minimum(z, nxt),
                      jnp.where(is_hi, jnp.maximum(z, prv), z))
    return z


# ----------------------------------------------------------------------------
# Kernel 1: audio branch + video branch + concat blocks -> per-frame logits.
# ----------------------------------------------------------------------------
def _make_prelogits_kernel(n_av_ids, n_cat_ids):
    def kernel(*refs):
        a_ref, v_ref = refs[0], refs[1]
        out_ref = refs[-1]
        w = [r[...] for r in refs[2:-1]]
        pos = 0

        def take(n):
            nonlocal pos
            vals = w[pos:pos + n]
            pos += n
            return vals

        a = _fc_block(a_ref[...], *take(4))
        for _ in range(n_av_ids):
            a = _identity_block(a, *take(6))

        v = _fc_block(v_ref[...], *take(4))
        for _ in range(n_av_ids):
            v = _identity_block(v, *take(6))

        x = jnp.concatenate([a, v], axis=1)       # torch.cat([audio, video], 1)
        for _ in range(n_cat_ids):
            x = _identity_block(x, *take(6))
        x = _fc_block(x, *take(4))
        wo, bo = take(2)
        out_ref[...] = jnp.dot(x, wo, preferred_element_type=jnp.float32) + bo

    return kernel


# ----------------------------------------------------------------------------
# Kernel 2: sort over time (lane axis) + frame head (FCBlock + Conv1d->1).
# ----------------------------------------------------------------------------
def _frame_kernel(z_ref, wf1_ref, bf1_ref, gf_ref, bef_ref, wf2_ref, bf2_ref,
                  out_ref):
    z = _sort_rows_ascending(z_ref[...])                   # [B*L, T]
    h = _fc_block(z, wf1_ref[...], bf1_ref[...], gf_ref[...], bef_ref[...])
    out_ref[...] = (jnp.dot(h, wf2_ref[...], preferred_element_type=jnp.float32)
                    + bf2_ref[...])


# ----------------------------------------------------------------------------
# Wrapper (forward pass).
# ----------------------------------------------------------------------------
def _flatten_prelogits_params(params):
    flat = list(params["audio"]["fc"])
    for blk in params["audio"]["ids"]:
        flat += list(blk)
    flat += list(params["video"]["fc"])
    for blk in params["video"]["ids"]:
        flat += list(blk)
    for blk in params["concat"]["ids"]:
        flat += list(blk)
    flat += list(params["concat"]["fc"])
    flat += list(params["concat"]["out"])
    return flat


@functools.partial(jax.jit, static_argnums=(3,))
def resnet_like_sort_forward(video, audio, params, max_seq_len):
    """video: [B, T_in, RGB], audio: [B, T_in, AUD] (PyTorch batch-first)."""
    b, t_in, _ = video.shape
    pad = max_seq_len - t_in
    video = jnp.pad(video.astype(jnp.float32), ((0, 0), (0, pad), (0, 0)))
    audio = jnp.pad(audio.astype(jnp.float32), ((0, 0), (0, pad), (0, 0)))
    n_rows = b * max_seq_len
    a2d = audio.reshape(n_rows, audio.shape[-1])
    v2d = video.reshape(n_rows, video.shape[-1])

    flat_w = _flatten_prelogits_params(params)
    labels = params["concat"]["out"][0].shape[1]
    n_av_ids = len(params["audio"]["ids"])
    n_cat_ids = len(params["concat"]["ids"])

    logits = pl.pallas_call(
        _make_prelogits_kernel(n_av_ids, n_cat_ids),
        out_shape=jax.ShapeDtypeStruct((n_rows, labels), jnp.float32),
        in_specs=[_VMEM] * (2 + len(flat_w)),
        out_specs=_VMEM,
    )(a2d, v2d, *flat_w)

    # [B*T, L] -> rows = (b, label), lanes = time  (lane-dense sort input).
    z = logits.reshape(b, max_seq_len, labels).transpose(0, 2, 1)
    z = z.reshape(b * labels, max_seq_len)

    wf1, bf1, gf, bef = params["frame"]["fc"]
    wf2, bf2 = params["frame"]["out"]
    out = pl.pallas_call(
        _frame_kernel,
        out_shape=jax.ShapeDtypeStruct((b * labels, 1), jnp.float32),
        in_specs=[_VMEM] * 7,
        out_specs=_VMEM,
    )(z, wf1, bf1, gf, bef, wf2, bf2)
    return out.reshape(b, labels)


# ----------------------------------------------------------------------------
# Pure-JAX reference (PyTorch [B, C, T] layout) for correctness check.
# ----------------------------------------------------------------------------
def _forward_ref(video, audio, params, max_seq_len):
    b, t_in, _ = video.shape
    pad = max_seq_len - t_in
    v = jnp.pad(video.astype(jnp.float32),
                ((0, 0), (0, pad), (0, 0))).transpose(0, 2, 1)
    a = jnp.pad(audio.astype(jnp.float32),
                ((0, 0), (0, pad), (0, 0))).transpose(0, 2, 1)

    def conv1x1(x, w, bb):                       # x: [B, Cin, L], w: [Cin, Cout]
        return jnp.einsum('bct,co->bot', x, w) + bb[0][None, :, None]

    def fc_block(x, w, bb, g, be):
        y = conv1x1(x, w, bb)
        m = y.mean(axis=(0, 2), keepdims=True)
        var = ((y - m) ** 2).mean(axis=(0, 2), keepdims=True)
        y = ((y - m) / jnp.sqrt(var + _BN_EPS) * g[0][None, :, None]
             + be[0][None, :, None])
        return jnp.where(y >= 0, y, _LEAKY_SLOPE * y)

    def identity(x, w1, b1, g1, be1, w2, b2):
        x1 = fc_block(x, w1, b1, g1, be1)
        x1 = conv1x1(x1, w2, b2)
        y = x + x1
        return jnp.where(y >= 0, y, _LEAKY_SLOPE * y)

    a = fc_block(a, *params["audio"]["fc"])
    for blk in params["audio"]["ids"]:
        a = identity(a, *blk)
    v = fc_block(v, *params["video"]["fc"])
    for blk in params["video"]["ids"]:
        v = identity(v, *blk)
    x = jnp.concatenate([a, v], axis=1)
    for blk in params["concat"]["ids"]:
        x = identity(x, *blk)
    x = fc_block(x, *params["concat"]["fc"])
    x = conv1x1(x, *params["concat"]["out"])          # [B, LABELS, T]
    frame = jnp.sort(x, axis=2).transpose(0, 2, 1)    # [B, T, LABELS]
    y = fc_block(frame, *params["frame"]["fc"])       # channels = T -> F
    y = conv1x1(y, *params["frame"]["out"])           # [B, 1, LABELS]
    return y[:, 0, :]


# ----------------------------------------------------------------------------
# Deterministic parameter init (kernel layout: W [in, out], vectors [1, out]).
# ----------------------------------------------------------------------------
def init_params(key, rgb_size, audio_size, inner_size, labels, frame_inner,
                max_seq_len, av_id_block_num=1, concat_id_block_num=1):
    def split():
        nonlocal key
        key, sub = jax.random.split(key)
        return sub

    def conv(cin, cout):
        s = 1.0 / float(cin) ** 0.5
        w = jax.random.uniform(split(), (cin, cout), jnp.float32, -s, s)
        b = jax.random.uniform(split(), (1, cout), jnp.float32, -s, s)
        return (w, b)

    def fc_block(cin, cout):
        g = jax.random.uniform(split(), (1, cout), jnp.float32, 0.5, 1.5)
        be = jax.random.uniform(split(), (1, cout), jnp.float32, -0.5, 0.5)
        return conv(cin, cout) + (g, be)

    def identity(outer, inner):
        return fc_block(outer, inner) + conv(inner, outer)

    return {
        "audio": {"fc": fc_block(audio_size, inner_size),
                  "ids": [identity(inner_size, inner_size)
                          for _ in range(av_id_block_num)]},
        "video": {"fc": fc_block(rgb_size, inner_size),
                  "ids": [identity(inner_size, inner_size)
                          for _ in range(av_id_block_num)]},
        "concat": {"ids": [identity(2 * inner_size, inner_size)
                           for _ in range(concat_id_block_num)],
                   "fc": fc_block(2 * inner_size, inner_size),
                   "out": conv(inner_size, labels)},
        "frame": {"fc": fc_block(max_seq_len, frame_inner),
                  "out": conv(frame_inner, 1)},
    }


if __name__ == "__main__":
    # Small stand-ins for the module constants: batch=2, seq=5 padded to
    # MAX_SEQ_LEN=8, RGB=16, AUDIO=8, inner_size=32, labels=16, frame_inner=16.
    B, T_IN, MAX_SEQ_LEN = 2, 5, 8
    RGB, AUD = 16, 8
    INNER, LABELS, FRAME_INNER = 32, 16, 16

    key = jax.random.PRNGKey(0)
    key, kv, ka, kp = jax.random.split(key, 4)
    video = jax.random.normal(kv, (B, T_IN, RGB), jnp.float32)
    audio = jax.random.normal(ka, (B, T_IN, AUD), jnp.float32)
    params = init_params(kp, RGB, AUD, INNER, LABELS, FRAME_INNER, MAX_SEQ_LEN,
                         av_id_block_num=1, concat_id_block_num=1)

    out = jax.block_until_ready(
        resnet_like_sort_forward(video, audio, params, MAX_SEQ_LEN))
    ref = jax.block_until_ready(_forward_ref(video, audio, params, MAX_SEQ_LEN))

    assert out.shape == (B, LABELS), out.shape
    assert jnp.allclose(out, ref, rtol=1e-2, atol=1e-2), (
        "mismatch vs reference, max abs err = %f"
        % float(jnp.max(jnp.abs(out - ref))))
    print("KERNEL_OK")
</pallas_src>

<mosaic_0001>
module attributes {stable_mosaic.version = 11 : i64} {
  func.func @kernel(%arg0: memref<16x8xf32, #tpu.memory_space<vmem>>, %arg1: memref<16x16xf32, #tpu.memory_space<vmem>>, %arg2: memref<8x32xf32, #tpu.memory_space<vmem>>, %arg3: memref<1x32xf32, #tpu.memory_space<vmem>>, %arg4: memref<1x32xf32, #tpu.memory_space<vmem>>, %arg5: memref<1x32xf32, #tpu.memory_space<vmem>>, %arg6: memref<32x32xf32, #tpu.memory_space<vmem>>, %arg7: memref<1x32xf32, #tpu.memory_space<vmem>>, %arg8: memref<1x32xf32, #tpu.memory_space<vmem>>, %arg9: memref<1x32xf32, #tpu.memory_space<vmem>>, %arg10: memref<32x32xf32, #tpu.memory_space<vmem>>, %arg11: memref<1x32xf32, #tpu.memory_space<vmem>>, %arg12: memref<16x32xf32, #tpu.memory_space<vmem>>, %arg13: memref<1x32xf32, #tpu.memory_space<vmem>>, %arg14: memref<1x32xf32, #tpu.memory_space<vmem>>, %arg15: memref<1x32xf32, #tpu.memory_space<vmem>>, %arg16: memref<32x32xf32, #tpu.memory_space<vmem>>, %arg17: memref<1x32xf32, #tpu.memory_space<vmem>>, %arg18: memref<1x32xf32, #tpu.memory_space<vmem>>, %arg19: memref<1x32xf32, #tpu.memory_space<vmem>>, %arg20: memref<32x32xf32, #tpu.memory_space<vmem>>, %arg21: memref<1x32xf32, #tpu.memory_space<vmem>>, %arg22: memref<64x32xf32, #tpu.memory_space<vmem>>, %arg23: memref<1x32xf32, #tpu.memory_space<vmem>>, %arg24: memref<1x32xf32, #tpu.memory_space<vmem>>, %arg25: memref<1x32xf32, #tpu.memory_space<vmem>>, %arg26: memref<32x64xf32, #tpu.memory_space<vmem>>, %arg27: memref<1x64xf32, #tpu.memory_space<vmem>>, %arg28: memref<64x32xf32, #tpu.memory_space<vmem>>, %arg29: memref<1x32xf32, #tpu.memory_space<vmem>>, %arg30: memref<1x32xf32, #tpu.memory_space<vmem>>, %arg31: memref<1x32xf32, #tpu.memory_space<vmem>>, %arg32: memref<32x16xf32, #tpu.memory_space<vmem>>, %arg33: memref<1x16xf32, #tpu.memory_space<vmem>>, %arg34: memref<16x16xf32, #tpu.memory_space<vmem>>) attributes {dimension_semantics = [], scalar_prefetch = 0 : i64, scratch_operands = 0 : i64, tpu.core_type = #tpu.core_type<tc>} {
    %c0 = arith.constant 0 : index
    %c0_0 = arith.constant 0 : index
    %0 = vector.load %arg2[%c0, %c0_0] : memref<8x32xf32, #tpu.memory_space<vmem>>, vector<8x32xf32>
    %c0_1 = arith.constant 0 : index
    %c0_2 = arith.constant 0 : index
    %1 = vector.load %arg3[%c0_1, %c0_2] : memref<1x32xf32, #tpu.memory_space<vmem>>, vector<1x32xf32>
    %c0_3 = arith.constant 0 : index
    %c0_4 = arith.constant 0 : index
    %2 = vector.load %arg4[%c0_3, %c0_4] : memref<1x32xf32, #tpu.memory_space<vmem>>, vector<1x32xf32>
    %c0_5 = arith.constant 0 : index
    %c0_6 = arith.constant 0 : index
    %3 = vector.load %arg5[%c0_5, %c0_6] : memref<1x32xf32, #tpu.memory_space<vmem>>, vector<1x32xf32>
    %c0_7 = arith.constant 0 : index
    %c0_8 = arith.constant 0 : index
    %4 = vector.load %arg6[%c0_7, %c0_8] : memref<32x32xf32, #tpu.memory_space<vmem>>, vector<32x32xf32>
    %c0_9 = arith.constant 0 : index
    %c0_10 = arith.constant 0 : index
    %5 = vector.load %arg7[%c0_9, %c0_10] : memref<1x32xf32, #tpu.memory_space<vmem>>, vector<1x32xf32>
    %c0_11 = arith.constant 0 : index
    %c0_12 = arith.constant 0 : index
    %6 = vector.load %arg8[%c0_11, %c0_12] : memref<1x32xf32, #tpu.memory_space<vmem>>, vector<1x32xf32>
    %c0_13 = arith.constant 0 : index
    %c0_14 = arith.constant 0 : index
    %7 = vector.load %arg9[%c0_13, %c0_14] : memref<1x32xf32, #tpu.memory_space<vmem>>, vector<1x32xf32>
    %c0_15 = arith.constant 0 : index
    %c0_16 = arith.constant 0 : index
    %8 = vector.load %arg10[%c0_15, %c0_16] : memref<32x32xf32, #tpu.memory_space<vmem>>, vector<32x32xf32>
    %c0_17 = arith.constant 0 : index
    %c0_18 = arith.constant 0 : index
    %9 = vector.load %arg11[%c0_17, %c0_18] : memref<1x32xf32, #tpu.memory_space<vmem>>, vector<1x32xf32>
    %c0_19 = arith.constant 0 : index
    %c0_20 = arith.constant 0 : index
    %10 = vector.load %arg12[%c0_19, %c0_20] : memref<16x32xf32, #tpu.memory_space<vmem>>, vector<16x32xf32>
    %c0_21 = arith.constant 0 : index
    %c0_22 = arith.constant 0 : index
    %11 = vector.load %arg13[%c0_21, %c0_22] : memref<1x32xf32, #tpu.memory_space<vmem>>, vector<1x32xf32>
    %c0_23 = arith.constant 0 : index
    %c0_24 = arith.constant 0 : index
    %12 = vector.load %arg14[%c0_23, %c0_24] : memref<1x32xf32, #tpu.memory_space<vmem>>, vector<1x32xf32>
    %c0_25 = arith.constant 0 : index
    %c0_26 = arith.constant 0 : index
    %13 = vector.load %arg15[%c0_25, %c0_26] : memref<1x32xf32, #tpu.memory_space<vmem>>, vector<1x32xf32>
    %c0_27 = arith.constant 0 : index
    %c0_28 = arith.constant 0 : index
    %14 = vector.load %arg16[%c0_27, %c0_28] : memref<32x32xf32, #tpu.memory_space<vmem>>, vector<32x32xf32>
    %c0_29 = arith.constant 0 : index
    %c0_30 = arith.constant 0 : index
    %15 = vector.load %arg17[%c0_29, %c0_30] : memref<1x32xf32, #tpu.memory_space<vmem>>, vector<1x32xf32>
    %c0_31 = arith.constant 0 : index
    %c0_32 = arith.constant 0 : index
    %16 = vector.load %arg18[%c0_31, %c0_32] : memref<1x32xf32, #tpu.memory_space<vmem>>, vector<1x32xf32>
    %c0_33 = arith.constant 0 : index
    %c0_34 = arith.constant 0 : index
    %17 = vector.load %arg19[%c0_33, %c0_34] : memref<1x32xf32, #tpu.memory_space<vmem>>, vector<1x32xf32>
    %c0_35 = arith.constant 0 : index
    %c0_36 = arith.constant 0 : index
    %18 = vector.load %arg20[%c0_35, %c0_36] : memref<32x32xf32, #tpu.memory_space<vmem>>, vector<32x32xf32>
    %c0_37 = arith.constant 0 : index
    %c0_38 = arith.constant 0 : index
    %19 = vector.load %arg21[%c0_37, %c0_38] : memref<1x32xf32, #tpu.memory_space<vmem>>, vector<1x32xf32>
    %c0_39 = arith.constant 0 : index
    %c0_40 = arith.constant 0 : index
    %20 = vector.load %arg22[%c0_39, %c0_40] : memref<64x32xf32, #tpu.memory_space<vmem>>, vector<64x32xf32>
    %c0_41 = arith.constant 0 : index
    %c0_42 = arith.constant 0 : index
    %21 = vector.load %arg23[%c0_41, %c0_42] : memref<1x32xf32, #tpu.memory_space<vmem>>, vector<1x32xf32>
    %c0_43 = arith.constant 0 : index
    %c0_44 = arith.constant 0 : index
    %22 = vector.load %arg24[%c0_43, %c0_44] : memref<1x32xf32, #tpu.memory_space<vmem>>, vector<1x32xf32>
    %c0_45 = arith.constant 0 : index
    %c0_46 = arith.constant 0 : index
    %23 = vector.load %arg25[%c0_45, %c0_46] : memref<1x32xf32, #tpu.memory_space<vmem>>, vector<1x32xf32>
    %c0_47 = arith.constant 0 : index
    %c0_48 = arith.constant 0 : index
    %24 = vector.load %arg26[%c0_47, %c0_48] : memref<32x64xf32, #tpu.memory_space<vmem>>, vector<32x64xf32>
    %c0_49 = arith.constant 0 : index
    %c0_50 = arith.constant 0 : index
    %25 = vector.load %arg27[%c0_49, %c0_50] : memref<1x64xf32, #tpu.memory_space<vmem>>, vector<1x64xf32>
    %c0_51 = arith.constant 0 : index
    %c0_52 = arith.constant 0 : index
    %26 = vector.load %arg28[%c0_51, %c0_52] : memref<64x32xf32, #tpu.memory_space<vmem>>, vector<64x32xf32>
    %c0_53 = arith.constant 0 : index
    %c0_54 = arith.constant 0 : index
    %27 = vector.load %arg29[%c0_53, %c0_54] : memref<1x32xf32, #tpu.memory_space<vmem>>, vector<1x32xf32>
    %c0_55 = arith.constant 0 : index
    %c0_56 = arith.constant 0 : index
    %28 = vector.load %arg30[%c0_55, %c0_56] : memref<1x32xf32, #tpu.memory_space<vmem>>, vector<1x32xf32>
    %c0_57 = arith.constant 0 : index
    %c0_58 = arith.constant 0 : index
    %29 = vector.load %arg31[%c0_57, %c0_58] : memref<1x32xf32, #tpu.memory_space<vmem>>, vector<1x32xf32>
    %c0_59 = arith.constant 0 : index
    %c0_60 = arith.constant 0 : index
    %30 = vector.load %arg32[%c0_59, %c0_60] : memref<32x16xf32, #tpu.memory_space<vmem>>, vector<32x16xf32>
    %c0_61 = arith.constant 0 : index
    %c0_62 = arith.constant 0 : index
    %31 = vector.load %arg33[%c0_61, %c0_62] : memref<1x16xf32, #tpu.memory_space<vmem>>, vector<1x16xf32>
    %c0_63 = arith.constant 0 : index
    %c0_64 = arith.constant 0 : index
    %32 = vector.load %arg0[%c0_63, %c0_64] : memref<16x8xf32, #tpu.memory_space<vmem>>, vector<16x8xf32>
    %cst = arith.constant dense<0.000000e+00> : vector<16x32xf32>
    %33 = tpu.matmul %32, %0, %cst {dimension_numbers = #tpu.dot_dimension_numbers<[1], [0], [0], [1], [0, 0, 1, 1], [], []>} : vector<16x8xf32>, vector<8x32xf32>, vector<16x32xf32> -> vector<16x32xf32>
    %34 = vector.broadcast %1 : vector<1x32xf32> to vector<16x32xf32>
    %35 = arith.addf %33, %34 : vector<16x32xf32>
    %cst_65 = arith.constant dense<0.000000e+00> : vector<32xf32>
    %36 = vector.multi_reduction <add>, %35, %cst_65 [0] : vector<16x32xf32> to vector<32xf32>
    %37 = vector.shape_cast %36 : vector<32xf32> to vector<1x32xf32>
    %cst_66 = arith.constant 1.600000e+01 : f32
    %38 = vector.broadcast %cst_66 : f32 to vector<1x32xf32>
    %39 = arith.divf %37, %38 : vector<1x32xf32>
    %40 = vector.broadcast %39 : vector<1x32xf32> to vector<16x32xf32>
    %41 = arith.subf %35, %40 : vector<16x32xf32>
    %42 = arith.mulf %41, %41 : vector<16x32xf32>
    %cst_67 = arith.constant dense<0.000000e+00> : vector<32xf32>
    %43 = vector.multi_reduction <add>, %42, %cst_67 [0] : vector<16x32xf32> to vector<32xf32>
    %44 = vector.shape_cast %43 : vector<32xf32> to vector<1x32xf32>
    %cst_68 = arith.constant 1.600000e+01 : f32
    %45 = vector.broadcast %cst_68 : f32 to vector<1x32xf32>
    %46 = arith.divf %44, %45 : vector<1x32xf32>
    %47 = vector.broadcast %39 : vector<1x32xf32> to vector<16x32xf32>
    %48 = arith.subf %35, %47 : vector<16x32xf32>
    %cst_69 = arith.constant 9.99999974E-6 : f32
    %49 = vector.broadcast %cst_69 : f32 to vector<1x32xf32>
    %50 = arith.addf %46, %49 : vector<1x32xf32>
    %51 = math.rsqrt %50 : vector<1x32xf32>
    %52 = vector.broadcast %51 : vector<1x32xf32> to vector<16x32xf32>
    %53 = arith.mulf %48, %52 : vector<16x32xf32>
    %54 = vector.broadcast %2 : vector<1x32xf32> to vector<16x32xf32>
    %55 = arith.mulf %53, %54 : vector<16x32xf32>
    %56 = vector.broadcast %3 : vector<1x32xf32> to vector<16x32xf32>
    %57 = arith.addf %55, %56 : vector<16x32xf32>
    %cst_70 = arith.constant 0.000000e+00 : f32
    %58 = vector.broadcast %cst_70 : f32 to vector<16x32xf32>
    %59 = arith.cmpf oge, %57, %58 : vector<16x32xf32>
    %cst_71 = arith.constant 0.00999999977 : f32
    %60 = vector.broadcast %cst_71 : f32 to vector<16x32xf32>
    %61 = arith.mulf %60, %57 : vector<16x32xf32>
    %62 = arith.select %59, %57, %61 : vector<16x32xi1>, vector<16x32xf32>
    %cst_72 = arith.constant dense<0.000000e+00> : vector<16x32xf32>
    %63 = tpu.matmul %62, %4, %cst_72 {dimension_numbers = #tpu.dot_dimension_numbers<[1], [0], [0], [1], [0, 0, 1, 1], [], []>} : vector<16x32xf32>, vector<32x32xf32>, vector<16x32xf32> -> vector<16x32xf32>
    %64 = vector.broadcast %5 : vector<1x32xf32> to vector<16x32xf32>
    %65 = arith.addf %63, %64 : vector<16x32xf32>
    %cst_73 = arith.constant dense<0.000000e+00> : vector<32xf32>
    %66 = vector.multi_reduction <add>, %65, %cst_73 [0] : vector<16x32xf32> to vector<32xf32>
    %67 = vector.shape_cast %66 : vector<32xf32> to vector<1x32xf32>
    %cst_74 = arith.constant 1.600000e+01 : f32
    %68 = vector.broadcast %cst_74 : f32 to vector<1x32xf32>
    %69 = arith.divf %67, %68 : vector<1x32xf32>
    %70 = vector.broadcast %69 : vector<1x32xf32> to vector<16x32xf32>
    %71 = arith.subf %65, %70 : vector<16x32xf32>
    %72 = arith.mulf %71, %71 : vector<16x32xf32>
    %cst_75 = arith.constant dense<0.000000e+00> : vector<32xf32>
    %73 = vector.multi_reduction <add>, %72, %cst_75 [0] : vector<16x32xf32> to vector<32xf32>
    %74 = vector.shape_cast %73 : vector<32xf32> to vector<1x32xf32>
    %cst_76 = arith.constant 1.600000e+01 : f32
    %75 = vector.broadcast %cst_76 : f32 to vector<1x32xf32>
    %76 = arith.divf %74, %75 : vector<1x32xf32>
    %77 = vector.broadcast %69 : vector<1x32xf32> to vector<16x32xf32>
    %78 = arith.subf %65, %77 : vector<16x32xf32>
    %cst_77 = arith.constant 9.99999974E-6 : f32
    %79 = vector.broadcast %cst_77 : f32 to vector<1x32xf32>
    %80 = arith.addf %76, %79 : vector<1x32xf32>
    %81 = math.rsqrt %80 : vector<1x32xf32>
    %82 = vector.broadcast %81 : vector<1x32xf32> to vector<16x32xf32>
    %83 = arith.mulf %78, %82 : vector<16x32xf32>
    %84 = vector.broadcast %6 : vector<1x32xf32> to vector<16x32xf32>
    %85 = arith.mulf %83, %84 : vector<16x32xf32>
    %86 = vector.broadcast %7 : vector<1x32xf32> to vector<16x32xf32>
    %87 = arith.addf %85, %86 : vector<16x32xf32>
    %cst_78 = arith.constant 0.000000e+00 : f32
    %88 = vector.broadcast %cst_78 : f32 to vector<16x32xf32>
    %89 = arith.cmpf oge, %87, %88 : vector<16x32xf32>
    %cst_79 = arith.constant 0.00999999977 : f32
    %90 = vector.broadcast %cst_79 : f32 to vector<16x32xf32>
    %91 = arith.mulf %90, %87 : vector<16x32xf32>
    %92 = arith.select %89, %87, %91 : vector<16x32xi1>, vector<16x32xf32>
    %cst_80 = arith.constant dense<0.000000e+00> : vector<16x32xf32>
    %93 = tpu.matmul %92, %8, %cst_80 {dimension_numbers = #tpu.dot_dimension_numbers<[1], [0], [0], [1], [0, 0, 1, 1], [], []>} : vector<16x32xf32>, vector<32x32xf32>, vector<16x32xf32> -> vector<16x32xf32>
    %94 = vector.broadcast %9 : vector<1x32xf32> to vector<16x32xf32>
    %95 = arith.addf %93, %94 : vector<16x32xf32>
    %96 = arith.addf %62, %95 : vector<16x32xf32>
    %cst_81 = arith.constant 0.000000e+00 : f32
    %97 = vector.broadcast %cst_81 : f32 to vector<16x32xf32>
    %98 = arith.cmpf oge, %96, %97 : vector<16x32xf32>
    %cst_82 = arith.constant 0.00999999977 : f32
    %99 = vector.broadcast %cst_82 : f32 to vector<16x32xf32>
    %100 = arith.mulf %99, %96 : vector<16x32xf32>
    %101 = arith.select %98, %96, %100 : vector<16x32xi1>, vector<16x32xf32>
    %c0_83 = arith.constant 0 : index
    %c0_84 = arith.constant 0 : index
    %102 = vector.load %arg1[%c0_83, %c0_84] : memref<16x16xf32, #tpu.memory_space<vmem>>, vector<16x16xf32>
    %cst_85 = arith.constant dense<0.000000e+00> : vector<16x32xf32>
    %103 = tpu.matmul %102, %10, %cst_85 {dimension_numbers = #tpu.dot_dimension_numbers<[1], [0], [0], [1], [0, 0, 1, 1], [], []>} : vector<16x16xf32>, vector<16x32xf32>, vector<16x32xf32> -> vector<16x32xf32>
    %104 = vector.broadcast %11 : vector<1x32xf32> to vector<16x32xf32>
    %105 = arith.addf %103, %104 : vector<16x32xf32>
    %cst_86 = arith.constant dense<0.000000e+00> : vector<32xf32>
    %106 = vector.multi_reduction <add>, %105, %cst_86 [0] : vector<16x32xf32> to vector<32xf32>
    %107 = vector.shape_cast %106 : vector<32xf32> to vector<1x32xf32>
    %cst_87 = arith.constant 1.600000e+01 : f32
    %108 = vector.broadcast %cst_87 : f32 to vector<1x32xf32>
    %109 = arith.divf %107, %108 : vector<1x32xf32>
    %110 = vector.broadcast %109 : vector<1x32xf32> to vector<16x32xf32>
    %111 = arith.subf %105, %110 : vector<16x32xf32>
    %112 = arith.mulf %111, %111 : vector<16x32xf32>
    %cst_88 = arith.constant dense<0.000000e+00> : vector<32xf32>
    %113 = vector.multi_reduction <add>, %112, %cst_88 [0] : vector<16x32xf32> to vector<32xf32>
    %114 = vector.shape_cast %113 : vector<32xf32> to vector<1x32xf32>
    %cst_89 = arith.constant 1.600000e+01 : f32
    %115 = vector.broadcast %cst_89 : f32 to vector<1x32xf32>
    %116 = arith.divf %114, %115 : vector<1x32xf32>
    %117 = vector.broadcast %109 : vector<1x32xf32> to vector<16x32xf32>
    %118 = arith.subf %105, %117 : vector<16x32xf32>
    %cst_90 = arith.constant 9.99999974E-6 : f32
    %119 = vector.broadcast %cst_90 : f32 to vector<1x32xf32>
    %120 = arith.addf %116, %119 : vector<1x32xf32>
    %121 = math.rsqrt %120 : vector<1x32xf32>
    %122 = vector.broadcast %121 : vector<1x32xf32> to vector<16x32xf32>
    %123 = arith.mulf %118, %122 : vector<16x32xf32>
    %124 = vector.broadcast %12 : vector<1x32xf32> to vector<16x32xf32>
    %125 = arith.mulf %123, %124 : vector<16x32xf32>
    %126 = vector.broadcast %13 : vector<1x32xf32> to vector<16x32xf32>
    %127 = arith.addf %125, %126 : vector<16x32xf32>
    %cst_91 = arith.constant 0.000000e+00 : f32
    %128 = vector.broadcast %cst_91 : f32 to vector<16x32xf32>
    %129 = arith.cmpf oge, %127, %128 : vector<16x32xf32>
    %cst_92 = arith.constant 0.00999999977 : f32
    %130 = vector.broadcast %cst_92 : f32 to vector<16x32xf32>
    %131 = arith.mulf %130, %127 : vector<16x32xf32>
    %132 = arith.select %129, %127, %131 : vector<16x32xi1>, vector<16x32xf32>
    %cst_93 = arith.constant dense<0.000000e+00> : vector<16x32xf32>
    %133 = tpu.matmul %132, %14, %cst_93 {dimension_numbers = #tpu.dot_dimension_numbers<[1], [0], [0], [1], [0, 0, 1, 1], [], []>} : vector<16x32xf32>, vector<32x32xf32>, vector<16x32xf32> -> vector<16x32xf32>
    %134 = vector.broadcast %15 : vector<1x32xf32> to vector<16x32xf32>
    %135 = arith.addf %133, %134 : vector<16x32xf32>
    %cst_94 = arith.constant dense<0.000000e+00> : vector<32xf32>
    %136 = vector.multi_reduction <add>, %135, %cst_94 [0] : vector<16x32xf32> to vector<32xf32>
    %137 = vector.shape_cast %136 : vector<32xf32> to vector<1x32xf32>
    %cst_95 = arith.constant 1.600000e+01 : f32
    %138 = vector.broadcast %cst_95 : f32 to vector<1x32xf32>
    %139 = arith.divf %137, %138 : vector<1x32xf32>
    %140 = vector.broadcast %139 : vector<1x32xf32> to vector<16x32xf32>
    %141 = arith.subf %135, %140 : vector<16x32xf32>
    %142 = arith.mulf %141, %141 : vector<16x32xf32>
    %cst_96 = arith.constant dense<0.000000e+00> : vector<32xf32>
    %143 = vector.multi_reduction <add>, %142, %cst_96 [0] : vector<16x32xf32> to vector<32xf32>
    %144 = vector.shape_cast %143 : vector<32xf32> to vector<1x32xf32>
    %cst_97 = arith.constant 1.600000e+01 : f32
    %145 = vector.broadcast %cst_97 : f32 to vector<1x32xf32>
    %146 = arith.divf %144, %145 : vector<1x32xf32>
    %147 = vector.broadcast %139 : vector<1x32xf32> to vector<16x32xf32>
    %148 = arith.subf %135, %147 : vector<16x32xf32>
    %cst_98 = arith.constant 9.99999974E-6 : f32
    %149 = vector.broadcast %cst_98 : f32 to vector<1x32xf32>
    %150 = arith.addf %146, %149 : vector<1x32xf32>
    %151 = math.rsqrt %150 : vector<1x32xf32>
    %152 = vector.broadcast %151 : vector<1x32xf32> to vector<16x32xf32>
    %153 = arith.mulf %148, %152 : vector<16x32xf32>
    %154 = vector.broadcast %16 : vector<1x32xf32> to vector<16x32xf32>
    %155 = arith.mulf %153, %154 : vector<16x32xf32>
    %156 = vector.broadcast %17 : vector<1x32xf32> to vector<16x32xf32>
    %157 = arith.addf %155, %156 : vector<16x32xf32>
    %cst_99 = arith.constant 0.000000e+00 : f32
    %158 = vector.broadcast %cst_99 : f32 to vector<16x32xf32>
    %159 = arith.cmpf oge, %157, %158 : vector<16x32xf32>
    %cst_100 = arith.constant 0.00999999977 : f32
    %160 = vector.broadcast %cst_100 : f32 to vector<16x32xf32>
    %161 = arith.mulf %160, %157 : vector<16x32xf32>
    %162 = arith.select %159, %157, %161 : vector<16x32xi1>, vector<16x32xf32>
    %cst_101 = arith.constant dense<0.000000e+00> : vector<16x32xf32>
    %163 = tpu.matmul %162, %18, %cst_101 {dimension_numbers = #tpu.dot_dimension_numbers<[1], [0], [0], [1], [0, 0, 1, 1], [], []>} : vector<16x32xf32>, vector<32x32xf32>, vector<16x32xf32> -> vector<16x32xf32>
    %164 = vector.broadcast %19 : vector<1x32xf32> to vector<16x32xf32>
    %165 = arith.addf %163, %164 : vector<16x32xf32>
    %166 = arith.addf %132, %165 : vector<16x32xf32>
    %cst_102 = arith.constant 0.000000e+00 : f32
    %167 = vector.broadcast %cst_102 : f32 to vector<16x32xf32>
    %168 = arith.cmpf oge, %166, %167 : vector<16x32xf32>
    %cst_103 = arith.constant 0.00999999977 : f32
    %169 = vector.broadcast %cst_103 : f32 to vector<16x32xf32>
    %170 = arith.mulf %169, %166 : vector<16x32xf32>
    %171 = arith.select %168, %166, %170 : vector<16x32xi1>, vector<16x32xf32>
    %172 = tpu.concatenate %101, %171 in 1 : vector<16x32xf32>, vector<16x32xf32> -> vector<16x64xf32>
    %cst_104 = arith.constant dense<0.000000e+00> : vector<16x32xf32>
    %173 = tpu.matmul %172, %20, %cst_104 {dimension_numbers = #tpu.dot_dimension_numbers<[1], [0], [0], [1], [0, 0, 1, 1], [], []>} : vector<16x64xf32>, vector<64x32xf32>, vector<16x32xf32> -> vector<16x32xf32>
    %174 = vector.broadcast %21 : vector<1x32xf32> to vector<16x32xf32>
    %175 = arith.addf %173, %174 : vector<16x32xf32>
    %cst_105 = arith.constant dense<0.000000e+00> : vector<32xf32>
    %176 = vector.multi_reduction <add>, %175, %cst_105 [0] : vector<16x32xf32> to vector<32xf32>
    %177 = vector.shape_cast %176 : vector<32xf32> to vector<1x32xf32>
    %cst_106 = arith.constant 1.600000e+01 : f32
    %178 = vector.broadcast %cst_106 : f32 to vector<1x32xf32>
    %179 = arith.divf %177, %178 : vector<1x32xf32>
    %180 = vector.broadcast %179 : vector<1x32xf32> to vector<16x32xf32>
    %181 = arith.subf %175, %180 : vector<16x32xf32>
    %182 = arith.mulf %181, %181 : vector<16x32xf32>
    %cst_107 = arith.constant dense<0.000000e+00> : vector<32xf32>
    %183 = vector.multi_reduction <add>, %182, %cst_107 [0] : vector<16x32xf32> to vector<32xf32>
    %184 = vector.shape_cast %183 : vector<32xf32> to vector<1x32xf32>
    %cst_108 = arith.constant 1.600000e+01 : f32
    %185 = vector.broadcast %cst_108 : f32 to vector<1x32xf32>
    %186 = arith.divf %184, %185 : vector<1x32xf32>
    %187 = vector.broadcast %179 : vector<1x32xf32> to vector<16x32xf32>
    %188 = arith.subf %175, %187 : vector<16x32xf32>
    %cst_109 = arith.constant 9.99999974E-6 : f32
    %189 = vector.broadcast %cst_109 : f32 to vector<1x32xf32>
    %190 = arith.addf %186, %189 : vector<1x32xf32>
    %191 = math.rsqrt %190 : vector<1x32xf32>
    %192 = vector.broadcast %191 : vector<1x32xf32> to vector<16x32xf32>
    %193 = arith.mulf %188, %192 : vector<16x32xf32>
    %194 = vector.broadcast %22 : vector<1x32xf32> to vector<16x32xf32>
    %195 = arith.mulf %193, %194 : vector<16x32xf32>
    %196 = vector.broadcast %23 : vector<1x32xf32> to vector<16x32xf32>
    %197 = arith.addf %195, %196 : vector<16x32xf32>
    %cst_110 = arith.constant 0.000000e+00 : f32
    %198 = vector.broadcast %cst_110 : f32 to vector<16x32xf32>
    %199 = arith.cmpf oge, %197, %198 : vector<16x32xf32>
    %cst_111 = arith.constant 0.00999999977 : f32
    %200 = vector.broadcast %cst_111 : f32 to vector<16x32xf32>
    %201 = arith.mulf %200, %197 : vector<16x32xf32>
    %202 = arith.select %199, %197, %201 : vector<16x32xi1>, vector<16x32xf32>
    %cst_112 = arith.constant dense<0.000000e+00> : vector<16x64xf32>
    %203 = tpu.matmul %202, %24, %cst_112 {dimension_numbers = #tpu.dot_dimension_numbers<[1], [0], [0], [1], [0, 0, 1, 1], [], []>} : vector<16x32xf32>, vector<32x64xf32>, vector<16x64xf32> -> vector<16x64xf32>
    %204 = vector.broadcast %25 : vector<1x64xf32> to vector<16x64xf32>
    %205 = arith.addf %203, %204 : vector<16x64xf32>
    %206 = arith.addf %172, %205 : vector<16x64xf32>
    %cst_113 = arith.constant 0.000000e+00 : f32
    %207 = vector.broadcast %cst_113 : f32 to vector<16x64xf32>
    %208 = arith.cmpf oge, %206, %207 : vector<16x64xf32>
    %cst_114 = arith.constant 0.00999999977 : f32
    %209 = vector.broadcast %cst_114 : f32 to vector<16x64xf32>
    %210 = arith.mulf %209, %206 : vector<16x64xf32>
    %211 = arith.select %208, %206, %210 : vector<16x64xi1>, vector<16x64xf32>
    %cst_115 = arith.constant dense<0.000000e+00> : vector<16x32xf32>
    %212 = tpu.matmul %211, %26, %cst_115 {dimension_numbers = #tpu.dot_dimension_numbers<[1], [0], [0], [1], [0, 0, 1, 1], [], []>} : vector<16x64xf32>, vector<64x32xf32>, vector<16x32xf32> -> vector<16x32xf32>
    %213 = vector.broadcast %27 : vector<1x32xf32> to vector<16x32xf32>
    %214 = arith.addf %212, %213 : vector<16x32xf32>
    %cst_116 = arith.constant dense<0.000000e+00> : vector<32xf32>
    %215 = vector.multi_reduction <add>, %214, %cst_116 [0] : vector<16x32xf32> to vector<32xf32>
    %216 = vector.shape_cast %215 : vector<32xf32> to vector<1x32xf32>
    %cst_117 = arith.constant 1.600000e+01 : f32
    %217 = vector.broadcast %cst_117 : f32 to vector<1x32xf32>
    %218 = arith.divf %216, %217 : vector<1x32xf32>
    %219 = vector.broadcast %218 : vector<1x32xf32> to vector<16x32xf32>
    %220 = arith.subf %214, %219 : vector<16x32xf32>
    %221 = arith.mulf %220, %220 : vector<16x32xf32>
    %cst_118 = arith.constant dense<0.000000e+00> : vector<32xf32>
    %222 = vector.multi_reduction <add>, %221, %cst_118 [0] : vector<16x32xf32> to vector<32xf32>
    %223 = vector.shape_cast %222 : vector<32xf32> to vector<1x32xf32>
    %cst_119 = arith.constant 1.600000e+01 : f32
    %224 = vector.broadcast %cst_119 : f32 to vector<1x32xf32>
    %225 = arith.divf %223, %224 : vector<1x32xf32>
    %226 = vector.broadcast %218 : vector<1x32xf32> to vector<16x32xf32>
    %227 = arith.subf %214, %226 : vector<16x32xf32>
    %cst_120 = arith.constant 9.99999974E-6 : f32
    %228 = vector.broadcast %cst_120 : f32 to vector<1x32xf32>
    %229 = arith.addf %225, %228 : vector<1x32xf32>
    %230 = math.rsqrt %229 : vector<1x32xf32>
    %231 = vector.broadcast %230 : vector<1x32xf32> to vector<16x32xf32>
    %232 = arith.mulf %227, %231 : vector<16x32xf32>
    %233 = vector.broadcast %28 : vector<1x32xf32> to vector<16x32xf32>
    %234 = arith.mulf %232, %233 : vector<16x32xf32>
    %235 = vector.broadcast %29 : vector<1x32xf32> to vector<16x32xf32>
    %236 = arith.addf %234, %235 : vector<16x32xf32>
    %cst_121 = arith.constant 0.000000e+00 : f32
    %237 = vector.broadcast %cst_121 : f32 to vector<16x32xf32>
    %238 = arith.cmpf oge, %236, %237 : vector<16x32xf32>
    %cst_122 = arith.constant 0.00999999977 : f32
    %239 = vector.broadcast %cst_122 : f32 to vector<16x32xf32>
    %240 = arith.mulf %239, %236 : vector<16x32xf32>
    %241 = arith.select %238, %236, %240 : vector<16x32xi1>, vector<16x32xf32>
    %cst_123 = arith.constant dense<0.000000e+00> : vector<16x16xf32>
    %242 = tpu.matmul %241, %30, %cst_123 {dimension_numbers = #tpu.dot_dimension_numbers<[1], [0], [0], [1], [0, 0, 1, 1], [], []>} : vector<16x32xf32>, vector<32x16xf32>, vector<16x16xf32> -> vector<16x16xf32>
    %243 = vector.broadcast %31 : vector<1x16xf32> to vector<16x16xf32>
    %244 = arith.addf %242, %243 : vector<16x16xf32>
    %c0_124 = arith.constant 0 : index
    %c0_125 = arith.constant 0 : index
    %245 = vector.load %arg34[%c0_124, %c0_125] : memref<16x16xf32, #tpu.memory_space<vmem>>, vector<16x16xf32>
    tpu.vector_store %arg34[%c0_124, %c0_125], %244 {strides = array<i32>} : memref<16x16xf32, #tpu.memory_space<vmem>>, vector<16x16xf32>,
    return
  }
}

module attributes {stable_mosaic.version = 11 : i64} {
  func.func @_frame_kernel(%arg0: memref<32x8xf32, #tpu.memory_space<vmem>>, %arg1: memref<8x16xf32, #tpu.memory_space<vmem>>, %arg2: memref<1x16xf32, #tpu.memory_space<vmem>>, %arg3: memref<1x16xf32, #tpu.memory_space<vmem>>, %arg4: memref<1x16xf32, #tpu.memory_space<vmem>>, %arg5: memref<16x1xf32, #tpu.memory_space<vmem>>, %arg6: memref<1x1xf32, #tpu.memory_space<vmem>>, %arg7: memref<32x1xf32, #tpu.memory_space<vmem>>) attributes {dimension_semantics = [], scalar_prefetch = 0 : i64, scratch_operands = 0 : i64, tpu.core_type = #tpu.core_type<tc>} {
    %c0 = arith.constant 0 : index
    %c0_0 = arith.constant 0 : index
    %0 = vector.load %arg0[%c0, %c0_0] : memref<32x8xf32, #tpu.memory_space<vmem>>, vector<32x8xf32>
    %1 = tpu.iota {dimensions = array<i32: 1>} : vector<32x8xi32>
    %2 = vector.extract_strided_slice %0 {offsets = [0, 1], sizes = [32, 7], strides = [1, 1]} : vector<32x8xf32> to vector<32x7xf32>
    %3 = vector.extract_strided_slice %0 {offsets = [0, 0], sizes = [32, 1], strides = [1, 1]} : vector<32x8xf32> to vector<32x1xf32>
    %4 = tpu.concatenate %2, %3 in 1 : vector<32x7xf32>, vector<32x1xf32> -> vector<32x8xf32>
    %5 = vector.extract_strided_slice %0 {offsets = [0, 7], sizes = [32, 1], strides = [1, 1]} : vector<32x8xf32> to vector<32x1xf32>
    %6 = vector.extract_strided_slice %0 {offsets = [0, 0], sizes = [32, 7], strides = [1, 1]} : vector<32x8xf32> to vector<32x7xf32>
    %7 = tpu.concatenate %5, %6 in 1 : vector<32x1xf32>, vector<32x7xf32> -> vector<32x8xf32>
    %c2_i32 = arith.constant 2 : i32
    %c0_i32 = arith.constant 0 : i32
    %8 = arith.cmpi eq, %c2_i32, %c0_i32 : i32
    %c1_i32 = arith.constant 1 : i32
    %9 = arith.select %8, %c1_i32, %c2_i32 : i32
    %10 = vector.broadcast %9 : i32 to vector<32x8xi32>
    %11 = arith.remsi %1, %10 : vector<32x8xi32>
    %c0_i32_1 = arith.constant 0 : i32
    %12 = vector.broadcast %c0_i32_1 : i32 to vector<32x8xi32>
    %13 = arith.cmpi ne, %11, %12 : vector<32x8xi32>
    %c0_i32_2 = arith.constant 0 : i32
    %14 = vector.broadcast %c0_i32_2 : i32 to vector<32x8xi32>
    %15 = arith.cmpi slt, %11, %14 : vector<32x8xi32>
    %c0_i32_3 = arith.constant 0 : i32
    %16 = arith.cmpi slt, %9, %c0_i32_3 : i32
    %17 = vector.broadcast %16 : i1 to vector<32x8xi1>
    %18 = vector.broadcast %17 : vector<32x8xi1> to vector<32x8xi1>
    %19 = arith.xori %15, %18 : vector<32x8xi1>
    %20 = arith.andi %19, %13 : vector<32x8xi1>
    %21 = vector.broadcast %9 : i32 to vector<32x8xi32>
    %22 = arith.addi %11, %21 : vector<32x8xi32>
    %23 = arith.select %20, %22, %11 : vector<32x8xi1>, vector<32x8xi32>
    %c0_i32_4 = arith.constant 0 : i32
    %24 = vector.broadcast %c0_i32_4 : i32 to vector<32x8xi32>
    %25 = arith.cmpi eq, %23, %24 : vector<32x8xi32>
    %c1_i32_5 = arith.constant 1 : i32
    %26 = vector.broadcast %c1_i32_5 : i32 to vector<32x8xi32>
    %27 = arith.addi %1, %26 : vector<32x8xi32>
    %c8_i32 = arith.constant 8 : i32
    %28 = vector.broadcast %c8_i32 : i32 to vector<32x8xi32>
    %29 = arith.cmpi slt, %27, %28 : vector<32x8xi32>
    %30 = arith.andi %25, %29 : vector<32x8xi1>
    %c2_i32_6 = arith.constant 2 : i32
    %c0_i32_7 = arith.constant 0 : i32
    %31 = arith.cmpi eq, %c2_i32_6, %c0_i32_7 : i32
    %c1_i32_8 = arith.constant 1 : i32
    %32 = arith.select %31, %c1_i32_8, %c2_i32_6 : i32
    %33 = vector.broadcast %32 : i32 to vector<32x8xi32>
    %34 = arith.remsi %1, %33 : vector<32x8xi32>
    %c0_i32_9 = arith.constant 0 : i32
    %35 = vector.broadcast %c0_i32_9 : i32 to vector<32x8xi32>
    %36 = arith.cmpi ne, %34, %35 : vector<32x8xi32>
    %c0_i32_10 = arith.constant 0 : i32
    %37 = vector.broadcast %c0_i32_10 : i32 to vector<32x8xi32>
    %38 = arith.cmpi slt, %34, %37 : vector<32x8xi32>
    %c0_i32_11 = arith.constant 0 : i32
    %39 = arith.cmpi slt, %32, %c0_i32_11 : i32
    %40 = vector.broadcast %39 : i1 to vector<32x8xi1>
    %41 = vector.broadcast %40 : vector<32x8xi1> to vector<32x8xi1>
    %42 = arith.xori %38, %41 : vector<32x8xi1>
    %43 = arith.andi %42, %36 : vector<32x8xi1>
    %44 = vector.broadcast %32 : i32 to vector<32x8xi32>
    %45 = arith.addi %34, %44 : vector<32x8xi32>
    %46 = arith.select %43, %45, %34 : vector<32x8xi1>, vector<32x8xi32>
    %c1_i32_12 = arith.constant 1 : i32
    %47 = vector.broadcast %c1_i32_12 : i32 to vector<32x8xi32>
    %48 = arith.cmpi eq, %46, %47 : vector<32x8xi32>
    %c1_i32_13 = arith.constant 1 : i32
    %49 = vector.broadcast %c1_i32_13 : i32 to vector<32x8xi32>
    %50 = arith.cmpi sge, %1, %49 : vector<32x8xi32>
    %51 = arith.andi %48, %50 : vector<32x8xi1>
    %52 = arith.minimumf %0, %4 : vector<32x8xf32>
    %53 = arith.maximumf %0, %7 : vector<32x8xf32>
    %54 = arith.select %51, %53, %0 : vector<32x8xi1>, vector<32x8xf32>
    %55 = arith.select %30, %52, %54 : vector<32x8xi1>, vector<32x8xf32>
    %56 = vector.extract_strided_slice %55 {offsets = [0, 1], sizes = [32, 7], strides = [1, 1]} : vector<32x8xf32> to vector<32x7xf32>
    %57 = vector.extract_strided_slice %55 {offsets = [0, 0], sizes = [32, 1], strides = [1, 1]} : vector<32x8xf32> to vector<32x1xf32>
    %58 = tpu.concatenate %56, %57 in 1 : vector<32x7xf32>, vector<32x1xf32> -> vector<32x8xf32>
    %59 = vector.extract_strided_slice %55 {offsets = [0, 7], sizes = [32, 1], strides = [1, 1]} : vector<32x8xf32> to vector<32x1xf32>
    %60 = vector.extract_strided_slice %55 {offsets = [0, 0], sizes = [32, 7], strides = [1, 1]} : vector<32x8xf32> to vector<32x7xf32>
    %61 = tpu.concatenate %59, %60 in 1 : vector<32x1xf32>, vector<32x7xf32> -> vector<32x8xf32>
    %c2_i32_14 = arith.constant 2 : i32
    %c0_i32_15 = arith.constant 0 : i32
    %62 = arith.cmpi eq, %c2_i32_14, %c0_i32_15 : i32
    %c1_i32_16 = arith.constant 1 : i32
    %63 = arith.select %62, %c1_i32_16, %c2_i32_14 : i32
    %64 = vector.broadcast %63 : i32 to vector<32x8xi32>
    %65 = arith.remsi %1, %64 : vector<32x8xi32>
    %c0_i32_17 = arith.constant 0 : i32
    %66 = vector.broadcast %c0_i32_17 : i32 to vector<32x8xi32>
    %67 = arith.cmpi ne, %65, %66 : vector<32x8xi32>
    %c0_i32_18 = arith.constant 0 : i32
    %68 = vector.broadcast %c0_i32_18 : i32 to vector<32x8xi32>
    %69 = arith.cmpi slt, %65, %68 : vector<32x8xi32>
    %c0_i32_19 = arith.constant 0 : i32
    %70 = arith.cmpi slt, %63, %c0_i32_19 : i32
    %71 = vector.broadcast %70 : i1 to vector<32x8xi1>
    %72 = vector.broadcast %71 : vector<32x8xi1> to vector<32x8xi1>
    %73 = arith.xori %69, %72 : vector<32x8xi1>
    %74 = arith.andi %73, %67 : vector<32x8xi1>
    %75 = vector.broadcast %63 : i32 to vector<32x8xi32>
    %76 = arith.addi %65, %75 : vector<32x8xi32>
    %77 = arith.select %74, %76, %65 : vector<32x8xi1>, vector<32x8xi32>
    %c1_i32_20 = arith.constant 1 : i32
    %78 = vector.broadcast %c1_i32_20 : i32 to vector<32x8xi32>
    %79 = arith.cmpi eq, %77, %78 : vector<32x8xi32>
    %c1_i32_21 = arith.constant 1 : i32
    %80 = vector.broadcast %c1_i32_21 : i32 to vector<32x8xi32>
    %81 = arith.addi %1, %80 : vector<32x8xi32>
    %c8_i32_22 = arith.constant 8 : i32
    %82 = vector.broadcast %c8_i32_22 : i32 to vector<32x8xi32>
    %83 = arith.cmpi slt, %81, %82 : vector<32x8xi32>
    %84 = arith.andi %79, %83 : vector<32x8xi1>
    %c2_i32_23 = arith.constant 2 : i32
    %c0_i32_24 = arith.constant 0 : i32
    %85 = arith.cmpi eq, %c2_i32_23, %c0_i32_24 : i32
    %c1_i32_25 = arith.constant 1 : i32
    %86 = arith.select %85, %c1_i32_25, %c2_i32_23 : i32
    %87 = vector.broadcast %86 : i32 to vector<32x8xi32>
    %88 = arith.remsi %1, %87 : vector<32x8xi32>
    %c0_i32_26 = arith.constant 0 : i32
    %89 = vector.broadcast %c0_i32_26 : i32 to vector<32x8xi32>
    %90 = arith.cmpi ne, %88, %89 : vector<32x8xi32>
    %c0_i32_27 = arith.constant 0 : i32
    %91 = vector.broadcast %c0_i32_27 : i32 to vector<32x8xi32>
    %92 = arith.cmpi slt, %88, %91 : vector<32x8xi32>
    %c0_i32_28 = arith.constant 0 : i32
    %93 = arith.cmpi slt, %86, %c0_i32_28 : i32
    %94 = vector.broadcast %93 : i1 to vector<32x8xi1>
    %95 = vector.broadcast %94 : vector<32x8xi1> to vector<32x8xi1>
    %96 = arith.xori %92, %95 : vector<32x8xi1>
    %97 = arith.andi %96, %90 : vector<32x8xi1>
    %98 = vector.broadcast %86 : i32 to vector<32x8xi32>
    %99 = arith.addi %88, %98 : vector<32x8xi32>
    %100 = arith.select %97, %99, %88 : vector<32x8xi1>, vector<32x8xi32>
    %c0_i32_29 = arith.constant 0 : i32
    %101 = vector.broadcast %c0_i32_29 : i32 to vector<32x8xi32>
    %102 = arith.cmpi eq, %100, %101 : vector<32x8xi32>
    %c2_i32_30 = arith.constant 2 : i32
    %103 = vector.broadcast %c2_i32_30 : i32 to vector<32x8xi32>
    %104 = arith.cmpi sge, %1, %103 : vector<32x8xi32>
    %105 = arith.andi %102, %104 : vector<32x8xi1>
    %106 = arith.minimumf %55, %58 : vector<32x8xf32>
    %107 = arith.maximumf %55, %61 : vector<32x8xf32>
    %108 = arith.select %105, %107, %55 : vector<32x8xi1>, vector<32x8xf32>
    %109 = arith.select %84, %106, %108 : vector<32x8xi1>, vector<32x8xf32>
    %110 = vector.extract_strided_slice %109 {offsets = [0, 1], sizes = [32, 7], strides = [1, 1]} : vector<32x8xf32> to vector<32x7xf32>
    %111 = vector.extract_strided_slice %109 {offsets = [0, 0], sizes = [32, 1], strides = [1, 1]} : vector<32x8xf32> to vector<32x1xf32>
    %112 = tpu.concatenate %110, %111 in 1 : vector<32x7xf32>, vector<32x1xf32> -> vector<32x8xf32>
    %113 = vector.extract_strided_slice %109 {offsets = [0, 7], sizes = [32, 1], strides = [1, 1]} : vector<32x8xf32> to vector<32x1xf32>
    %114 = vector.extract_strided_slice %109 {offsets = [0, 0], sizes = [32, 7], strides = [1, 1]} : vector<32x8xf32> to vector<32x7xf32>
    %115 = tpu.concatenate %113, %114 in 1 : vector<32x1xf32>, vector<32x7xf32> -> vector<32x8xf32>
    %c2_i32_31 = arith.constant 2 : i32
    %c0_i32_32 = arith.constant 0 : i32
    %116 = arith.cmpi eq, %c2_i32_31, %c0_i32_32 : i32
    %c1_i32_33 = arith.constant 1 : i32
    %117 = arith.select %116, %c1_i32_33, %c2_i32_31 : i32
    %118 = vector.broadcast %117 : i32 to vector<32x8xi32>
    %119 = arith.remsi %1, %118 : vector<32x8xi32>
    %c0_i32_34 = arith.constant 0 : i32
    %120 = vector.broadcast %c0_i32_34 : i32 to vector<32x8xi32>
    %121 = arith.cmpi ne, %119, %120 : vector<32x8xi32>
    %c0_i32_35 = arith.constant 0 : i32
    %122 = vector.broadcast %c0_i32_35 : i32 to vector<32x8xi32>
    %123 = arith.cmpi slt, %119, %122 : vector<32x8xi32>
    %c0_i32_36 = arith.constant 0 : i32
    %124 = arith.cmpi slt, %117, %c0_i32_36 : i32
    %125 = vector.broadcast %124 : i1 to vector<32x8xi1>
    %126 = vector.broadcast %125 : vector<32x8xi1> to vector<32x8xi1>
    %127 = arith.xori %123, %126 : vector<32x8xi1>
    %128 = arith.andi %127, %121 : vector<32x8xi1>
    %129 = vector.broadcast %117 : i32 to vector<32x8xi32>
    %130 = arith.addi %119, %129 : vector<32x8xi32>
    %131 = arith.select %128, %130, %119 : vector<32x8xi1>, vector<32x8xi32>
    %c0_i32_37 = arith.constant 0 : i32
    %132 = vector.broadcast %c0_i32_37 : i32 to vector<32x8xi32>
    %133 = arith.cmpi eq, %131, %132 : vector<32x8xi32>
    %c1_i32_38 = arith.constant 1 : i32
    %134 = vector.broadcast %c1_i32_38 : i32 to vector<32x8xi32>
    %135 = arith.addi %1, %134 : vector<32x8xi32>
    %c8_i32_39 = arith.constant 8 : i32
    %136 = vector.broadcast %c8_i32_39 : i32 to vector<32x8xi32>
    %137 = arith.cmpi slt, %135, %136 : vector<32x8xi32>
    %138 = arith.andi %133, %137 : vector<32x8xi1>
    %c2_i32_40 = arith.constant 2 : i32
    %c0_i32_41 = arith.constant 0 : i32
    %139 = arith.cmpi eq, %c2_i32_40, %c0_i32_41 : i32
    %c1_i32_42 = arith.constant 1 : i32
    %140 = arith.select %139, %c1_i32_42, %c2_i32_40 : i32
    %141 = vector.broadcast %140 : i32 to vector<32x8xi32>
    %142 = arith.remsi %1, %141 : vector<32x8xi32>
    %c0_i32_43 = arith.constant 0 : i32
    %143 = vector.broadcast %c0_i32_43 : i32 to vector<32x8xi32>
    %144 = arith.cmpi ne, %142, %143 : vector<32x8xi32>
    %c0_i32_44 = arith.constant 0 : i32
    %145 = vector.broadcast %c0_i32_44 : i32 to vector<32x8xi32>
    %146 = arith.cmpi slt, %142, %145 : vector<32x8xi32>
    %c0_i32_45 = arith.constant 0 : i32
    %147 = arith.cmpi slt, %140, %c0_i32_45 : i32
    %148 = vector.broadcast %147 : i1 to vector<32x8xi1>
    %149 = vector.broadcast %148 : vector<32x8xi1> to vector<32x8xi1>
    %150 = arith.xori %146, %149 : vector<32x8xi1>
    %151 = arith.andi %150, %144 : vector<32x8xi1>
    %152 = vector.broadcast %140 : i32 to vector<32x8xi32>
    %153 = arith.addi %142, %152 : vector<32x8xi32>
    %154 = arith.select %151, %153, %142 : vector<32x8xi1>, vector<32x8xi32>
    %c1_i32_46 = arith.constant 1 : i32
    %155 = vector.broadcast %c1_i32_46 : i32 to vector<32x8xi32>
    %156 = arith.cmpi eq, %154, %155 : vector<32x8xi32>
    %c1_i32_47 = arith.constant 1 : i32
    %157 = vector.broadcast %c1_i32_47 : i32 to vector<32x8xi32>
    %158 = arith.cmpi sge, %1, %157 : vector<32x8xi32>
    %159 = arith.andi %156, %158 : vector<32x8xi1>
    %160 = arith.minimumf %109, %112 : vector<32x8xf32>
    %161 = arith.maximumf %109, %115 : vector<32x8xf32>
    %162 = arith.select %159, %161, %109 : vector<32x8xi1>, vector<32x8xf32>
    %163 = arith.select %138, %160, %162 : vector<32x8xi1>, vector<32x8xf32>
    %164 = vector.extract_strided_slice %163 {offsets = [0, 1], sizes = [32, 7], strides = [1, 1]} : vector<32x8xf32> to vector<32x7xf32>
    %165 = vector.extract_strided_slice %163 {offsets = [0, 0], sizes = [32, 1], strides = [1, 1]} : vector<32x8xf32> to vector<32x1xf32>
    %166 = tpu.concatenate %164, %165 in 1 : vector<32x7xf32>, vector<32x1xf32> -> vector<32x8xf32>
    %167 = vector.extract_strided_slice %163 {offsets = [0, 7], sizes = [32, 1], strides = [1, 1]} : vector<32x8xf32> to vector<32x1xf32>
    %168 = vector.extract_strided_slice %163 {offsets = [0, 0], sizes = [32, 7], strides = [1, 1]} : vector<32x8xf32> to vector<32x7xf32>
    %169 = tpu.concatenate %167, %168 in 1 : vector<32x1xf32>, vector<32x7xf32> -> vector<32x8xf32>
    %c2_i32_48 = arith.constant 2 : i32
    %c0_i32_49 = arith.constant 0 : i32
    %170 = arith.cmpi eq, %c2_i32_48, %c0_i32_49 : i32
    %c1_i32_50 = arith.constant 1 : i32
    %171 = arith.select %170, %c1_i32_50, %c2_i32_48 : i32
    %172 = vector.broadcast %171 : i32 to vector<32x8xi32>
    %173 = arith.remsi %1, %172 : vector<32x8xi32>
    %c0_i32_51 = arith.constant 0 : i32
    %174 = vector.broadcast %c0_i32_51 : i32 to vector<32x8xi32>
    %175 = arith.cmpi ne, %173, %174 : vector<32x8xi32>
    %c0_i32_52 = arith.constant 0 : i32
    %176 = vector.broadcast %c0_i32_52 : i32 to vector<32x8xi32>
    %177 = arith.cmpi slt, %173, %176 : vector<32x8xi32>
    %c0_i32_53 = arith.constant 0 : i32
    %178 = arith.cmpi slt, %171, %c0_i32_53 : i32
    %179 = vector.broadcast %178 : i1 to vector<32x8xi1>
    %180 = vector.broadcast %179 : vector<32x8xi1> to vector<32x8xi1>
    %181 = arith.xori %177, %180 : vector<32x8xi1>
    %182 = arith.andi %181, %175 : vector<32x8xi1>
    %183 = vector.broadcast %171 : i32 to vector<32x8xi32>
    %184 = arith.addi %173, %183 : vector<32x8xi32>
    %185 = arith.select %182, %184, %173 : vector<32x8xi1>, vector<32x8xi32>
    %c1_i32_54 = arith.constant 1 : i32
    %186 = vector.broadcast %c1_i32_54 : i32 to vector<32x8xi32>
    %187 = arith.cmpi eq, %185, %186 : vector<32x8xi32>
    %c1_i32_55 = arith.constant 1 : i32
    %188 = vector.broadcast %c1_i32_55 : i32 to vector<32x8xi32>
    %189 = arith.addi %1, %188 : vector<32x8xi32>
    %c8_i32_56 = arith.constant 8 : i32
    %190 = vector.broadcast %c8_i32_56 : i32 to vector<32x8xi32>
    %191 = arith.cmpi slt, %189, %190 : vector<32x8xi32>
    %192 = arith.andi %187, %191 : vector<32x8xi1>
    %c2_i32_57 = arith.constant 2 : i32
    %c0_i32_58 = arith.constant 0 : i32
    %193 = arith.cmpi eq, %c2_i32_57, %c0_i32_58 : i32
    %c1_i32_59 = arith.constant 1 : i32
    %194 = arith.select %193, %c1_i32_59, %c2_i32_57 : i32
    %195 = vector.broadcast %194 : i32 to vector<32x8xi32>
    %196 = arith.remsi %1, %195 : vector<32x8xi32>
    %c0_i32_60 = arith.constant 0 : i32
    %197 = vector.broadcast %c0_i32_60 : i32 to vector<32x8xi32>
    %198 = arith.cmpi ne, %196, %197 : vector<32x8xi32>
    %c0_i32_61 = arith.constant 0 : i32
    %199 = vector.broadcast %c0_i32_61 : i32 to vector<32x8xi32>
    %200 = arith.cmpi slt, %196, %199 : vector<32x8xi32>
    %c0_i32_62 = arith.constant 0 : i32
    %201 = arith.cmpi slt, %194, %c0_i32_62 : i32
    %202 = vector.broadcast %201 : i1 to vector<32x8xi1>
    %203 = vector.broadcast %202 : vector<32x8xi1> to vector<32x8xi1>
    %204 = arith.xori %200, %203 : vector<32x8xi1>
    %205 = arith.andi %204, %198 : vector<32x8xi1>
    %206 = vector.broadcast %194 : i32 to vector<32x8xi32>
    %207 = arith.addi %196, %206 : vector<32x8xi32>
    %208 = arith.select %205, %207, %196 : vector<32x8xi1>, vector<32x8xi32>
    %c0_i32_63 = arith.constant 0 : i32
    %209 = vector.broadcast %c0_i32_63 : i32 to vector<32x8xi32>
    %210 = arith.cmpi eq, %208, %209 : vector<32x8xi32>
    %c2_i32_64 = arith.constant 2 : i32
    %211 = vector.broadcast %c2_i32_64 : i32 to vector<32x8xi32>
    %212 = arith.cmpi sge, %1, %211 : vector<32x8xi32>
    %213 = arith.andi %210, %212 : vector<32x8xi1>
    %214 = arith.minimumf %163, %166 : vector<32x8xf32>
    %215 = arith.maximumf %163, %169 : vector<32x8xf32>
    %216 = arith.select %213, %215, %163 : vector<32x8xi1>, vector<32x8xf32>
    %217 = arith.select %192, %214, %216 : vector<32x8xi1>, vector<32x8xf32>
    %218 = vector.extract_strided_slice %217 {offsets = [0, 1], sizes = [32, 7], strides = [1, 1]} : vector<32x8xf32> to vector<32x7xf32>
    %219 = vector.extract_strided_slice %217 {offsets = [0, 0], sizes = [32, 1], strides = [1, 1]} : vector<32x8xf32> to vector<32x1xf32>
    %220 = tpu.concatenate %218, %219 in 1 : vector<32x7xf32>, vector<32x1xf32> -> vector<32x8xf32>
    %221 = vector.extract_strided_slice %217 {offsets = [0, 7], sizes = [32, 1], strides = [1, 1]} : vector<32x8xf32> to vector<32x1xf32>
    %222 = vector.extract_strided_slice %217 {offsets = [0, 0], sizes = [32, 7], strides = [1, 1]} : vector<32x8xf32> to vector<32x7xf32>
    %223 = tpu.concatenate %221, %222 in 1 : vector<32x1xf32>, vector<32x7xf32> -> vector<32x8xf32>
    %c2_i32_65 = arith.constant 2 : i32
    %c0_i32_66 = arith.constant 0 : i32
    %224 = arith.cmpi eq, %c2_i32_65, %c0_i32_66 : i32
    %c1_i32_67 = arith.constant 1 : i32
    %225 = arith.select %224, %c1_i32_67, %c2_i32_65 : i32
    %226 = vector.broadcast %225 : i32 to vector<32x8xi32>
    %227 = arith.remsi %1, %226 : vector<32x8xi32>
    %c0_i32_68 = arith.constant 0 : i32
    %228 = vector.broadcast %c0_i32_68 : i32 to vector<32x8xi32>
    %229 = arith.cmpi ne, %227, %228 : vector<32x8xi32>
    %c0_i32_69 = arith.constant 0 : i32
    %230 = vector.broadcast %c0_i32_69 : i32 to vector<32x8xi32>
    %231 = arith.cmpi slt, %227, %230 : vector<32x8xi32>
    %c0_i32_70 = arith.constant 0 : i32
    %232 = arith.cmpi slt, %225, %c0_i32_70 : i32
    %233 = vector.broadcast %232 : i1 to vector<32x8xi1>
    %234 = vector.broadcast %233 : vector<32x8xi1> to vector<32x8xi1>
    %235 = arith.xori %231, %234 : vector<32x8xi1>
    %236 = arith.andi %235, %229 : vector<32x8xi1>
    %237 = vector.broadcast %225 : i32 to vector<32x8xi32>
    %238 = arith.addi %227, %237 : vector<32x8xi32>
    %239 = arith.select %236, %238, %227 : vector<32x8xi1>, vector<32x8xi32>
    %c0_i32_71 = arith.constant 0 : i32
    %240 = vector.broadcast %c0_i32_71 : i32 to vector<32x8xi32>
    %241 = arith.cmpi eq, %239, %240 : vector<32x8xi32>
    %c1_i32_72 = arith.constant 1 : i32
    %242 = vector.broadcast %c1_i32_72 : i32 to vector<32x8xi32>
    %243 = arith.addi %1, %242 : vector<32x8xi32>
    %c8_i32_73 = arith.constant 8 : i32
    %244 = vector.broadcast %c8_i32_73 : i32 to vector<32x8xi32>
    %245 = arith.cmpi slt, %243, %244 : vector<32x8xi32>
    %246 = arith.andi %241, %245 : vector<32x8xi1>
    %c2_i32_74 = arith.constant 2 : i32
    %c0_i32_75 = arith.constant 0 : i32
    %247 = arith.cmpi eq, %c2_i32_74, %c0_i32_75 : i32
    %c1_i32_76 = arith.constant 1 : i32
    %248 = arith.select %247, %c1_i32_76, %c2_i32_74 : i32
    %249 = vector.broadcast %248 : i32 to vector<32x8xi32>
    %250 = arith.remsi %1, %249 : vector<32x8xi32>
    %c0_i32_77 = arith.constant 0 : i32
    %251 = vector.broadcast %c0_i32_77 : i32 to vector<32x8xi32>
    %252 = arith.cmpi ne, %250, %251 : vector<32x8xi32>
    %c0_i32_78 = arith.constant 0 : i32
    %253 = vector.broadcast %c0_i32_78 : i32 to vector<32x8xi32>
    %254 = arith.cmpi slt, %250, %253 : vector<32x8xi32>
    %c0_i32_79 = arith.constant 0 : i32
    %255 = arith.cmpi slt, %248, %c0_i32_79 : i32
    %256 = vector.broadcast %255 : i1 to vector<32x8xi1>
    %257 = vector.broadcast %256 : vector<32x8xi1> to vector<32x8xi1>
    %258 = arith.xori %254, %257 : vector<32x8xi1>
    %259 = arith.andi %258, %252 : vector<32x8xi1>
    %260 = vector.broadcast %248 : i32 to vector<32x8xi32>
    %261 = arith.addi %250, %260 : vector<32x8xi32>
    %262 = arith.select %259, %261, %250 : vector<32x8xi1>, vector<32x8xi32>
    %c1_i32_80 = arith.constant 1 : i32
    %263 = vector.broadcast %c1_i32_80 : i32 to vector<32x8xi32>
    %264 = arith.cmpi eq, %262, %263 : vector<32x8xi32>
    %c1_i32_81 = arith.constant 1 : i32
    %265 = vector.broadcast %c1_i32_81 : i32 to vector<32x8xi32>
    %266 = arith.cmpi sge, %1, %265 : vector<32x8xi32>
    %267 = arith.andi %264, %266 : vector<32x8xi1>
    %268 = arith.minimumf %217, %220 : vector<32x8xf32>
    %269 = arith.maximumf %217, %223 : vector<32x8xf32>
    %270 = arith.select %267, %269, %217 : vector<32x8xi1>, vector<32x8xf32>
    %271 = arith.select %246, %268, %270 : vector<32x8xi1>, vector<32x8xf32>
    %272 = vector.extract_strided_slice %271 {offsets = [0, 1], sizes = [32, 7], strides = [1, 1]} : vector<32x8xf32> to vector<32x7xf32>
    %273 = vector.extract_strided_slice %271 {offsets = [0, 0], sizes = [32, 1], strides = [1, 1]} : vector<32x8xf32> to vector<32x1xf32>
    %274 = tpu.concatenate %272, %273 in 1 : vector<32x7xf32>, vector<32x1xf32> -> vector<32x8xf32>
    %275 = vector.extract_strided_slice %271 {offsets = [0, 7], sizes = [32, 1], strides = [1, 1]} : vector<32x8xf32> to vector<32x1xf32>
    %276 = vector.extract_strided_slice %271 {offsets = [0, 0], sizes = [32, 7], strides = [1, 1]} : vector<32x8xf32> to vector<32x7xf32>
    %277 = tpu.concatenate %275, %276 in 1 : vector<32x1xf32>, vector<32x7xf32> -> vector<32x8xf32>
    %c2_i32_82 = arith.constant 2 : i32
    %c0_i32_83 = arith.constant 0 : i32
    %278 = arith.cmpi eq, %c2_i32_82, %c0_i32_83 : i32
    %c1_i32_84 = arith.constant 1 : i32
    %279 = arith.select %278, %c1_i32_84, %c2_i32_82 : i32
    %280 = vector.broadcast %279 : i32 to vector<32x8xi32>
    %281 = arith.remsi %1, %280 : vector<32x8xi32>
    %c0_i32_85 = arith.constant 0 : i32
    %282 = vector.broadcast %c0_i32_85 : i32 to vector<32x8xi32>
    %283 = arith.cmpi ne, %281, %282 : vector<32x8xi32>
    %c0_i32_86 = arith.constant 0 : i32
    %284 = vector.broadcast %c0_i32_86 : i32 to vector<32x8xi32>
    %285 = arith.cmpi slt, %281, %284 : vector<32x8xi32>
    %c0_i32_87 = arith.constant 0 : i32
    %286 = arith.cmpi slt, %279, %c0_i32_87 : i32
    %287 = vector.broadcast %286 : i1 to vector<32x8xi1>
    %288 = vector.broadcast %287 : vector<32x8xi1> to vector<32x8xi1>
    %289 = arith.xori %285, %288 : vector<32x8xi1>
    %290 = arith.andi %289, %283 : vector<32x8xi1>
    %291 = vector.broadcast %279 : i32 to vector<32x8xi32>
    %292 = arith.addi %281, %291 : vector<32x8xi32>
    %293 = arith.select %290, %292, %281 : vector<32x8xi1>, vector<32x8xi32>
    %c1_i32_88 = arith.constant 1 : i32
    %294 = vector.broadcast %c1_i32_88 : i32 to vector<32x8xi32>
    %295 = arith.cmpi eq, %293, %294 : vector<32x8xi32>
    %c1_i32_89 = arith.constant 1 : i32
    %296 = vector.broadcast %c1_i32_89 : i32 to vector<32x8xi32>
    %297 = arith.addi %1, %296 : vector<32x8xi32>
    %c8_i32_90 = arith.constant 8 : i32
    %298 = vector.broadcast %c8_i32_90 : i32 to vector<32x8xi32>
    %299 = arith.cmpi slt, %297, %298 : vector<32x8xi32>
    %300 = arith.andi %295, %299 : vector<32x8xi1>
    %c2_i32_91 = arith.constant 2 : i32
    %c0_i32_92 = arith.constant 0 : i32
    %301 = arith.cmpi eq, %c2_i32_91, %c0_i32_92 : i32
    %c1_i32_93 = arith.constant 1 : i32
    %302 = arith.select %301, %c1_i32_93, %c2_i32_91 : i32
    %303 = vector.broadcast %302 : i32 to vector<32x8xi32>
    %304 = arith.remsi %1, %303 : vector<32x8xi32>
    %c0_i32_94 = arith.constant 0 : i32
    %305 = vector.broadcast %c0_i32_94 : i32 to vector<32x8xi32>
    %306 = arith.cmpi ne, %304, %305 : vector<32x8xi32>
    %c0_i32_95 = arith.constant 0 : i32
    %307 = vector.broadcast %c0_i32_95 : i32 to vector<32x8xi32>
    %308 = arith.cmpi slt, %304, %307 : vector<32x8xi32>
    %c0_i32_96 = arith.constant 0 : i32
    %309 = arith.cmpi slt, %302, %c0_i32_96 : i32
    %310 = vector.broadcast %309 : i1 to vector<32x8xi1>
    %311 = vector.broadcast %310 : vector<32x8xi1> to vector<32x8xi1>
    %312 = arith.xori %308, %311 : vector<32x8xi1>
    %313 = arith.andi %312, %306 : vector<32x8xi1>
    %314 = vector.broadcast %302 : i32 to vector<32x8xi32>
    %315 = arith.addi %304, %314 : vector<32x8xi32>
    %316 = arith.select %313, %315, %304 : vector<32x8xi1>, vector<32x8xi32>
    %c0_i32_97 = arith.constant 0 : i32
    %317 = vector.broadcast %c0_i32_97 : i32 to vector<32x8xi32>
    %318 = arith.cmpi eq, %316, %317 : vector<32x8xi32>
    %c2_i32_98 = arith.constant 2 : i32
    %319 = vector.broadcast %c2_i32_98 : i32 to vector<32x8xi32>
    %320 = arith.cmpi sge, %1, %319 : vector<32x8xi32>
    %321 = arith.andi %318, %320 : vector<32x8xi1>
    %322 = arith.minimumf %271, %274 : vector<32x8xf32>
    %323 = arith.maximumf %271, %277 : vector<32x8xf32>
    %324 = arith.select %321, %323, %271 : vector<32x8xi1>, vector<32x8xf32>
    %325 = arith.select %300, %322, %324 : vector<32x8xi1>, vector<32x8xf32>
    %326 = vector.extract_strided_slice %325 {offsets = [0, 1], sizes = [32, 7], strides = [1, 1]} : vector<32x8xf32> to vector<32x7xf32>
    %327 = vector.extract_strided_slice %325 {offsets = [0, 0], sizes = [32, 1], strides = [1, 1]} : vector<32x8xf32> to vector<32x1xf32>
    %328 = tpu.concatenate %326, %327 in 1 : vector<32x7xf32>, vector<32x1xf32> -> vector<32x8xf32>
    %329 = vector.extract_strided_slice %325 {offsets = [0, 7], sizes = [32, 1], strides = [1, 1]} : vector<32x8xf32> to vector<32x1xf32>
    %330 = vector.extract_strided_slice %325 {offsets = [0, 0], sizes = [32, 7], strides = [1, 1]} : vector<32x8xf32> to vector<32x7xf32>
    %331 = tpu.concatenate %329, %330 in 1 : vector<32x1xf32>, vector<32x7xf32> -> vector<32x8xf32>
    %c2_i32_99 = arith.constant 2 : i32
    %c0_i32_100 = arith.constant 0 : i32
    %332 = arith.cmpi eq, %c2_i32_99, %c0_i32_100 : i32
    %c1_i32_101 = arith.constant 1 : i32
    %333 = arith.select %332, %c1_i32_101, %c2_i32_99 : i32
    %334 = vector.broadcast %333 : i32 to vector<32x8xi32>
    %335 = arith.remsi %1, %334 : vector<32x8xi32>
    %c0_i32_102 = arith.constant 0 : i32
    %336 = vector.broadcast %c0_i32_102 : i32 to vector<32x8xi32>
    %337 = arith.cmpi ne, %335, %336 : vector<32x8xi32>
    %c0_i32_103 = arith.constant 0 : i32
    %338 = vector.broadcast %c0_i32_103 : i32 to vector<32x8xi32>
    %339 = arith.cmpi slt, %335, %338 : vector<32x8xi32>
    %c0_i32_104 = arith.constant 0 : i32
    %340 = arith.cmpi slt, %333, %c0_i32_104 : i32
    %341 = vector.broadcast %340 : i1 to vector<32x8xi1>
    %342 = vector.broadcast %341 : vector<32x8xi1> to vector<32x8xi1>
    %343 = arith.xori %339, %342 : vector<32x8xi1>
    %344 = arith.andi %343, %337 : vector<32x8xi1>
    %345 = vector.broadcast %333 : i32 to vector<32x8xi32>
    %346 = arith.addi %335, %345 : vector<32x8xi32>
    %347 = arith.select %344, %346, %335 : vector<32x8xi1>, vector<32x8xi32>
    %c0_i32_105 = arith.constant 0 : i32
    %348 = vector.broadcast %c0_i32_105 : i32 to vector<32x8xi32>
    %349 = arith.cmpi eq, %347, %348 : vector<32x8xi32>
    %c1_i32_106 = arith.constant 1 : i32
    %350 = vector.broadcast %c1_i32_106 : i32 to vector<32x8xi32>
    %351 = arith.addi %1, %350 : vector<32x8xi32>
    %c8_i32_107 = arith.constant 8 : i32
    %352 = vector.broadcast %c8_i32_107 : i32 to vector<32x8xi32>
    %353 = arith.cmpi slt, %351, %352 : vector<32x8xi32>
    %354 = arith.andi %349, %353 : vector<32x8xi1>
    %c2_i32_108 = arith.constant 2 : i32
    %c0_i32_109 = arith.constant 0 : i32
    %355 = arith.cmpi eq, %c2_i32_108, %c0_i32_109 : i32
    %c1_i32_110 = arith.constant 1 : i32
    %356 = arith.select %355, %c1_i32_110, %c2_i32_108 : i32
    %357 = vector.broadcast %356 : i32 to vector<32x8xi32>
    %358 = arith.remsi %1, %357 : vector<32x8xi32>
    %c0_i32_111 = arith.constant 0 : i32
    %359 = vector.broadcast %c0_i32_111 : i32 to vector<32x8xi32>
    %360 = arith.cmpi ne, %358, %359 : vector<32x8xi32>
    %c0_i32_112 = arith.constant 0 : i32
    %361 = vector.broadcast %c0_i32_112 : i32 to vector<32x8xi32>
    %362 = arith.cmpi slt, %358, %361 : vector<32x8xi32>
    %c0_i32_113 = arith.constant 0 : i32
    %363 = arith.cmpi slt, %356, %c0_i32_113 : i32
    %364 = vector.broadcast %363 : i1 to vector<32x8xi1>
    %365 = vector.broadcast %364 : vector<32x8xi1> to vector<32x8xi1>
    %366 = arith.xori %362, %365 : vector<32x8xi1>
    %367 = arith.andi %366, %360 : vector<32x8xi1>
    %368 = vector.broadcast %356 : i32 to vector<32x8xi32>
    %369 = arith.addi %358, %368 : vector<32x8xi32>
    %370 = arith.select %367, %369, %358 : vector<32x8xi1>, vector<32x8xi32>
    %c1_i32_114 = arith.constant 1 : i32
    %371 = vector.broadcast %c1_i32_114 : i32 to vector<32x8xi32>
    %372 = arith.cmpi eq, %370, %371 : vector<32x8xi32>
    %c1_i32_115 = arith.constant 1 : i32
    %373 = vector.broadcast %c1_i32_115 : i32 to vector<32x8xi32>
    %374 = arith.cmpi sge, %1, %373 : vector<32x8xi32>
    %375 = arith.andi %372, %374 : vector<32x8xi1>
    %376 = arith.minimumf %325, %328 : vector<32x8xf32>
    %377 = arith.maximumf %325, %331 : vector<32x8xf32>
    %378 = arith.select %375, %377, %325 : vector<32x8xi1>, vector<32x8xf32>
    %379 = arith.select %354, %376, %378 : vector<32x8xi1>, vector<32x8xf32>
    %380 = vector.extract_strided_slice %379 {offsets = [0, 1], sizes = [32, 7], strides = [1, 1]} : vector<32x8xf32> to vector<32x7xf32>
    %381 = vector.extract_strided_slice %379 {offsets = [0, 0], sizes = [32, 1], strides = [1, 1]} : vector<32x8xf32> to vector<32x1xf32>
    %382 = tpu.concatenate %380, %381 in 1 : vector<32x7xf32>, vector<32x1xf32> -> vector<32x8xf32>
    %383 = vector.extract_strided_slice %379 {offsets = [0, 7], sizes = [32, 1], strides = [1, 1]} : vector<32x8xf32> to vector<32x1xf32>
    %384 = vector.extract_strided_slice %379 {offsets = [0, 0], sizes = [32, 7], strides = [1, 1]} : vector<32x8xf32> to vector<32x7xf32>
    %385 = tpu.concatenate %383, %384 in 1 : vector<32x1xf32>, vector<32x7xf32> -> vector<32x8xf32>
    %c2_i32_116 = arith.constant 2 : i32
    %c0_i32_117 = arith.constant 0 : i32
    %386 = arith.cmpi eq, %c2_i32_116, %c0_i32_117 : i32
    %c1_i32_118 = arith.constant 1 : i32
    %387 = arith.select %386, %c1_i32_118, %c2_i32_116 : i32
    %388 = vector.broadcast %387 : i32 to vector<32x8xi32>
    %389 = arith.remsi %1, %388 : vector<32x8xi32>
    %c0_i32_119 = arith.constant 0 : i32
    %390 = vector.broadcast %c0_i32_119 : i32 to vector<32x8xi32>
    %391 = arith.cmpi ne, %389, %390 : vector<32x8xi32>
    %c0_i32_120 = arith.constant 0 : i32
    %392 = vector.broadcast %c0_i32_120 : i32 to vector<32x8xi32>
    %393 = arith.cmpi slt, %389, %392 : vector<32x8xi32>
    %c0_i32_121 = arith.constant 0 : i32
    %394 = arith.cmpi slt, %387, %c0_i32_121 : i32
    %395 = vector.broadcast %394 : i1 to vector<32x8xi1>
    %396 = vector.broadcast %395 : vector<32x8xi1> to vector<32x8xi1>
    %397 = arith.xori %393, %396 : vector<32x8xi1>
    %398 = arith.andi %397, %391 : vector<32x8xi1>
    %399 = vector.broadcast %387 : i32 to vector<32x8xi32>
    %400 = arith.addi %389, %399 : vector<32x8xi32>
    %401 = arith.select %398, %400, %389 : vector<32x8xi1>, vector<32x8xi32>
    %c1_i32_122 = arith.constant 1 : i32
    %402 = vector.broadcast %c1_i32_122 : i32 to vector<32x8xi32>
    %403 = arith.cmpi eq, %401, %402 : vector<32x8xi32>
    %c1_i32_123 = arith.constant 1 : i32
    %404 = vector.broadcast %c1_i32_123 : i32 to vector<32x8xi32>
    %405 = arith.addi %1, %404 : vector<32x8xi32>
    %c8_i32_124 = arith.constant 8 : i32
    %406 = vector.broadcast %c8_i32_124 : i32 to vector<32x8xi32>
    %407 = arith.cmpi slt, %405, %406 : vector<32x8xi32>
    %408 = arith.andi %403, %407 : vector<32x8xi1>
    %c2_i32_125 = arith.constant 2 : i32
    %c0_i32_126 = arith.constant 0 : i32
    %409 = arith.cmpi eq, %c2_i32_125, %c0_i32_126 : i32
    %c1_i32_127 = arith.constant 1 : i32
    %410 = arith.select %409, %c1_i32_127, %c2_i32_125 : i32
    %411 = vector.broadcast %410 : i32 to vector<32x8xi32>
    %412 = arith.remsi %1, %411 : vector<32x8xi32>
    %c0_i32_128 = arith.constant 0 : i32
    %413 = vector.broadcast %c0_i32_128 : i32 to vector<32x8xi32>
    %414 = arith.cmpi ne, %412, %413 : vector<32x8xi32>
    %c0_i32_129 = arith.constant 0 : i32
    %415 = vector.broadcast %c0_i32_129 : i32 to vector<32x8xi32>
    %416 = arith.cmpi slt, %412, %415 : vector<32x8xi32>
    %c0_i32_130 = arith.constant 0 : i32
    %417 = arith.cmpi slt, %410, %c0_i32_130 : i32
    %418 = vector.broadcast %417 : i1 to vector<32x8xi1>
    %419 = vector.broadcast %418 : vector<32x8xi1> to vector<32x8xi1>
    %420 = arith.xori %416, %419 : vector<32x8xi1>
    %421 = arith.andi %420, %414 : vector<32x8xi1>
    %422 = vector.broadcast %410 : i32 to vector<32x8xi32>
    %423 = arith.addi %412, %422 : vector<32x8xi32>
    %424 = arith.select %421, %423, %412 : vector<32x8xi1>, vector<32x8xi32>
    %c0_i32_131 = arith.constant 0 : i32
    %425 = vector.broadcast %c0_i32_131 : i32 to vector<32x8xi32>
    %426 = arith.cmpi eq, %424, %425 : vector<32x8xi32>
    %c2_i32_132 = arith.constant 2 : i32
    %427 = vector.broadcast %c2_i32_132 : i32 to vector<32x8xi32>
    %428 = arith.cmpi sge, %1, %427 : vector<32x8xi32>
    %429 = arith.andi %426, %428 : vector<32x8xi1>
    %430 = arith.minimumf %379, %382 : vector<32x8xf32>
    %431 = arith.maximumf %379, %385 : vector<32x8xf32>
    %432 = arith.select %429, %431, %379 : vector<32x8xi1>, vector<32x8xf32>
    %433 = arith.select %408, %430, %432 : vector<32x8xi1>, vector<32x8xf32>
    %c0_133 = arith.constant 0 : index
    %c0_134 = arith.constant 0 : index
    %434 = vector.load %arg1[%c0_133, %c0_134] : memref<8x16xf32, #tpu.memory_space<vmem>>, vector<8x16xf32>
    %c0_135 = arith.constant 0 : index
    %c0_136 = arith.constant 0 : index
    %435 = vector.load %arg2[%c0_135, %c0_136] : memref<1x16xf32, #tpu.memory_space<vmem>>, vector<1x16xf32>
    %c0_137 = arith.constant 0 : index
    %c0_138 = arith.constant 0 : index
    %436 = vector.load %arg3[%c0_137, %c0_138] : memref<1x16xf32, #tpu.memory_space<vmem>>, vector<1x16xf32>
    %c0_139 = arith.constant 0 : index
    %c0_140 = arith.constant 0 : index
    %437 = vector.load %arg4[%c0_139, %c0_140] : memref<1x16xf32, #tpu.memory_space<vmem>>, vector<1x16xf32>
    %cst = arith.constant dense<0.000000e+00> : vector<32x16xf32>
    %438 = tpu.matmul %433, %434, %cst {dimension_numbers = #tpu.dot_dimension_numbers<[1], [0], [0], [1], [0, 0, 1, 1], [], []>} : vector<32x8xf32>, vector<8x16xf32>, vector<32x16xf32> -> vector<32x16xf32>
    %439 = vector.broadcast %435 : vector<1x16xf32> to vector<32x16xf32>
    %440 = arith.addf %438, %439 : vector<32x16xf32>
    %cst_141 = arith.constant dense<0.000000e+00> : vector<16xf32>
    %441 = vector.multi_reduction <add>, %440, %cst_141 [0] : vector<32x16xf32> to vector<16xf32>
    %442 = vector.shape_cast %441 : vector<16xf32> to vector<1x16xf32>
    %cst_142 = arith.constant 3.200000e+01 : f32
    %443 = vector.broadcast %cst_142 : f32 to vector<1x16xf32>
    %444 = arith.divf %442, %443 : vector<1x16xf32>
    %445 = vector.broadcast %444 : vector<1x16xf32> to vector<32x16xf32>
    %446 = arith.subf %440, %445 : vector<32x16xf32>
    %447 = arith.mulf %446, %446 : vector<32x16xf32>
    %cst_143 = arith.constant dense<0.000000e+00> : vector<16xf32>
    %448 = vector.multi_reduction <add>, %447, %cst_143 [0] : vector<32x16xf32> to vector<16xf32>
    %449 = vector.shape_cast %448 : vector<16xf32> to vector<1x16xf32>
    %cst_144 = arith.constant 3.200000e+01 : f32
    %450 = vector.broadcast %cst_144 : f32 to vector<1x16xf32>
    %451 = arith.divf %449, %450 : vector<1x16xf32>
    %452 = vector.broadcast %444 : vector<1x16xf32> to vector<32x16xf32>
    %453 = arith.subf %440, %452 : vector<32x16xf32>
    %cst_145 = arith.constant 9.99999974E-6 : f32
    %454 = vector.broadcast %cst_145 : f32 to vector<1x16xf32>
    %455 = arith.addf %451, %454 : vector<1x16xf32>
    %456 = math.rsqrt %455 : vector<1x16xf32>
    %457 = vector.broadcast %456 : vector<1x16xf32> to vector<32x16xf32>
    %458 = arith.mulf %453, %457 : vector<32x16xf32>
    %459 = vector.broadcast %436 : vector<1x16xf32> to vector<32x16xf32>
    %460 = arith.mulf %458, %459 : vector<32x16xf32>
    %461 = vector.broadcast %437 : vector<1x16xf32> to vector<32x16xf32>
    %462 = arith.addf %460, %461 : vector<32x16xf32>
    %cst_146 = arith.constant 0.000000e+00 : f32
    %463 = vector.broadcast %cst_146 : f32 to vector<32x16xf32>
    %464 = arith.cmpf oge, %462, %463 : vector<32x16xf32>
    %cst_147 = arith.constant 0.00999999977 : f32
    %465 = vector.broadcast %cst_147 : f32 to vector<32x16xf32>
    %466 = arith.mulf %465, %462 : vector<32x16xf32>
    %467 = arith.select %464, %462, %466 : vector<32x16xi1>, vector<32x16xf32>
    %c0_148 = arith.constant 0 : index
    %c0_149 = arith.constant 0 : index
    %468 = vector.load %arg5[%c0_148, %c0_149] : memref<16x1xf32, #tpu.memory_space<vmem>>, vector<16x1xf32>
    %cst_150 = arith.constant dense<0.000000e+00> : vector<32x1xf32>
    %469 = tpu.matmul %467, %468, %cst_150 {dimension_numbers = #tpu.dot_dimension_numbers<[1], [0], [0], [1], [0, 0, 1, 1], [], []>} : vector<32x16xf32>, vector<16x1xf32>, vector<32x1xf32> -> vector<32x1xf32>
    %c0_151 = arith.constant 0 : index
    %c0_152 = arith.constant 0 : index
    %470 = vector.load %arg6[%c0_151, %c0_152] : memref<1x1xf32, #tpu.memory_space<vmem>>, vector<1x1xf32>
    %471 = vector.broadcast %470 : vector<1x1xf32> to vector<32x1xf32>
    %472 = arith.addf %469, %471 : vector<32x1xf32>
    %c0_153 = arith.constant 0 : index
    %c0_154 = arith.constant 0 : index
    %473 = vector.load %arg7[%c0_153, %c0_154] : memref<32x1xf32, #tpu.memory_space<vmem>>, vector<32x1xf32>
    tpu.vector_store %arg7[%c0_153, %c0_154], %472 {strides = array<i32>} : memref<32x1xf32, #tpu.memory_space<vmem>>, vector<32x1xf32>,
    return
  }
}

</mosaic_0001>

<bundles_post_ra>
// kernel: resnet_like_sort_forward.3
= control target key start
LH: loop header
LB: loop body
LE: loop exit
PB: predicated region body
PF: predicated region fallthrough
CT: control target
= control target key end

     0   :  { %s1015_s26 = smov 127   ;;  %s1016_s27 = smov 121   ;;  %v32_v4 = vlaneseq  ;;  %vm62_vm0 = vcmask 56320   ;;  %vm91_vm1 = vcmask 7168   ;;  %vm676_vm11 = vcmask 64512   ;;  %s1507_s0 = inlined_call_operand.vmem [shape: f32[32,8], index: 0, kind: input, shape index: {}]   ;;  %s1508_s1 = inlined_call_operand.vmem [shape: f32[8,16], index: 1, kind: input, shape index: {}]   ;;  %s1509_s5 = inlined_call_operand.vmem [shape: f32[16,1], index: 5, kind: input, shape index: {}]   ;;  %s1510_s6 = inlined_call_operand.<no memory space> [shape: f32[1,1], index: 6, kind: input, shape index: {}]   ;;  %s1511_s2 = inlined_call_operand.vmem [shape: f32[1,16], index: 2, kind: input, shape index: {}]   ;;  %s1512_s3 = inlined_call_operand.vmem [shape: f32[1,16], index: 3, kind: input, shape index: {}]   ;;  %s1513_s4 = inlined_call_operand.vmem [shape: f32[1,16], index: 4, kind: input, shape index: {}]   ;;  %s1514_s7 = inlined_call_operand.vmem [shape: f32[32,1], index: 7, kind: output, shape index: {}]  }
   0x1   :  { %v28_v0 = vld [vmem:[%s1507_s0] sm:$0xff]  ;;  %s1017_s28 = smov 7   ;;  %s1018_s29 = smov 1   ;;  %v29_v1 = vld [vmem:[%s1507_s0 + $0x8] sm:$0xff]  ;;  %v30_v2 = vld [vmem:[%s1507_s0 + $0x10] sm:$0xff]  ;;  %v12_v56 = vstv %s1510_s6  ;;  %vm774_vm12 = vcmask 130048  }
   0x2   :  { %38 = vrot.lane.b32.xlu1 %v28_v0, %s1015_s26  ;;  %67 = vrot.lane.b32.xlu0 %v28_v0, %s1016_s27  ;;  %v1083_v3 = vld [vmem:[%s1507_s0 + $0x18] sm:$0xff]  ;;  %v1093_v5 = vand.u32 127, %v32_v4  ;;  %13 = vst [vmem:[#allocation2] sm:$0x1] %v12_v56  ;;  %v964_v59 = vld [vmem:[%s1511_s2] ss:$0 sm:$0xff] }
   0x4   :  { %v100_v6 = vand.u32 1, %v1093_v5  ;;  %v1097_v7 = vadd.s32 1, %v1093_v5  ;;  %vm113_vm3 = vcmp.ge.s32.totalorder %v1093_v5, 1  ;;  %vm192_vm8 = vcmp.ge.s32.totalorder %v1093_v5, 2 }
   0x6   :  { %50 = vrot.lane.b32.xlu1 %v28_v0, %s1017_s28  ;;  %79 = vrot.lane.b32.xlu0 %v28_v0, %s1018_s29  ;;  %vm1099_vm2 = vcmp.eq.s32.totalorder %v100_v6, 1  ;;  %vm1104_vm4 = vcmp.eq.s32.totalorder %v100_v6, 0  ;;  %vm110_vm5 = vcmp.lt.s32.totalorder %v1097_v7, 8 }
   0x7   :  { %vm1112_vm6 = vmand %vm1099_vm2, %vm113_vm3 }
   0x8   :  { %vm1121_vm7 = vmand %vm1104_vm4, %vm110_vm5 }
   0x9   :  { %vm1170_vm9 = vmand %vm1104_vm4, %vm192_vm8 }
   0xa   :  { %81 = vrot.lane.b32.xlu1 %v29_v1, %s1018_s29  ;;  %69 = vrot.lane.b32.xlu0 %v29_v1, %s1016_s27  ;;  %vm1178_vm10 = vmand %vm1099_vm2, %vm110_vm5 }
   0xe   :  { %52 = vrot.lane.b32.xlu1 %v29_v1, %s1017_s28  ;;  %40 = vrot.lane.b32.xlu0 %v29_v1, %s1015_s26 }
  0x12   :  { %83 = vrot.lane.b32.xlu1 %v30_v2, %s1018_s29  ;;  %71 = vrot.lane.b32.xlu0 %v30_v2, %s1016_s27 }
  0x16   :  { %54 = vrot.lane.b32.xlu1 %v30_v2, %s1017_s28  ;;  %42 = vrot.lane.b32.xlu0 %v30_v2, %s1015_s26 }
  0x1a   :  { %85 = vrot.lane.b32.xlu1 %v1083_v3, %s1018_s29  ;;  %73 = vrot.lane.b32.xlu0 %v1083_v3, %s1016_s27 }
  0x1e   :  { %56 = vrot.lane.b32.xlu1 %v1083_v3, %s1017_s28  ;;  %44 = vrot.lane.b32.xlu0 %v1083_v3, %s1015_s26 }
  0x74   :  { %v39_v8 = vpop.permute.xlu1 %38  ;;  %v68_v9 = vpop.permute.xlu0 %67 }
  0x78   :  { %v51_v12 = vpop.permute.xlu1 %50  ;;  %v80_v13 = vpop.permute.xlu0 %79 }
  0x79   :  { %v63_v14 = vsel %vm62_vm0, %v39_v8, %v51_v12  ;;  %v92_v16 = vsel %vm91_vm1, %v68_v9, %v80_v13 }
  0x7a   :  { %v115_v17 = vmin.f32 %v28_v0, %v63_v14  ;;  %v119_v19 = vmax.f32 %v28_v0, %v92_v16 }
  0x7c   :  { %v123_v20 = vsel %vm1112_vm6, %v119_v19, %v28_v0  ;;  %v82_v21 = vpop.permute.xlu1 %81  ;;  %v70_v22 = vpop.permute.xlu0 %69 }
  0x7d   :  { %v127_v23 = vsel %vm1121_vm7, %v115_v17, %v123_v20  ;;  %v93_v24 = vsel %vm91_vm1, %v70_v22, %v82_v21 }
  0x7e   :  { %175 = vrot.lane.b32.xlu1 %v127_v23, %s1018_s29  ;;  %163 = vrot.lane.b32.xlu0 %v127_v23, %s1016_s27  ;;  %v120_v25 = vmax.f32 %v29_v1, %v93_v24 }
  0x80   :  { %v53_v26 = vpop.permute.xlu1 %52  ;;  %v41_v27 = vpop.permute.xlu0 %40  ;;  %v124_v30 = vsel %vm1112_vm6, %v120_v25, %v29_v1 }
  0x81   :  { %v64_v28 = vsel %vm62_vm0, %v41_v27, %v53_v26 }
  0x82   :  { %v116_v29 = vmin.f32 %v29_v1, %v64_v28  ;;  %147 = vrot.lane.b32.xlu1 %v127_v23, %s1017_s28  ;;  %135 = vrot.lane.b32.xlu0 %v127_v23, %s1015_s26 }
  0x84   :  { %v128_v31 = vsel %vm1121_vm7, %v116_v29, %v124_v30  ;;  %v84_v32 = vpop.permute.xlu1 %83  ;;  %v72_v33 = vpop.permute.xlu0 %71 }
  0x85   :  { %v94_v34 = vsel %vm91_vm1, %v72_v33, %v84_v32 }
  0x86   :  { %177 = vrot.lane.b32.xlu1 %v128_v31, %s1018_s29  ;;  %165 = vrot.lane.b32.xlu0 %v128_v31, %s1016_s27  ;;  %v121_v35 = vmax.f32 %v30_v2, %v94_v34 }
  0x88   :  { %v55_v36 = vpop.permute.xlu1 %54  ;;  %v43_v37 = vpop.permute.xlu0 %42  ;;  %v125_v40 = vsel %vm1112_vm6, %v121_v35, %v30_v2 }
  0x89   :  { %v65_v38 = vsel %vm62_vm0, %v43_v37, %v55_v36 }
  0x8a   :  { %v117_v39 = vmin.f32 %v30_v2, %v65_v38  ;;  %149 = vrot.lane.b32.xlu1 %v128_v31, %s1017_s28  ;;  %137 = vrot.lane.b32.xlu0 %v128_v31, %s1015_s26 }
  0x8c   :  { %v129_v41 = vsel %vm1121_vm7, %v117_v39, %v125_v40  ;;  %v86_v42 = vpop.permute.xlu1 %85  ;;  %v74_v43 = vpop.permute.xlu0 %73 }
  0x8d   :  { %v95_v44 = vsel %vm91_vm1, %v74_v43, %v86_v42 }
  0x8e   :  { %179 = vrot.lane.b32.xlu1 %v129_v41, %s1018_s29  ;;  %167 = vrot.lane.b32.xlu0 %v129_v41, %s1016_s27  ;;  %v122_v45 = vmax.f32 %v1083_v3, %v95_v44 }
  0x90   :  { %v57_v46 = vpop.permute.xlu1 %56  ;;  %v45_v47 = vpop.permute.xlu0 %44  ;;  %v126_v50 = vsel %vm1112_vm6, %v122_v45, %v1083_v3 }
  0x91   :  { %v66_v48 = vsel %vm62_vm0, %v45_v47, %v57_v46 }
  0x92   :  { %v118_v49 = vmin.f32 %v1083_v3, %v66_v48  ;;  %151 = vrot.lane.b32.xlu1 %v129_v41, %s1017_s28  ;;  %139 = vrot.lane.b32.xlu0 %v129_v41, %s1015_s26 }
  0x94   :  { %v130_v51 = vsel %vm1121_vm7, %v118_v49, %v126_v50 }
  0x96   :  { %181 = vrot.lane.b32.xlu1 %v130_v51, %s1018_s29  ;;  %169 = vrot.lane.b32.xlu0 %v130_v51, %s1016_s27 }
  0x9a   :  { %153 = vrot.lane.b32.xlu1 %v130_v51, %s1017_s28  ;;  %141 = vrot.lane.b32.xlu0 %v130_v51, %s1015_s26 }
  0xf0   :  { %v176_v52 = vpop.permute.xlu1 %175  ;;  %v164_v53 = vpop.permute.xlu0 %163 }
  0xf1   :  { %v187_v54 = vsel %vm91_vm1, %v164_v53, %v176_v52 }
  0xf2   :  { %v198_v55 = vmax.f32 %v127_v23, %v187_v54 }
  0xf4   :  { %v148_v57 = vpop.permute.xlu1 %147  ;;  %v136_v58 = vpop.permute.xlu0 %135  ;;  %v202_v62 = vsel %vm1170_vm9, %v198_v55, %v127_v23 }
  0xf5   :  { %v159_v60 = vsel %vm62_vm0, %v136_v58, %v148_v57 }
  0xf6   :  { %v194_v61 = vmin.f32 %v127_v23, %v159_v60 }
  0xf8   :  { %v206_v63 = vsel %vm1178_vm10, %v194_v61, %v202_v62  ;;  %v178_v0 = vpop.permute.xlu1 %177  ;;  %v166_v1 = vpop.permute.xlu0 %165 }
  0xf9   :  { %v188_v2 = vsel %vm91_vm1, %v166_v1, %v178_v0  ;;  %254 = vrot.lane.b32.xlu1 %v206_v63, %s1018_s29  ;;  %242 = vrot.lane.b32.xlu0 %v206_v63, %s1016_s27 }
  0xfa   :  { %v199_v3 = vmax.f32 %v128_v31, %v188_v2 }
  0xfc   :  { %v150_v4 = vpop.permute.xlu1 %149  ;;  %v138_v5 = vpop.permute.xlu0 %137  ;;  %v203_v8 = vsel %vm1170_vm9, %v199_v3, %v128_v31 }
  0xfd   :  { %v160_v6 = vsel %vm62_vm0, %v138_v5, %v150_v4  ;;  %226 = vrot.lane.b32.xlu1 %v206_v63, %s1017_s28  ;;  %214 = vrot.lane.b32.xlu0 %v206_v63, %s1015_s26 }
  0xfe   :  { %v195_v7 = vmin.f32 %v128_v31, %v160_v6 }
 0x100   :  { %v207_v9 = vsel %vm1178_vm10, %v195_v7, %v203_v8  ;;  %v180_v10 = vpop.permute.xlu1 %179  ;;  %v168_v11 = vpop.permute.xlu0 %167 }
 0x101   :  { %v189_v12 = vsel %vm91_vm1, %v168_v11, %v180_v10  ;;  %256 = vrot.lane.b32.xlu1 %v207_v9, %s1018_s29  ;;  %244 = vrot.lane.b32.xlu0 %v207_v9, %s1016_s27 }
 0x102   :  { %v200_v13 = vmax.f32 %v129_v41, %v189_v12 }
 0x104   :  { %v152_v14 = vpop.permute.xlu1 %151  ;;  %v140_v16 = vpop.permute.xlu0 %139  ;;  %v204_v20 = vsel %vm1170_vm9, %v200_v13, %v129_v41 }
 0x105   :  { %v161_v17 = vsel %vm62_vm0, %v140_v16, %v152_v14  ;;  %228 = vrot.lane.b32.xlu1 %v207_v9, %s1017_s28  ;;  %216 = vrot.lane.b32.xlu0 %v207_v9, %s1015_s26 }
 0x106   :  { %v196_v19 = vmin.f32 %v129_v41, %v161_v17 }
 0x108   :  { %v208_v21 = vsel %vm1178_vm10, %v196_v19, %v204_v20  ;;  %v182_v22 = vpop.permute.xlu1 %181  ;;  %v170_v23 = vpop.permute.xlu0 %169 }
 0x109   :  { %v190_v24 = vsel %vm91_vm1, %v170_v23, %v182_v22  ;;  %258 = vrot.lane.b32.xlu1 %v208_v21, %s1018_s29  ;;  %246 = vrot.lane.b32.xlu0 %v208_v21, %s1016_s27 }
 0x10a   :  { %v201_v25 = vmax.f32 %v130_v51, %v190_v24 }
 0x10c   :  { %v154_v26 = vpop.permute.xlu1 %153  ;;  %v142_v27 = vpop.permute.xlu0 %141  ;;  %v205_v30 = vsel %vm1170_vm9, %v201_v25, %v130_v51 }
 0x10d   :  { %v162_v28 = vsel %vm62_vm0, %v142_v27, %v154_v26  ;;  %230 = vrot.lane.b32.xlu1 %v208_v21, %s1017_s28  ;;  %218 = vrot.lane.b32.xlu0 %v208_v21, %s1015_s26 }
 0x10e   :  { %v197_v29 = vmin.f32 %v130_v51, %v162_v28 }
 0x110   :  { %v209_v31 = vsel %vm1178_vm10, %v197_v29, %v205_v30 }
 0x111   :  { %260 = vrot.lane.b32.xlu1 %v209_v31, %s1018_s29  ;;  %248 = vrot.lane.b32.xlu0 %v209_v31, %s1016_s27 }
 0x115   :  { %232 = vrot.lane.b32.xlu1 %v209_v31, %s1017_s28  ;;  %220 = vrot.lane.b32.xlu0 %v209_v31, %s1015_s26 }
 0x16b   :  { %v255_v32 = vpop.permute.xlu1 %254  ;;  %v243_v33 = vpop.permute.xlu0 %242 }
 0x16c   :  { %v266_v34 = vsel %vm91_vm1, %v243_v33, %v255_v32 }
 0x16d   :  { %v274_v35 = vmax.f32 %v206_v63, %v266_v34 }
 0x16f   :  { %v227_v36 = vpop.permute.xlu1 %226  ;;  %v215_v37 = vpop.permute.xlu0 %214  ;;  %v278_v40 = vsel %vm1112_vm6, %v274_v35, %v206_v63 }
 0x170   :  { %v238_v38 = vsel %vm62_vm0, %v215_v37, %v227_v36 }
 0x171   :  { %v270_v39 = vmin.f32 %v206_v63, %v238_v38 }
 0x173   :  { %v282_v41 = vsel %vm1121_vm7, %v270_v39, %v278_v40  ;;  %v257_v42 = vpop.permute.xlu1 %256  ;;  %v245_v43 = vpop.permute.xlu0 %244 }
 0x174   :  { %v267_v44 = vsel %vm91_vm1, %v245_v43, %v257_v42  ;;  %330 = vrot.lane.b32.xlu1 %v282_v41, %s1018_s29  ;;  %318 = vrot.lane.b32.xlu0 %v282_v41, %s1016_s27 }
 0x175   :  { %v275_v45 = vmax.f32 %v207_v9, %v267_v44 }
 0x177   :  { %v229_v46 = vpop.permute.xlu1 %228  ;;  %v217_v47 = vpop.permute.xlu0 %216  ;;  %v279_v50 = vsel %vm1112_vm6, %v275_v45, %v207_v9 }
 0x178   :  { %v239_v48 = vsel %vm62_vm0, %v217_v47, %v229_v46  ;;  %302 = vrot.lane.b32.xlu1 %v282_v41, %s1017_s28  ;;  %290 = vrot.lane.b32.xlu0 %v282_v41, %s1015_s26 }
 0x179   :  { %v271_v49 = vmin.f32 %v207_v9, %v239_v48 }
 0x17b   :  { %v283_v51 = vsel %vm1121_vm7, %v271_v49, %v279_v50  ;;  %v259_v52 = vpop.permute.xlu1 %258  ;;  %v247_v53 = vpop.permute.xlu0 %246 }
 0x17c   :  { %v268_v54 = vsel %vm91_vm1, %v247_v53, %v259_v52  ;;  %332 = vrot.lane.b32.xlu1 %v283_v51, %s1018_s29  ;;  %320 = vrot.lane.b32.xlu0 %v283_v51, %s1016_s27 }
 0x17d   :  { %v276_v55 = vmax.f32 %v208_v21, %v268_v54 }
 0x17f   :  { %v231_v57 = vpop.permute.xlu1 %230  ;;  %v219_v58 = vpop.permute.xlu0 %218  ;;  %v280_v62 = vsel %vm1112_vm6, %v276_v55, %v208_v21 }
 0x180   :  { %v240_v60 = vsel %vm62_vm0, %v219_v58, %v231_v57  ;;  %304 = vrot.lane.b32.xlu1 %v283_v51, %s1017_s28  ;;  %292 = vrot.lane.b32.xlu0 %v283_v51, %s1015_s26 }
 0x181   :  { %v272_v61 = vmin.f32 %v208_v21, %v240_v60 }
 0x183   :  { %v284_v63 = vsel %vm1121_vm7, %v272_v61, %v280_v62  ;;  %v261_v0 = vpop.permute.xlu1 %260  ;;  %v249_v1 = vpop.permute.xlu0 %248 }
 0x184   :  { %v269_v2 = vsel %vm91_vm1, %v249_v1, %v261_v0  ;;  %334 = vrot.lane.b32.xlu1 %v284_v63, %s1018_s29  ;;  %322 = vrot.lane.b32.xlu0 %v284_v63, %s1016_s27 }
 0x185   :  { %v277_v3 = vmax.f32 %v209_v31, %v269_v2 }
 0x187   :  { %v233_v4 = vpop.permute.xlu1 %232  ;;  %v221_v5 = vpop.permute.xlu0 %220  ;;  %v281_v8 = vsel %vm1112_vm6, %v277_v3, %v209_v31 }
 0x188   :  { %v241_v6 = vsel %vm62_vm0, %v221_v5, %v233_v4  ;;  %306 = vrot.lane.b32.xlu1 %v284_v63, %s1017_s28  ;;  %294 = vrot.lane.b32.xlu0 %v284_v63, %s1015_s26 }
 0x189   :  { %v273_v7 = vmin.f32 %v209_v31, %v241_v6 }
 0x18b   :  { %v285_v9 = vsel %vm1121_vm7, %v273_v7, %v281_v8 }
 0x18c   :  { %336 = vrot.lane.b32.xlu1 %v285_v9, %s1018_s29  ;;  %324 = vrot.lane.b32.xlu0 %v285_v9, %s1016_s27 }
 0x190   :  { %308 = vrot.lane.b32.xlu1 %v285_v9, %s1017_s28  ;;  %296 = vrot.lane.b32.xlu0 %v285_v9, %s1015_s26 }
 0x1e6   :  { %v331_v10 = vpop.permute.xlu1 %330  ;;  %v319_v11 = vpop.permute.xlu0 %318 }
 0x1e7   :  { %v342_v12 = vsel %vm91_vm1, %v319_v11, %v331_v10 }
 0x1e8   :  { %v350_v13 = vmax.f32 %v282_v41, %v342_v12 }
 0x1ea   :  { %v303_v14 = vpop.permute.xlu1 %302  ;;  %v291_v16 = vpop.permute.xlu0 %290  ;;  %v354_v20 = vsel %vm1170_vm9, %v350_v13, %v282_v41 }
 0x1eb   :  { %v314_v17 = vsel %vm62_vm0, %v291_v16, %v303_v14 }
 0x1ec   :  { %v346_v19 = vmin.f32 %v282_v41, %v314_v17 }
 0x1ee   :  { %v358_v21 = vsel %vm1178_vm10, %v346_v19, %v354_v20  ;;  %v333_v22 = vpop.permute.xlu1 %332  ;;  %v321_v23 = vpop.permute.xlu0 %320 }
 0x1ef   :  { %v343_v24 = vsel %vm91_vm1, %v321_v23, %v333_v22  ;;  %406 = vrot.lane.b32.xlu1 %v358_v21, %s1018_s29  ;;  %394 = vrot.lane.b32.xlu0 %v358_v21, %s1016_s27 }
 0x1f0   :  { %v351_v25 = vmax.f32 %v283_v51, %v343_v24 }
 0x1f2   :  { %v305_v26 = vpop.permute.xlu1 %304  ;;  %v293_v27 = vpop.permute.xlu0 %292  ;;  %v355_v30 = vsel %vm1170_vm9, %v351_v25, %v283_v51 }
 0x1f3   :  { %v315_v28 = vsel %vm62_vm0, %v293_v27, %v305_v26  ;;  %378 = vrot.lane.b32.xlu1 %v358_v21, %s1017_s28  ;;  %366 = vrot.lane.b32.xlu0 %v358_v21, %s1015_s26 }
 0x1f4   :  { %v347_v29 = vmin.f32 %v283_v51, %v315_v28 }
 0x1f6   :  { %v359_v31 = vsel %vm1178_vm10, %v347_v29, %v355_v30  ;;  %v335_v32 = vpop.permute.xlu1 %334  ;;  %v323_v33 = vpop.permute.xlu0 %322 }
 0x1f7   :  { %v344_v34 = vsel %vm91_vm1, %v323_v33, %v335_v32  ;;  %408 = vrot.lane.b32.xlu1 %v359_v31, %s1018_s29  ;;  %396 = vrot.lane.b32.xlu0 %v359_v31, %s1016_s27 }
 0x1f8   :  { %v352_v35 = vmax.f32 %v284_v63, %v344_v34 }
 0x1fa   :  { %v307_v36 = vpop.permute.xlu1 %306  ;;  %v295_v37 = vpop.permute.xlu0 %294  ;;  %v356_v40 = vsel %vm1170_vm9, %v352_v35, %v284_v63 }
 0x1fb   :  { %v316_v38 = vsel %vm62_vm0, %v295_v37, %v307_v36  ;;  %380 = vrot.lane.b32.xlu1 %v359_v31, %s1017_s28  ;;  %368 = vrot.lane.b32.xlu0 %v359_v31, %s1015_s26 }
 0x1fc   :  { %v348_v39 = vmin.f32 %v284_v63, %v316_v38 }
 0x1fe   :  { %v360_v41 = vsel %vm1178_vm10, %v348_v39, %v356_v40  ;;  %v337_v42 = vpop.permute.xlu1 %336  ;;  %v325_v43 = vpop.permute.xlu0 %324 }
 0x1ff   :  { %v345_v44 = vsel %vm91_vm1, %v325_v43, %v337_v42  ;;  %410 = vrot.lane.b32.xlu1 %v360_v41, %s1018_s29  ;;  %398 = vrot.lane.b32.xlu0 %v360_v41, %s1016_s27 }
 0x200   :  { %v353_v45 = vmax.f32 %v285_v9, %v345_v44 }
 0x202   :  { %v309_v46 = vpop.permute.xlu1 %308  ;;  %v297_v47 = vpop.permute.xlu0 %296  ;;  %v357_v50 = vsel %vm1170_vm9, %v353_v45, %v285_v9 }
 0x203   :  { %v317_v48 = vsel %vm62_vm0, %v297_v47, %v309_v46  ;;  %382 = vrot.lane.b32.xlu1 %v360_v41, %s1017_s28  ;;  %370 = vrot.lane.b32.xlu0 %v360_v41, %s1015_s26 }
 0x204   :  { %v349_v49 = vmin.f32 %v285_v9, %v317_v48 }
 0x206   :  { %v361_v51 = vsel %vm1178_vm10, %v349_v49, %v357_v50 }
 0x207   :  { %412 = vrot.lane.b32.xlu1 %v361_v51, %s1018_s29  ;;  %400 = vrot.lane.b32.xlu0 %v361_v51, %s1016_s27 }
 0x20b   :  { %384 = vrot.lane.b32.xlu1 %v361_v51, %s1017_s28  ;;  %372 = vrot.lane.b32.xlu0 %v361_v51, %s1015_s26 }
 0x261   :  { %v407_v52 = vpop.permute.xlu1 %406  ;;  %v395_v53 = vpop.permute.xlu0 %394 }
 0x262   :  { %v418_v54 = vsel %vm91_vm1, %v395_v53, %v407_v52 }
 0x263   :  { %v426_v55 = vmax.f32 %v358_v21, %v418_v54 }
 0x265   :  { %v379_v57 = vpop.permute.xlu1 %378  ;;  %v367_v58 = vpop.permute.xlu0 %366  ;;  %v430_v62 = vsel %vm1112_vm6, %v426_v55, %v358_v21 }
 0x266   :  { %v390_v60 = vsel %vm62_vm0, %v367_v58, %v379_v57 }
 0x267   :  { %v422_v61 = vmin.f32 %v358_v21, %v390_v60 }
 0x269   :  { %v434_v63 = vsel %vm1121_vm7, %v422_v61, %v430_v62  ;;  %v409_v0 = vpop.permute.xlu1 %408  ;;  %v397_v1 = vpop.permute.xlu0 %396 }
 0x26a   :  { %v419_v2 = vsel %vm91_vm1, %v397_v1, %v409_v0  ;;  %482 = vrot.lane.b32.xlu1 %v434_v63, %s1018_s29  ;;  %470 = vrot.lane.b32.xlu0 %v434_v63, %s1016_s27 }
 0x26b   :  { %v427_v3 = vmax.f32 %v359_v31, %v419_v2 }
 0x26d   :  { %v381_v4 = vpop.permute.xlu1 %380  ;;  %v369_v5 = vpop.permute.xlu0 %368  ;;  %v431_v8 = vsel %vm1112_vm6, %v427_v3, %v359_v31 }
 0x26e   :  { %v391_v6 = vsel %vm62_vm0, %v369_v5, %v381_v4  ;;  %454 = vrot.lane.b32.xlu1 %v434_v63, %s1017_s28  ;;  %442 = vrot.lane.b32.xlu0 %v434_v63, %s1015_s26 }
 0x26f   :  { %v423_v7 = vmin.f32 %v359_v31, %v391_v6 }
 0x271   :  { %v435_v9 = vsel %vm1121_vm7, %v423_v7, %v431_v8  ;;  %v411_v10 = vpop.permute.xlu1 %410  ;;  %v399_v11 = vpop.permute.xlu0 %398 }
 0x272   :  { %v420_v12 = vsel %vm91_vm1, %v399_v11, %v411_v10  ;;  %484 = vrot.lane.b32.xlu1 %v435_v9, %s1018_s29  ;;  %472 = vrot.lane.b32.xlu0 %v435_v9, %s1016_s27 }
 0x273   :  { %v428_v13 = vmax.f32 %v360_v41, %v420_v12 }
 0x275   :  { %v383_v14 = vpop.permute.xlu1 %382  ;;  %v371_v16 = vpop.permute.xlu0 %370  ;;  %v432_v20 = vsel %vm1112_vm6, %v428_v13, %v360_v41 }
 0x276   :  { %v392_v17 = vsel %vm62_vm0, %v371_v16, %v383_v14  ;;  %456 = vrot.lane.b32.xlu1 %v435_v9, %s1017_s28  ;;  %444 = vrot.lane.b32.xlu0 %v435_v9, %s1015_s26 }
 0x277   :  { %v424_v19 = vmin.f32 %v360_v41, %v392_v17 }
 0x279   :  { %v436_v21 = vsel %vm1121_vm7, %v424_v19, %v432_v20  ;;  %v413_v22 = vpop.permute.xlu1 %412  ;;  %v401_v23 = vpop.permute.xlu0 %400 }
 0x27a   :  { %v421_v24 = vsel %vm91_vm1, %v401_v23, %v413_v22  ;;  %486 = vrot.lane.b32.xlu1 %v436_v21, %s1018_s29  ;;  %474 = vrot.lane.b32.xlu0 %v436_v21, %s1016_s27 }
 0x27b   :  { %v429_v25 = vmax.f32 %v361_v51, %v421_v24 }
 0x27d   :  { %v385_v26 = vpop.permute.xlu1 %384  ;;  %v373_v27 = vpop.permute.xlu0 %372  ;;  %v433_v30 = vsel %vm1112_vm6, %v429_v25, %v361_v51  ;;  %v666_v25 = vld [vmem:[%s1508_s1] sm:$0xff] }
 0x27e   :  { %v393_v28 = vsel %vm62_vm0, %v373_v27, %v385_v26  ;;  %458 = vrot.lane.b32.xlu1 %v436_v21, %s1017_s28  ;;  %446 = vrot.lane.b32.xlu0 %v436_v21, %s1015_s26 }
 0x27f   :  { %v425_v29 = vmin.f32 %v361_v51, %v393_v28  ;;  %987 = vmatprep.subr.mxu0 %v666_v25 }
 0x280   :  { %988 = vmatpush3.msra.mxu0 %v666_v25 }
 0x281   :  { %v437_v31 = vsel %vm1121_vm7, %v425_v29, %v433_v30 }
 0x282   :  { %488 = vrot.lane.b32.xlu1 %v437_v31, %s1018_s29  ;;  %476 = vrot.lane.b32.xlu0 %v437_v31, %s1016_s27 }
 0x286   :  { %460 = vrot.lane.b32.xlu1 %v437_v31, %s1017_s28  ;;  %448 = vrot.lane.b32.xlu0 %v437_v31, %s1015_s26 }
 0x2dc   :  { %v483_v32 = vpop.permute.xlu1 %482  ;;  %v471_v33 = vpop.permute.xlu0 %470 }
 0x2dd   :  { %v494_v34 = vsel %vm91_vm1, %v471_v33, %v483_v32 }
 0x2de   :  { %v502_v35 = vmax.f32 %v434_v63, %v494_v34 }
 0x2e0   :  { %v455_v36 = vpop.permute.xlu1 %454  ;;  %v443_v37 = vpop.permute.xlu0 %442  ;;  %v506_v40 = vsel %vm1170_vm9, %v502_v35, %v434_v63 }
 0x2e1   :  { %v466_v38 = vsel %vm62_vm0, %v443_v37, %v455_v36 }
 0x2e2   :  { %v498_v39 = vmin.f32 %v434_v63, %v466_v38 }
 0x2e4   :  { %v510_v41 = vsel %vm1178_vm10, %v498_v39, %v506_v40  ;;  %v485_v42 = vpop.permute.xlu1 %484  ;;  %v473_v43 = vpop.permute.xlu0 %472 }
 0x2e5   :  { %v495_v44 = vsel %vm91_vm1, %v473_v43, %v485_v42  ;;  %558 = vrot.lane.b32.xlu1 %v510_v41, %s1018_s29  ;;  %546 = vrot.lane.b32.xlu0 %v510_v41, %s1016_s27 }
 0x2e6   :  { %v503_v45 = vmax.f32 %v435_v9, %v495_v44 }
 0x2e8   :  { %v457_v46 = vpop.permute.xlu1 %456  ;;  %v445_v47 = vpop.permute.xlu0 %444  ;;  %v507_v50 = vsel %vm1170_vm9, %v503_v45, %v435_v9 }
 0x2e9   :  { %v467_v48 = vsel %vm62_vm0, %v445_v47, %v457_v46  ;;  %530 = vrot.lane.b32.xlu1 %v510_v41, %s1017_s28  ;;  %518 = vrot.lane.b32.xlu0 %v510_v41, %s1015_s26 }
 0x2ea   :  { %v499_v49 = vmin.f32 %v435_v9, %v467_v48 }
 0x2ec   :  { %v511_v51 = vsel %vm1178_vm10, %v499_v49, %v507_v50  ;;  %v487_v52 = vpop.permute.xlu1 %486  ;;  %v475_v53 = vpop.permute.xlu0 %474 }
 0x2ed   :  { %v496_v54 = vsel %vm91_vm1, %v475_v53, %v487_v52  ;;  %560 = vrot.lane.b32.xlu1 %v511_v51, %s1018_s29  ;;  %548 = vrot.lane.b32.xlu0 %v511_v51, %s1016_s27 }
 0x2ee   :  { %v504_v55 = vmax.f32 %v436_v21, %v496_v54 }
 0x2f0   :  { %v459_v57 = vpop.permute.xlu1 %458  ;;  %v447_v58 = vpop.permute.xlu0 %446  ;;  %v508_v62 = vsel %vm1170_vm9, %v504_v55, %v436_v21 }
 0x2f1   :  { %v468_v60 = vsel %vm62_vm0, %v447_v58, %v459_v57  ;;  %532 = vrot.lane.b32.xlu1 %v511_v51, %s1017_s28  ;;  %520 = vrot.lane.b32.xlu0 %v511_v51, %s1015_s26 }
 0x2f2   :  { %v500_v61 = vmin.f32 %v436_v21, %v468_v60 }
 0x2f4   :  { %v512_v63 = vsel %vm1178_vm10, %v500_v61, %v508_v62  ;;  %v489_v0 = vpop.permute.xlu1 %488  ;;  %v477_v1 = vpop.permute.xlu0 %476 }
 0x2f5   :  { %v497_v2 = vsel %vm91_vm1, %v477_v1, %v489_v0  ;;  %562 = vrot.lane.b32.xlu1 %v512_v63, %s1018_s29  ;;  %550 = vrot.lane.b32.xlu0 %v512_v63, %s1016_s27 }
 0x2f6   :  { %v505_v3 = vmax.f32 %v437_v31, %v497_v2 }
 0x2f8   :  { %v461_v4 = vpop.permute.xlu1 %460  ;;  %v449_v5 = vpop.permute.xlu0 %448  ;;  %v509_v8 = vsel %vm1170_vm9, %v505_v3, %v437_v31 }
 0x2f9   :  { %v469_v6 = vsel %vm62_vm0, %v449_v5, %v461_v4  ;;  %534 = vrot.lane.b32.xlu1 %v512_v63, %s1017_s28  ;;  %522 = vrot.lane.b32.xlu0 %v512_v63, %s1015_s26 }
 0x2fa   :  { %v501_v7 = vmin.f32 %v437_v31, %v469_v6 }
 0x2fc   :  { %v513_v9 = vsel %vm1178_vm10, %v501_v7, %v509_v8 }
 0x2fd   :  { %564 = vrot.lane.b32.xlu1 %v513_v9, %s1018_s29  ;;  %552 = vrot.lane.b32.xlu0 %v513_v9, %s1016_s27 }
 0x301   :  { %536 = vrot.lane.b32.xlu1 %v513_v9, %s1017_s28  ;;  %524 = vrot.lane.b32.xlu0 %v513_v9, %s1015_s26 }
 0x357   :  { %v559_v10 = vpop.permute.xlu1 %558  ;;  %v547_v11 = vpop.permute.xlu0 %546 }
 0x358   :  { %v570_v12 = vsel %vm91_vm1, %v547_v11, %v559_v10 }
 0x359   :  { %v578_v13 = vmax.f32 %v510_v41, %v570_v12 }
 0x35b   :  { %v531_v14 = vpop.permute.xlu1 %530  ;;  %v519_v16 = vpop.permute.xlu0 %518  ;;  %v582_v20 = vsel %vm1112_vm6, %v578_v13, %v510_v41 }
 0x35c   :  { %v542_v17 = vsel %vm62_vm0, %v519_v16, %v531_v14 }
 0x35d   :  { %v574_v19 = vmin.f32 %v510_v41, %v542_v17 }
 0x35f   :  { %v1387_v21 = vsel %vm1121_vm7, %v574_v19, %v582_v20  ;;  %v561_v22 = vpop.permute.xlu1 %560  ;;  %v549_v23 = vpop.permute.xlu0 %548 }
 0x360   :  { %v571_v24 = vsel %vm91_vm1, %v549_v23, %v561_v22  ;;  %634 = vrot.lane.b32.xlu1 %v1387_v21, %s1018_s29  ;;  %622 = vrot.lane.b32.xlu0 %v1387_v21, %s1016_s27 }
 0x361   :  { %v579_v26 = vmax.f32 %v511_v51, %v571_v24 }
 0x363   :  { %v533_v27 = vpop.permute.xlu1 %532  ;;  %v521_v28 = vpop.permute.xlu0 %520  ;;  %v583_v31 = vsel %vm1112_vm6, %v579_v26, %v511_v51 }
 0x364   :  { %v543_v29 = vsel %vm62_vm0, %v521_v28, %v533_v27  ;;  %606 = vrot.lane.b32.xlu1 %v1387_v21, %s1017_s28  ;;  %594 = vrot.lane.b32.xlu0 %v1387_v21, %s1015_s26 }
 0x365   :  { %v575_v30 = vmin.f32 %v511_v51, %v543_v29 }
 0x367   :  { %v587_v32 = vsel %vm1121_vm7, %v575_v30, %v583_v31  ;;  %v563_v33 = vpop.permute.xlu1 %562  ;;  %v551_v34 = vpop.permute.xlu0 %550  ;;  %v850_v31 = vld [vmem:[%s1509_s5] sm:$0xff] }
 0x368   :  { %v572_v35 = vsel %vm91_vm1, %v551_v34, %v563_v33  ;;  %636 = vrot.lane.b32.xlu1 %v587_v32, %s1018_s29  ;;  %624 = vrot.lane.b32.xlu0 %v587_v32, %s1016_s27 }
 0x369   :  { %v580_v36 = vmax.f32 %v512_v63, %v572_v35 }
 0x36b   :  { %v535_v37 = vpop.permute.xlu1 %534  ;;  %v523_v38 = vpop.permute.xlu0 %522  ;;  %v584_v41 = vsel %vm1112_vm6, %v580_v36, %v512_v63 }
 0x36c   :  { %v544_v39 = vsel %vm62_vm0, %v523_v38, %v535_v37  ;;  %608 = vrot.lane.b32.xlu1 %v587_v32, %s1017_s28  ;;  %596 = vrot.lane.b32.xlu0 %v587_v32, %s1015_s26 }
 0x36d   :  { %v576_v40 = vmin.f32 %v512_v63, %v544_v39 }
 0x36f   :  { %v588_v42 = vsel %vm1121_vm7, %v576_v40, %v584_v41  ;;  %v565_v43 = vpop.permute.xlu1 %564  ;;  %v553_v44 = vpop.permute.xlu0 %552 }
 0x370   :  { %v573_v45 = vsel %vm91_vm1, %v553_v44, %v565_v43  ;;  %638 = vrot.lane.b32.xlu1 %v588_v42, %s1018_s29  ;;  %626 = vrot.lane.b32.xlu0 %v588_v42, %s1016_s27 }
 0x371   :  { %v581_v46 = vmax.f32 %v513_v9, %v573_v45 }
 0x373   :  { %v537_v47 = vpop.permute.xlu1 %536  ;;  %v525_v48 = vpop.permute.xlu0 %524  ;;  %v585_v51 = vsel %vm1112_vm6, %v581_v46, %v513_v9 }
 0x374   :  { %v545_v49 = vsel %vm62_vm0, %v525_v48, %v537_v47  ;;  %610 = vrot.lane.b32.xlu1 %v588_v42, %s1017_s28  ;;  %598 = vrot.lane.b32.xlu0 %v588_v42, %s1015_s26 }
 0x375   :  { %v577_v50 = vmin.f32 %v513_v9, %v545_v49 }
 0x377   :  { %v589_v52 = vsel %vm1121_vm7, %v577_v50, %v585_v51 }
 0x378   :  { %640 = vrot.lane.b32.xlu1 %v589_v52, %s1018_s29  ;;  %628 = vrot.lane.b32.xlu0 %v589_v52, %s1016_s27 }
 0x37c   :  { %612 = vrot.lane.b32.xlu1 %v589_v52, %s1017_s28  ;;  %600 = vrot.lane.b32.xlu0 %v589_v52, %s1015_s26 }
 0x3d2   :  { %v635_v53 = vpop.permute.xlu1 %634  ;;  %v623_v54 = vpop.permute.xlu0 %622 }
 0x3d3   :  { %v646_v55 = vsel %vm91_vm1, %v623_v54, %v635_v53 }
 0x3d4   :  { %v654_v57 = vmax.f32 %v1387_v21, %v646_v55 }
 0x3d6   :  { %v607_v58 = vpop.permute.xlu1 %606  ;;  %v595_v15 = vpop.permute.xlu0 %594  ;;  %v658_v61 = vsel %vm1170_vm9, %v654_v57, %v1387_v21 }
 0x3d7   :  { %v618_v60 = vsel %vm62_vm0, %v595_v15, %v607_v58 }
 0x3d8   :  { %v650_v18 = vmin.f32 %v1387_v21, %v618_v60 }
 0x3da   :  { %v637_v62 = vpop.permute.xlu1 %636  ;;  %v625_v63 = vpop.permute.xlu0 %624  ;;  %v662_v0 = vsel %vm1178_vm10, %v650_v18, %v658_v61 }
 0x3db   :  { %v647_v1 = vsel %vm91_vm1, %v625_v63, %v637_v62  ;;  %989 = vmatprep.mubr.msk.f32.mxu0 %vm676_vm11, %v662_v0 }
 0x3dc   :  { %v655_v2 = vmax.f32 %v587_v32, %v647_v1 }
 0x3de   :  { %v609_v3 = vpop.permute.xlu1 %608  ;;  %v597_v4 = vpop.permute.xlu0 %596  ;;  %v659_v7 = vsel %vm1170_vm9, %v655_v2, %v587_v32 }
 0x3df   :  { %v619_v5 = vsel %vm62_vm0, %v597_v4, %v609_v3 }
 0x3e0   :  { %v651_v6 = vmin.f32 %v587_v32, %v619_v5  ;;  %v851_v32 = vld [vmem:[%s1509_s5 + $0x8] sm:$0xff] }
 0x3e1   :  { %v1005_v33 = vpack.c.bf16 %v851_v32, %v850_v31 }
 0x3e2   :  { %v639_v8 = vpop.permute.xlu1 %638  ;;  %v627_v9 = vpop.permute.xlu0 %626  ;;  %v663_v10 = vsel %vm1178_vm10, %v651_v6, %v659_v7 }
 0x3e3   :  { %v648_v11 = vsel %vm91_vm1, %v627_v9, %v639_v8  ;;  %990 = vmatmul.mubr.msk.f32.vlgmr.msra.gmra.mrb[0].mxu0 %vm676_vm11, %v663_v10  ;;  %1006 = vmatprep.subr.bf16.mxu1 %v1005_v33 }
 0x3e4   :  { %v656_v12 = vmax.f32 %v588_v42, %v648_v11  ;;  %1008 = vmatpush3.bf16.msra.mxu1 %v1005_v33 }
 0x3e6   :  { %v611_v13 = vpop.permute.xlu1 %610  ;;  %v599_v14 = vpop.permute.xlu0 %598  ;;  %v660_v19 = vsel %vm1170_vm9, %v656_v12, %v588_v42 }
 0x3e7   :  { %v620_v16 = vsel %vm62_vm0, %v599_v14, %v611_v13 }
 0x3e8   :  { %v652_v17 = vmin.f32 %v588_v42, %v620_v16 }
 0x3ea   :  { %v641_v20 = vpop.permute.xlu1 %640  ;;  %v629_v21 = vpop.permute.xlu0 %628  ;;  %v664_v22 = vsel %vm1178_vm10, %v652_v17, %v660_v19  ;;  %v969_v17 = vld [vmem:[%s1512_s3] ss:$0 sm:$0xff] }
 0x3eb   :  { %v649_v23 = vsel %vm91_vm1, %v629_v21, %v641_v20  ;;  %992 = vmatprep.mubr.msk.f32.mxu0 %vm676_vm11, %v664_v22 }
 0x3ec   :  { %v657_v24 = vmax.f32 %v589_v52, %v649_v23  ;;  %v970_v23 = vld [vmem:[%s1513_s4] ss:$0 sm:$0xff] }
 0x3ee   :  { %v613_v25 = vpop.permute.xlu1 %612  ;;  %v601_v26 = vpop.permute.xlu0 %600  ;;  %v661_v29 = vsel %vm1170_vm9, %v657_v24, %v589_v52 }
 0x3ef   :  { %v621_v27 = vsel %vm62_vm0, %v601_v26, %v613_v25 }
 0x3f0   :  { %v653_v28 = vmin.f32 %v589_v52, %v621_v27 }
 0x3f2   :  { %v665_v30 = vsel %vm1178_vm10, %v653_v28, %v661_v29 }
 0x3f3   :  { %993 = vmatmul.mubr.msk.f32.gmra.mrb[2].mxu0 %vm676_vm11, %v665_v30 }
 0x4b6   :  { %v991_v34 = vpop.f32.mrb[0].mxu0 }
 0x4b7   :  { %v761_v35 = vadd.f32 %v991_v34, %v964_v59  ;;  %v755_v36 = vpop.f32.mrb[1].mxu0 }
 0x4b8   :  { %v756_v37 = vadd.f32 %v964_v59, %v755_v36 }
 0x4b9   :  { %v776_v38 = vsel %vm774_vm12, %v761_v35, 0.0 }
 0x4ba   :  { %v775_v39 = vsel %vm774_vm12, %v756_v37, 0.0 }
 0x4bb   :  { %v777_v40 = vadd.f32 %v776_v38, %v775_v39  ;;  %v971_v38 = vld [vmem:[#allocation2] ss:$0 sm:$0xff] }
 0x4c6   :  { %v994_v41 = vpop.f32.mrb[2].mxu0 }
 0x4c7   :  { %v765_v42 = vpop.f32.mrb[3].mxu0  ;;  %v771_v43 = vadd.f32 %v994_v41, %v964_v59 }
 0x4c8   :  { %v766_v44 = vadd.f32 %v964_v59, %v765_v42 }
 0x4c9   :  { %v780_v47 = vsel %vm774_vm12, %v771_v43, 0.0 }
 0x4ca   :  { %v778_v45 = vsel %vm774_vm12, %v766_v44, 0.0 }
 0x4cb   :  { %v779_v46 = vadd.f32 %v778_v45, %v777_v40 }
 0x4cd   :  { %v781_v48 = vadd.f32 %v780_v47, %v779_v46 }
 0x4cf   :  { %v782_v49 = vrot.slane %v781_v48, 4 }
 0x4d1   :  { %v783_v50 = vadd.f32 %v782_v49, %v781_v48 }
 0x4d3   :  { %v784_v51 = vrot.slane %v783_v50, 2 }
 0x4d5   :  { %v785_v52 = vadd.f32 %v784_v51, %v783_v50 }
 0x4d7   :  { %v786_v53 = vrot.slane %v785_v52, 1 }
 0x4d9   :  { %v787_v54 = vadd.f32 %v786_v53, %v785_v52 }
 0x4db   :  { %v789_v55 = vmul.f32 0.03125, %v787_v54 }
 0x4dd   :  { %v790_v57 = vsub.f32 %v756_v37, %v789_v55  ;;  %v791_v58 = vsub.f32 %v761_v35, %v789_v55  ;;  %v792_v15 = vsub.f32 %v766_v44, %v789_v55  ;;  %v793_v60 = vsub.f32 %v771_v43, %v789_v55 }
 0x4df   :  { %v794_v18 = vmul.f32 %v790_v57, %v790_v57  ;;  %v795_v61 = vmul.f32 %v791_v58, %v791_v58  ;;  %v796_v62 = vmul.f32 %v792_v15, %v792_v15  ;;  %v797_v63 = vmul.f32 %v793_v60, %v793_v60 }
 0x4e1   :  { %v798_v0 = vsel %vm774_vm12, %v794_v18, 0.0  ;;  %v799_v1 = vsel %vm774_vm12, %v795_v61, 0.0  ;;  %v801_v3 = vsel %vm774_vm12, %v796_v62, 0.0  ;;  %v803_v5 = vsel %vm774_vm12, %v797_v63, 0.0 }
 0x4e2   :  { %v800_v2 = vadd.f32 %v799_v1, %v798_v0 }
 0x4e4   :  { %v802_v4 = vadd.f32 %v801_v3, %v800_v2 }
 0x4e6   :  { %v804_v6 = vadd.f32 %v803_v5, %v802_v4 }
 0x4e8   :  { %v805_v7 = vrot.slane %v804_v6, 4 }
 0x4ea   :  { %v806_v8 = vadd.f32 %v805_v7, %v804_v6 }
 0x4ec   :  { %v807_v9 = vrot.slane %v806_v8, 2 }
 0x4ee   :  { %v808_v10 = vadd.f32 %v807_v9, %v806_v8 }
 0x4f0   :  { %v809_v11 = vrot.slane %v808_v10, 1 }
 0x4f2   :  { %v810_v12 = vadd.f32 %v809_v11, %v808_v10 }
 0x4f4   :  { %v811_v13 = vmul.f32 0.03125, %v810_v12 }
 0x4f6   :  { %v812_v14 = vadd.f32 1e-05, %v811_v13 }
 0x4f8   :  { %1013 = vrsqrt.f32 %v812_v14 }
 0x502   :  { %v1014_v16 = vpop.eup %1013 }
 0x503   :  { %v816_v19 = vmul.f32 %v1014_v16, %v792_v15  ;;  %v814_v20 = vmul.f32 %v1014_v16, %v790_v57  ;;  %v815_v21 = vmul.f32 %v1014_v16, %v791_v58  ;;  %v817_v22 = vmul.f32 %v1014_v16, %v793_v60 }
 0x505   :  { %v826_v24 = vmul.f32 %v969_v17, %v816_v19  ;;  %v824_v25 = vmul.f32 %v969_v17, %v814_v20  ;;  %v825_v26 = vmul.f32 %v969_v17, %v815_v21  ;;  %v827_v27 = vmul.f32 %v969_v17, %v817_v22 }
 0x507   :  { %v834_v28 = vadd.f32 %v970_v23, %v824_v25  ;;  %v835_v29 = vadd.f32 %v970_v23, %v825_v26  ;;  %v836_v30 = vadd.f32 %v970_v23, %v826_v24  ;;  %v837_v31 = vadd.f32 %v970_v23, %v827_v27 }
 0x509   :  { %vm838_vm13 = vcmp.ge.f32.partialorder %v834_v28, 0.0  ;;  %v842_v32 = vmul.f32 0.01, %v834_v28  ;;  %vm839_vm14 = vcmp.ge.f32.partialorder %v835_v29, 0.0  ;;  %v843_v33 = vmul.f32 0.01, %v835_v29 }
 0x50a   :  { %vm840_vm15 = vcmp.ge.f32.partialorder %v836_v30, 0.0  ;;  %v844_v56 = vmul.f32 0.01, %v836_v30  ;;  %v845_v35 = vmul.f32 0.01, %v837_v31  ;;  %vm841_vm0 = vcmp.ge.f32.partialorder %v837_v31, 0.0 }
 0x50b   :  { %v846_v59 = vsel %vm838_vm13, %v834_v28, %v842_v32  ;;  %v847_v34 = vsel %vm839_vm14, %v835_v29, %v843_v33 }
 0x50c   :  { %999 = vmatprep.mubr.msk.f32.mxu1 %vm774_vm12, %v846_v59  ;;  %v848_v36 = vsel %vm840_vm15, %v836_v30, %v844_v56  ;;  %v849_v37 = vsel %vm841_vm0, %v837_v31, %v845_v35 }
 0x50d   :  { %1000 = vmatmul.mubr.msk.f32.vlgmr.msra.gmra.mrb[0].mxu1 %vm774_vm12, %v847_v34 }
 0x50e   :  { %1002 = vmatprep.mubr.msk.f32.mxu1 %vm774_vm12, %v848_v36 }
 0x511   :  { %1003 = vmatmul.mubr.msk.f32.gmra.mrb[2].mxu1 %vm774_vm12, %v849_v37 }
 0x5e0   :  { %v1001_v39 = vpop.f32.mrb[0].mxu1 }
 0x5e1   :  { %v943_v40 = vadd.f32 %v1001_v39, %v971_v38  ;;  %v937_v41 = vpop.f32.mrb[1].mxu1 }
 0x5e2   :  { %v938_v42 = vadd.f32 %v971_v38, %v937_v41 }
 0x5e3   :  { %957 = vst.msk [vmem:[%s1514_s7 + $0x8] sm:$0xff] %vm91_vm1, %v943_v40 }
 0x5e4   :  { %956 = vst.msk [vmem:[%s1514_s7] sm:$0xff] %vm91_vm1, %v938_v42  ;;  %v1004_v43 = vpop.f32.mrb[2].mxu1 }
 0x5e5   :  { %v953_v44 = vadd.f32 %v1004_v43, %v971_v38  ;;  %v947_v45 = vpop.f32.mrb[3].mxu1 }
 0x5e6   :  { %v948_v46 = vadd.f32 %v971_v38, %v947_v45 }
 0x5e7   :  { %959 = vst.msk [vmem:[%s1514_s7 + $0x18] sm:$0xff] %vm91_vm1, %v953_v44 }
 0x5e8   :  { %958 = vst.msk [vmem:[%s1514_s7 + $0x10] sm:$0xff] %vm91_vm1, %v948_v46 }

// kernel: resnet_like_sort_forward.2
= control target key start
LH: loop header
LB: loop body
LE: loop exit
PB: predicated region body
PF: predicated region fallthrough
CT: control target
= control target key end

     0   :  { %s1811_s3 = smov 2   ;;  %vm215_vm0 = vcmask 64512   ;;  %s1812_s10 = smov 6   ;;  %vm297_vm1 = vcmask 261120   ;;  %vm589_vm4 = vcmask 130048   ;;  %vm969_vm14 = vcmask 523264   ;;  %s2054_s0 = inlined_call_operand.smem [shape: u32[35], index: -1, kind: input, shape index: {}] }
   0x1   :  { %s1427_s6 = sld [smem:[%s2054_s0 + %s1811_s3]]   ;;  %s1813_s14 = smov 12  }
   0x2   :  { %s1_s9 = sld [smem:[%s2054_s0]]   ;;  %s1814_s18 = smov 3  }
   0x3   :  { %s1431_s13 = sld [smem:[%s2054_s0 + %s1812_s10]]   ;;  %s1815_s22 = smov 4  }
   0x4   :  { %s1437_s17 = sld [smem:[%s2054_s0 + %s1813_s14]]   ;;  %s1816_s26 = smov 5  }
   0x5   :  { %s1428_s21 = sld [smem:[%s2054_s0 + %s1814_s18]]   ;;  %s1817_s30 = smov 1  }
   0x6   :  { %s1429_s25 = sld [smem:[%s2054_s0 + %s1815_s22]]   ;;  %s1818_s4 = smov 10  }
   0x7   :  { %v142_v0 = vld [vmem:[%s1427_s6] sm:$0xff]  ;;  %s1430_s29 = sld [smem:[%s2054_s0 + %s1816_s26]]   ;;  %s1819_s8 = smov 16  }
   0x8   :  { %v207_v1 = vld [vmem:[%s1_s9] sm:$0xff]  ;;  %v208_v2 = vld [vmem:[%s1_s9 + $0x8] sm:$0xff]  ;;  %1565 = vmatprep.subr.mxu0 %v142_v0  ;;  %s1426_s3 = sld [smem:[%s2054_s0 + %s1817_s30]]   ;;  %s1820_s12 = smov 7  }
   0x9   :  { %1567 = vmatprep.mubr.msk.f32.mxu0 %vm215_vm0, %v207_v1  ;;  %1566 = vmatpush3.msra.mxu0 %v142_v0  ;;  %v146_v3 = vld [vmem:[%s1431_s13] sm:$0xff]  ;;  %v147_v4 = vld [vmem:[%s1431_s13 + $0x8] sm:$0xff]  ;;  %v148_v6 = vld [vmem:[%s1431_s13 + $0x10] sm:$0xff]  ;;  %s1435_s7 = sld [smem:[%s2054_s0 + %s1818_s4]]   ;;  %s1821_s16 = smov 13  }
   0xa   :  { %1568 = vmatmul.mubr.msk.f32.vlgmr.msra.gmra.mrb[0].mxu0 %vm215_vm0, %v208_v2  ;;  %v1681_v5 = vpack.c.bf16 %v147_v4, %v146_v3  ;;  %v149_v7 = vld [vmem:[%s1431_s13 + $0x18] sm:$0xff]  ;;  %v158_v9 = vld [vmem:[%s1437_s17] sm:$0xff]  ;;  %v159_v10 = vld [vmem:[%s1437_s17 + $0x8] sm:$0xff]  ;;  %s1894_s11 = sld [smem:[%s2054_s0 + %s1819_s8]]   ;;  %s1822_s20 = smov 8  }
   0xb   :  { %v1685_v8 = vpack.c.bf16 %v149_v7, %v148_v6  ;;  %v1697_v11 = vpack.c.bf16 %v159_v10, %v158_v9  ;;  %v1460_v12 = vld [vmem:[%s1428_s21] ss:$0 sm:$0xff]  ;;  %s1432_s15 = sld [smem:[%s2054_s0 + %s1820_s12]]   ;;  %s1823_s24 = smov 9  }
   0xc   :  { %1682 = vmatprep.subr.bf16.mxu1 %v1681_v5  ;;  %v1463_v43 = vld [vmem:[%s1429_s25] ss:$0 sm:$0xff]  ;;  %s1438_s19 = sld [smem:[%s2054_s0 + %s1821_s16]]   ;;  %s1824_s28 = smov 14  }
   0xd   :  { %1684 = vmatpush3.bf16.msra.mxu1 %v1681_v5  ;;  %v1464_v46 = vld [vmem:[%s1430_s29] ss:$0 sm:$0xff]  ;;  %s1433_s23 = sld [smem:[%s2054_s0 + %s1822_s20]]   ;;  %s1825_s2 = smov 15  }
   0xe   :  { %1686 = vmatprep.subr.bf16.mxu1 %v1685_v8  ;;  %v581_v55 = vld [vmem:[%s1426_s3] sm:$0xff]  ;;  %v582_v56 = vld [vmem:[%s1426_s3 + $0x8] sm:$0xff]  ;;  %s1434_s27 = sld [smem:[%s2054_s0 + %s1823_s24]]   ;;  %s1826_s6 = smov 20  }
   0xf   :  { %v153_v57 = vld [vmem:[%s1435_s7] sm:$0xff]  ;;  %v154_v58 = vld [vmem:[%s1435_s7 + $0x8] sm:$0xff]  ;;  %v155_v60 = vld [vmem:[%s1435_s7 + $0x10] sm:$0xff]  ;;  %s1439_s1 = sld [smem:[%s2054_s0 + %s1824_s28]]   ;;  %s1827_s10 = smov 17  }
  0x10   :  { %v1689_v59 = vpack.c.bf16 %v154_v58, %v153_v57  ;;  %v156_v61 = vld [vmem:[%s1435_s7 + $0x18] sm:$0xff]  ;;  %v163_v63 = vld [vmem:[%s1894_s11] sm:$0xff]  ;;  %v164_v0 = vld [vmem:[%s1894_s11 + $0x8] sm:$0xff]  ;;  %s1440_s5 = sld [smem:[%s2054_s0 + %s1825_s2]]   ;;  %s1828_s14 = smov 18  }
  0x11   :  { %1688 = vmatpush3.bf16.msra.mxu1 %v1685_v8  ;;  %v1693_v62 = vpack.c.bf16 %v156_v61, %v155_v60  ;;  %v1898_v1 = vpack.c.bf16 %v164_v0, %v163_v63  ;;  %v1465_v2 = vld [vmem:[%s1432_s15] ss:$0 sm:$0xff]  ;;  %s1445_s9 = sld [smem:[%s2054_s0 + %s1826_s6]]   ;;  %s1829_s18 = smov 19  }
  0x12   :  { %1698 = vmatprep.subr.bf16.mxu1 %v1697_v11  ;;  %1690 = vmatprep.subr.bf16.mxu0 %v1689_v59  ;;  %v1473_v7 = vld [vmem:[%s1438_s19] ss:$0 sm:$0xff]  ;;  %s1442_s13 = sld [smem:[%s2054_s0 + %s1827_s10]]   ;;  %s1830_s22 = smov 22  }
  0x13   :  { %1692 = vmatpush3.bf16.msra.mxu0 %v1689_v59  ;;  %s1443_s17 = sld [smem:[%s2054_s0 + %s1828_s14]]   ;;  %s1831_s26 = smov 21  }
  0x14   :  { %1694 = vmatprep.subr.bf16.mxu0 %v1693_v62  ;;  %s1444_s21 = sld [smem:[%s2054_s0 + %s1829_s18]]   ;;  %s1832_s30 = smov 32  }
  0x15   :  { %s1447_s25 = sld [smem:[%s2054_s0 + %s1830_s22]]   ;;  %s1840_s3 = smov 29  }
  0x16   :  { %s1446_s29 = sld [smem:[%s2054_s0 + %s1831_s26]]   ;;  %s1842_s10 = smov 31  }
  0x17   :  { %1696 = vmatpush3.bf16.msra.mxu0 %v1693_v62  ;;  %s1457_s2 = sld [smem:[%s2054_s0 + %s1832_s30]]   ;;  %s1843_s14 = smov 33  }
  0x18   :  { %1702 = vmatprep.subr.bf16.mxu0 %v1898_v1  ;;  %s1454_s6 = sld [smem:[%s2054_s0 + %s1840_s3]]   ;;  %s1844_s18 = smov 34  }
  0xdd   :  { %v1569_v13 = vpop.f32.mrb[0].mxu0 }
  0xde   :  { %v294_v14 = vadd.f32 %v1569_v13, %v1460_v12  ;;  %v288_v15 = vpop.f32.mrb[1].mxu0 }
  0xdf   :  { %v289_v16 = vadd.f32 %v1460_v12, %v288_v15 }
  0xe0   :  { %v299_v17 = vsel %vm297_vm1, %v294_v14, 0.0 }
  0xe1   :  { %v298_v18 = vsel %vm297_vm1, %v289_v16, 0.0 }
  0xe2   :  { %v300_v19 = vadd.f32 %v299_v17, %v298_v18 }
  0xe4   :  { %v301_v20 = vrot.slane %v300_v19, 4 }
  0xe6   :  { %v302_v21 = vadd.f32 %v301_v20, %v300_v19 }
  0xe8   :  { %v303_v22 = vrot.slane %v302_v21, 2 }
  0xea   :  { %v304_v23 = vadd.f32 %v303_v22, %v302_v21 }
  0xec   :  { %v305_v24 = vrot.slane %v304_v23, 1 }
  0xee   :  { %v306_v25 = vadd.f32 %v305_v24, %v304_v23 }
  0xf0   :  { %v308_v26 = vmul.f32 0.0625, %v306_v25 }
  0xf2   :  { %v309_v27 = vsub.f32 %v289_v16, %v308_v26  ;;  %v310_v28 = vsub.f32 %v294_v14, %v308_v26 }
  0xf4   :  { %v311_v29 = vmul.f32 %v309_v27, %v309_v27  ;;  %v312_v30 = vmul.f32 %v310_v28, %v310_v28 }
  0xf6   :  { %v313_v31 = vsel %vm297_vm1, %v311_v29, 0.0  ;;  %v314_v32 = vsel %vm297_vm1, %v312_v30, 0.0 }
  0xf7   :  { %v315_v33 = vadd.f32 %v314_v32, %v313_v31 }
  0xf9   :  { %v316_v34 = vrot.slane %v315_v33, 4 }
  0xfb   :  { %v317_v35 = vadd.f32 %v316_v34, %v315_v33 }
  0xfd   :  { %v318_v36 = vrot.slane %v317_v35, 2 }
  0xff   :  { %v319_v37 = vadd.f32 %v318_v36, %v317_v35 }
 0x101   :  { %v320_v38 = vrot.slane %v319_v37, 1 }
 0x103   :  { %v321_v39 = vadd.f32 %v320_v38, %v319_v37 }
 0x105   :  { %v322_v40 = vmul.f32 0.0625, %v321_v39 }
 0x107   :  { %v323_v41 = vadd.f32 1e-05, %v322_v40 }
 0x109   :  { %1799 = vrsqrt.f32 %v323_v41 }
 0x113   :  { %v1800_v42 = vpop.eup %1799 }
 0x114   :  { %v325_v44 = vmul.f32 %v1800_v42, %v309_v27  ;;  %v326_v45 = vmul.f32 %v1800_v42, %v310_v28 }
 0x116   :  { %v333_v47 = vmul.f32 %v1463_v43, %v325_v44  ;;  %v334_v48 = vmul.f32 %v1463_v43, %v326_v45 }
 0x118   :  { %v341_v49 = vadd.f32 %v1464_v46, %v333_v47  ;;  %v342_v50 = vadd.f32 %v1464_v46, %v334_v48 }
 0x11a   :  { %vm343_vm2 = vcmp.ge.f32.partialorder %v341_v49, 0.0  ;;  %v345_v51 = vmul.f32 0.01, %v341_v49  ;;  %vm344_vm3 = vcmp.ge.f32.partialorder %v342_v50, 0.0  ;;  %v346_v52 = vmul.f32 0.01, %v342_v50 }
 0x11c   :  { %v1878_v53 = vsel %vm343_vm2, %v341_v49, %v345_v51  ;;  %v1880_v54 = vsel %vm344_vm3, %v342_v50, %v346_v52 }
 0x11d   :  { %1578 = vmatprep.mubr.msk.f32.mxu1 %vm297_vm1, %v1878_v53 }
 0x11e   :  { %1579 = vmatmul.mubr.msk.f32.vlgmr.msra.gmra.mrb[0].mxu1 %vm297_vm1, %v1880_v54 }
 0x11f   :  { %1700 = vmatpush3.bf16.msra.mxu1 %v1697_v11  ;;  %1596 = vmatprep.mubr.msk.f32.mxu1 %vm589_vm4, %v581_v55 }
 0x122   :  { %1597 = vmatmul.mubr.msk.f32.vlgmr.msra.gmra.mrb[2].mxu1 %vm589_vm4, %v582_v56 }
 0x1f1   :  { %v1580_v3 = vpop.f32.mrb[0].mxu1 }
 0x1f2   :  { %v433_v4 = vadd.f32 %v1580_v3, %v1465_v2  ;;  %v427_v5 = vpop.f32.mrb[1].mxu1 }
 0x1f3   :  { %v428_v6 = vadd.f32 %v1465_v2, %v427_v5  ;;  %v1468_v2 = vld [vmem:[%s1433_s23] ss:$0 sm:$0xff] }
 0x1f4   :  { %v437_v8 = vsel %vm297_vm1, %v433_v4, 0.0  ;;  %v1469_v5 = vld [vmem:[%s1434_s27] ss:$0 sm:$0xff] }
 0x1f5   :  { %v436_v9 = vsel %vm297_vm1, %v428_v6, 0.0  ;;  %v1598_v10 = vpop.f32.mrb[2].mxu1 }
 0x1f6   :  { %v438_v11 = vadd.f32 %v437_v8, %v436_v9  ;;  %v668_v12 = vadd.f32 %v1598_v10, %v1473_v7  ;;  %v662_v13 = vpop.f32.mrb[3].mxu1  ;;  %v1476_v9 = vld [vmem:[%s1439_s1] ss:$0 sm:$0xff]  ;;  %s1833_s1 = smov 11  }
 0x1f7   :  { %v663_v14 = vadd.f32 %v1473_v7, %v662_v13  ;;  %s1436_s4 = sld [smem:[%s2054_s0 + %s1833_s1]]  }
 0x1f8   :  { %v439_v15 = vrot.slane %v438_v11, 4  ;;  %v672_v16 = vsel %vm297_vm1, %v668_v12, 0.0 }
 0x1f9   :  { %v671_v17 = vsel %vm297_vm1, %v663_v14, 0.0 }
 0x1fa   :  { %v440_v18 = vadd.f32 %v439_v15, %v438_v11  ;;  %v673_v19 = vadd.f32 %v672_v16, %v671_v17  ;;  %v166_v15 = vld [vmem:[%s1894_s11 + $0x18] sm:$0xff]  ;;  %v1477_v16 = vld [vmem:[%s1440_s5] ss:$0 sm:$0xff]  ;;  %s1834_s5 = smov 26  }
 0x1fb   :  { %s1451_s8 = sld [smem:[%s2054_s0 + %s1834_s5]]  }
 0x1fc   :  { %v441_v20 = vrot.slane %v440_v18, 2  ;;  %v674_v21 = vrot.slane %v673_v19, 4 }
 0x1fe   :  { %v442_v22 = vadd.f32 %v441_v20, %v440_v18  ;;  %v675_v23 = vadd.f32 %v674_v21, %v673_v19 }
 0x200   :  { %v443_v24 = vrot.slane %v442_v22, 1  ;;  %v676_v25 = vrot.slane %v675_v23, 2 }
 0x202   :  { %v444_v26 = vadd.f32 %v443_v24, %v442_v22  ;;  %v677_v27 = vadd.f32 %v676_v25, %v675_v23 }
 0x204   :  { %v445_v28 = vmul.f32 0.0625, %v444_v26  ;;  %v678_v29 = vrot.slane %v677_v27, 1 }
 0x206   :  { %v446_v30 = vsub.f32 %v428_v6, %v445_v28  ;;  %v447_v31 = vsub.f32 %v433_v4, %v445_v28  ;;  %v679_v32 = vadd.f32 %v678_v29, %v677_v27 }
 0x208   :  { %v448_v33 = vmul.f32 %v446_v30, %v446_v30  ;;  %v449_v34 = vmul.f32 %v447_v31, %v447_v31  ;;  %v680_v35 = vmul.f32 0.0625, %v679_v32  ;;  %v172_v32 = vld [vmem:[%s1445_s9 + $0x10] sm:$0xff] }
 0x20a   :  { %v450_v36 = vsel %vm297_vm1, %v448_v33, 0.0  ;;  %v451_v37 = vsel %vm297_vm1, %v449_v34, 0.0  ;;  %v681_v38 = vsub.f32 %v663_v14, %v680_v35  ;;  %v682_v39 = vsub.f32 %v668_v12, %v680_v35  ;;  %v165_v14 = vld [vmem:[%s1894_s11 + $0x10] sm:$0xff]  ;;  %v173_v33 = vld [vmem:[%s1445_s9 + $0x18] sm:$0xff] }
 0x20b   :  { %v452_v40 = vadd.f32 %v451_v37, %v450_v36  ;;  %v1705_v22 = vpack.c.bf16 %v166_v15, %v165_v14  ;;  %v1713_v34 = vpack.c.bf16 %v173_v33, %v172_v32  ;;  %v1478_v37 = vld [vmem:[%s1442_s13] ss:$0 sm:$0xff]  ;;  %s1836_s13 = smov 23  }
 0x20c   :  { %v683_v41 = vmul.f32 %v681_v38, %v681_v38  ;;  %v684_v42 = vmul.f32 %v682_v39, %v682_v39  ;;  %v1483_v32 = vld [vmem:[%s1446_s29] ss:$0 sm:$0xff]  ;;  %s1448_s16 = sld [smem:[%s2054_s0 + %s1836_s13]]  }
 0x20d   :  { %v453_v43 = vrot.slane %v452_v40, 4  ;;  %s1456_s13 = sld [smem:[%s2054_s0 + %s1842_s10]]  }
 0x20e   :  { %v685_v44 = vsel %vm297_vm1, %v683_v41, 0.0  ;;  %v686_v45 = vsel %vm297_vm1, %v684_v42, 0.0 }
 0x20f   :  { %v454_v46 = vadd.f32 %v453_v43, %v452_v40  ;;  %v687_v47 = vadd.f32 %v686_v45, %v685_v44 }
 0x211   :  { %v455_v48 = vrot.slane %v454_v46, 2  ;;  %v688_v49 = vrot.slane %v687_v47, 4 }
 0x213   :  { %v456_v50 = vadd.f32 %v455_v48, %v454_v46  ;;  %v689_v51 = vadd.f32 %v688_v49, %v687_v47 }
 0x215   :  { %v457_v52 = vrot.slane %v456_v50, 1  ;;  %v690_v55 = vrot.slane %v689_v51, 2 }
 0x217   :  { %v458_v56 = vadd.f32 %v457_v52, %v456_v50  ;;  %v691_v57 = vadd.f32 %v690_v55, %v689_v51 }
 0x219   :  { %v459_v58 = vmul.f32 0.0625, %v458_v56  ;;  %v692_v59 = vrot.slane %v691_v57, 1 }
 0x21b   :  { %v460_v60 = vadd.f32 1e-05, %v459_v58  ;;  %v693_v61 = vadd.f32 %v692_v59, %v691_v57 }
 0x21d   :  { %1801 = vrsqrt.f32 %v460_v60  ;;  %v694_v62 = vmul.f32 0.0625, %v693_v61 }
 0x21f   :  { %v695_v63 = vadd.f32 1e-05, %v694_v62 }
 0x221   :  { %1803 = vrsqrt.f32 %v695_v63 }
 0x227   :  { %v1802_v0 = vpop.eup %1801 }
 0x228   :  { %v462_v3 = vmul.f32 %v1802_v0, %v446_v30  ;;  %v463_v4 = vmul.f32 %v1802_v0, %v447_v31  ;;  %v171_v30 = vld [vmem:[%s1445_s9 + $0x8] sm:$0xff] }
 0x22a   :  { %v470_v6 = vmul.f32 %v1468_v2, %v462_v3  ;;  %v471_v7 = vmul.f32 %v1468_v2, %v463_v4 }
 0x22b   :  { %v1804_v8 = vpop.eup %1803 }
 0x22c   :  { %v697_v10 = vmul.f32 %v1804_v8, %v681_v38  ;;  %v698_v11 = vmul.f32 %v1804_v8, %v682_v39  ;;  %v478_v12 = vadd.f32 %v1469_v5, %v470_v6  ;;  %v479_v13 = vadd.f32 %v1469_v5, %v471_v7  ;;  %v1481_v7 = vld [vmem:[%s1443_s17] ss:$0 sm:$0xff]  ;;  %s1837_s17 = smov 24  }
 0x22d   :  { %s1449_s20 = sld [smem:[%s2054_s0 + %s1837_s17]]  }
 0x22e   :  { %v705_v17 = vmul.f32 %v1476_v9, %v697_v10  ;;  %v706_v18 = vmul.f32 %v1476_v9, %v698_v11  ;;  %vm480_vm5 = vcmp.ge.f32.partialorder %v478_v12, 0.0  ;;  %v482_v19 = vmul.f32 0.01, %v478_v12  ;;  %v1482_v10 = vld [vmem:[%s1444_s21] ss:$0 sm:$0xff]  ;;  %s1838_s21 = smov 25   ;;  %s1458_s17 = sld [smem:[%s2054_s0 + %s1843_s14]]  }
 0x22f   :  { %vm481_vm6 = vcmp.ge.f32.partialorder %v479_v13, 0.0  ;;  %v483_v20 = vmul.f32 0.01, %v479_v13  ;;  %s1450_s24 = sld [smem:[%s2054_s0 + %s1838_s21]]  }
 0x230   :  { %v484_v21 = vsel %vm480_vm5, %v478_v12, %v482_v19  ;;  %v713_v23 = vadd.f32 %v1477_v16, %v705_v17  ;;  %v714_v25 = vadd.f32 %v1477_v16, %v706_v18  ;;  %v175_v19 = vld [vmem:[%s1447_s25] sm:$0xff]  ;;  %s1459_s21 = sld [smem:[%s2054_s0 + %s1844_s18]]  }
 0x231   :  { %1589 = vmatprep.mubr.msk.f32.mxu0 %vm297_vm1, %v484_v21  ;;  %v485_v24 = vsel %vm481_vm6, %v479_v13, %v483_v20  ;;  %v176_v20 = vld [vmem:[%s1447_s25 + $0x8] sm:$0xff]  ;;  %v177_v21 = vld [vmem:[%s1447_s25 + $0x10] sm:$0xff] }
 0x232   :  { %1590 = vmatmul.mubr.msk.f32.vlgmr.msra.gmra.mrb[2].mxu0 %vm297_vm1, %v485_v24  ;;  %vm715_vm7 = vcmp.ge.f32.partialorder %v713_v23, 0.0  ;;  %v717_v26 = vmul.f32 0.01, %v713_v23  ;;  %v718_v28 = vmul.f32 0.01, %v714_v25  ;;  %vm716_vm8 = vcmp.ge.f32.partialorder %v714_v25, 0.0 }
 0x233   :  { %1704 = vmatpush3.bf16.msra.mxu0 %v1898_v1  ;;  %v170_v1 = vld [vmem:[%s1445_s9] sm:$0xff]  ;;  %s1835_s9 = smov 28  }
 0x234   :  { %1706 = vmatprep.subr.bf16.mxu0 %v1705_v22  ;;  %v1932_v27 = vsel %vm715_vm7, %v713_v23, %v717_v26  ;;  %v1936_v29 = vsel %vm716_vm8, %v714_v25, %v718_v28  ;;  %v1709_v31 = vpack.c.bf16 %v171_v30, %v170_v1  ;;  %v178_v23 = vld [vmem:[%s1447_s25 + $0x18] sm:$0xff]  ;;  %v179_v25 = vld [vmem:[%s1447_s25 + $0x20] sm:$0xff]  ;;  %v180_v26 = vld [vmem:[%s1447_s25 + $0x28] sm:$0xff]  ;;  %s1995_s12 = sld [smem:[%s2054_s0 + %s1835_s9]]  }
 0x235   :  { %1607 = vmatprep.mubr.msk.f32.mxu0 %vm297_vm1, %v1932_v27  ;;  %v1721_v24 = vpack.c.bf16 %v178_v23, %v177_v21  ;;  %v1725_v28 = vpack.c.bf16 %v180_v26, %v179_v25  ;;  %v181_v1 = vld [vmem:[%s1447_s25 + $0x30] sm:$0xff]  ;;  %v182_v30 = vld [vmem:[%s1447_s25 + $0x38] sm:$0xff]  ;;  %s1839_s25 = smov 27  }
 0x236   :  { %1710 = vmatprep.subr.bf16.mxu1 %v1709_v31  ;;  %s1452_s28 = sld [smem:[%s2054_s0 + %s1839_s25]]  }
 0x237   :  { %1708 = vmatpush3.bf16.msra.mxu0 %v1705_v22  ;;  %1712 = vmatpush3.bf16.msra.mxu1 %v1709_v31  ;;  %v1717_v22 = vpack.c.bf16 %v176_v20, %v175_v19  ;;  %v1729_v31 = vpack.c.bf16 %v182_v30, %v181_v1 }
 0x238   :  { %1714 = vmatprep.subr.bf16.mxu1 %v1713_v34 }
 0x239   :  { %1718 = vmatprep.subr.bf16.mxu0 %v1717_v22 }
 0x23a   :  { %1608 = vmatmul.mubr.msk.f32.vlgmr.msra.gmra.mrb[4].mxu0 %vm297_vm1, %v1936_v29 }
 0x23b   :  { %1716 = vmatpush3.bf16.msra.mxu1 %v1713_v34  ;;  %1720 = vmatpush3.bf16.msra.mxu0 %v1717_v22 }
 0x23c   :  { %1722 = vmatprep.subr.bf16.mxu0 %v1721_v24 }
 0x23f   :  { %1724 = vmatpush3.bf16.msra.mxu0 %v1721_v24 }
 0x240   :  { %1726 = vmatprep.subr.bf16.mxu0 %v1725_v28 }
 0x243   :  { %1728 = vmatpush3.bf16.msra.mxu0 %v1725_v28 }
 0x244   :  { %1730 = vmatprep.subr.bf16.mxu0 %v1729_v31 }
 0x247   :  { %1732 = vmatpush3.bf16.msra.mxu0 %v1729_v31 }
 0x305   :  { %v1946_v35 = vpop.f32.mrb[2].mxu0 }
 0x306   :  { %v1948_v36 = vpop.f32.mrb[3].mxu0 }
 0x30d   :  { %v1609_v38 = vpop.f32.mrb[4].mxu0 }
 0x30e   :  { %v805_v39 = vadd.f32 %v1609_v38, %v1478_v37  ;;  %v799_v40 = vpop.f32.mrb[5].mxu0 }
 0x30f   :  { %v800_v41 = vadd.f32 %v1478_v37, %v799_v40 }
 0x310   :  { %v809_v42 = vsel %vm297_vm1, %v805_v39, 0.0 }
 0x311   :  { %v808_v43 = vsel %vm297_vm1, %v800_v41, 0.0 }
 0x312   :  { %v810_v44 = vadd.f32 %v809_v42, %v808_v43 }
 0x314   :  { %v811_v45 = vrot.slane %v810_v44, 4 }
 0x316   :  { %v812_v46 = vadd.f32 %v811_v45, %v810_v44  ;;  %v1470_v45 = vld [vmem:[%s1436_s4] ss:$0 sm:$0xff] }
 0x318   :  { %v813_v47 = vrot.slane %v812_v46, 2 }
 0x31a   :  { %v814_v48 = vadd.f32 %v813_v47, %v812_v46 }
 0x31c   :  { %v815_v49 = vrot.slane %v814_v48, 1 }
 0x31e   :  { %v816_v50 = vadd.f32 %v815_v49, %v814_v48 }
 0x320   :  { %v817_v51 = vmul.f32 0.0625, %v816_v50 }
 0x322   :  { %v818_v52 = vsub.f32 %v800_v41, %v817_v51  ;;  %v819_v55 = vsub.f32 %v805_v39, %v817_v51 }
 0x324   :  { %v820_v56 = vmul.f32 %v818_v52, %v818_v52  ;;  %v821_v57 = vmul.f32 %v819_v55, %v819_v55 }
 0x326   :  { %v822_v58 = vsel %vm297_vm1, %v820_v56, 0.0  ;;  %v823_v59 = vsel %vm297_vm1, %v821_v57, 0.0  ;;  %v188_v57 = vld [vmem:[%s1451_s8 + $0x10] sm:$0xff] }
 0x327   :  { %v824_v60 = vadd.f32 %v823_v59, %v822_v58  ;;  %v189_v58 = vld [vmem:[%s1451_s8 + $0x18] sm:$0xff] }
 0x328   :  { %v1737_v59 = vpack.c.bf16 %v189_v58, %v188_v57 }
 0x329   :  { %v825_v61 = vrot.slane %v824_v60, 4 }
 0x32b   :  { %v826_v62 = vadd.f32 %v825_v61, %v824_v60  ;;  %v191_v60 = vld [vmem:[%s1995_s12] sm:$0xff]  ;;  %v192_v61 = vld [vmem:[%s1995_s12 + $0x8] sm:$0xff] }
 0x32d   :  { %v827_v63 = vrot.slane %v826_v62, 2 }
 0x32f   :  { %v828_v0 = vadd.f32 %v827_v63, %v826_v62  ;;  %v1741_v62 = vpack.c.bf16 %v192_v61, %v191_v60  ;;  %v1486_v63 = vld [vmem:[%s1448_s16] ss:$0 sm:$0xff] }
 0x331   :  { %v829_v2 = vrot.slane %v828_v0, 1 }
 0x333   :  { %v830_v3 = vadd.f32 %v829_v2, %v828_v0 }
 0x335   :  { %v831_v4 = vmul.f32 0.0625, %v830_v3 }
 0x337   :  { %v832_v5 = vadd.f32 1e-05, %v831_v4 }
 0x339   :  { %1805 = vrsqrt.f32 %v832_v5 }
 0x343   :  { %v1806_v6 = vpop.eup %1805 }
 0x344   :  { %v834_v8 = vmul.f32 %v1806_v6, %v818_v52  ;;  %v835_v9 = vmul.f32 %v1806_v6, %v819_v55 }
 0x346   :  { %v842_v11 = vmul.f32 %v1481_v7, %v834_v8  ;;  %v843_v12 = vmul.f32 %v1481_v7, %v835_v9 }
 0x348   :  { %v850_v13 = vadd.f32 %v1482_v10, %v842_v11  ;;  %v851_v14 = vadd.f32 %v1482_v10, %v843_v12 }
 0x34a   :  { %vm852_vm9 = vcmp.ge.f32.partialorder %v850_v13, 0.0  ;;  %v854_v15 = vmul.f32 0.01, %v850_v13  ;;  %vm853_vm10 = vcmp.ge.f32.partialorder %v851_v14, 0.0  ;;  %v855_v16 = vmul.f32 0.01, %v851_v14 }
 0x34c   :  { %v856_v17 = vsel %vm852_vm9, %v850_v13, %v854_v15  ;;  %v857_v18 = vsel %vm853_vm10, %v851_v14, %v855_v16 }
 0x34d   :  { %1618 = vmatprep.mubr.msk.f32.mxu1 %vm297_vm1, %v856_v17 }
 0x34e   :  { %1619 = vmatmul.mubr.msk.f32.vlgmr.msra.gmra.mrb[4].mxu1 %vm297_vm1, %v857_v18 }
 0x421   :  { %v1620_v33 = vpop.f32.mrb[4].mxu1 }
 0x422   :  { %v942_v34 = vadd.f32 %v1620_v33, %v1483_v32  ;;  %v936_v37 = vpop.f32.mrb[5].mxu1 }
 0x423   :  { %v937_v38 = vadd.f32 %v1483_v32, %v936_v37  ;;  %v1489_v32 = vld [vmem:[%s1449_s20] ss:$0 sm:$0xff] }
 0x424   :  { %v946_v39 = vadd.f32 %v942_v34, %v1936_v29  ;;  %v565_v29 = vadd.f32 %v1470_v45, %v1948_v36  ;;  %v1490_v37 = vld [vmem:[%s1450_s24] ss:$0 sm:$0xff] }
 0x425   :  { %v945_v40 = vadd.f32 %v937_v38, %v1932_v27  ;;  %v570_v27 = vadd.f32 %v1946_v35, %v1470_v45 }
 0x426   :  { %v950_v43 = vmul.f32 0.01, %v946_v39  ;;  %vm948_vm12 = vcmp.ge.f32.partialorder %v946_v39, 0.0  ;;  %v573_v46 = vadd.f32 %v565_v29, %v1878_v53  ;;  %v186_v53 = vld [vmem:[%s1451_s8] sm:$0xff] }
 0x427   :  { %vm947_vm11 = vcmp.ge.f32.partialorder %v945_v40, 0.0  ;;  %v949_v41 = vmul.f32 0.01, %v945_v40  ;;  %v574_v47 = vadd.f32 %v570_v27, %v1880_v54  ;;  %v187_v54 = vld [vmem:[%s1451_s8 + $0x8] sm:$0xff] }
 0x428   :  { %v952_v44 = vsel %vm948_vm12, %v946_v39, %v950_v43  ;;  %v577_v48 = vmul.f32 0.01, %v573_v46  ;;  %vm575_vm13 = vcmp.ge.f32.partialorder %v573_v46, 0.0  ;;  %v1733_v56 = vpack.c.bf16 %v187_v54, %v186_v53  ;;  %v194_v43 = vld [vmem:[%s1995_s12 + $0x18] sm:$0xff] }
 0x429   :  { %v951_v42 = vsel %vm947_vm11, %v945_v40, %v949_v41  ;;  %v578_v49 = vmul.f32 0.01, %v574_v47  ;;  %vm576_vm15 = vcmp.ge.f32.partialorder %v574_v47, 0.0 }
 0x42a   :  { %955 = vrot.lane.b32.xlu0 %v951_v42, %s1832_s30  ;;  %v579_v51 = vsel %vm575_vm13, %v573_v46, %v577_v48  ;;  %1734 = vmatprep.subr.bf16.mxu1 %v1733_v56  ;;  %v193_v42 = vld [vmem:[%s1995_s12 + $0x10] sm:$0xff]  ;;  %v196_v48 = vld [vmem:[%s1995_s12 + $0x28] sm:$0xff] }
 0x42b   :  { %v580_v36 = vsel %vm576_vm15, %v574_v47, %v578_v49  ;;  %1736 = vmatpush3.bf16.msra.mxu1 %v1733_v56  ;;  %v1745_v46 = vpack.c.bf16 %v194_v43, %v193_v42  ;;  %v195_v47 = vld [vmem:[%s1995_s12 + $0x20] sm:$0xff] }
 0x42c   :  { %1738 = vmatprep.subr.bf16.mxu1 %v1737_v59  ;;  %v1749_v49 = vpack.c.bf16 %v196_v48, %v195_v47  ;;  %v1498_v42 = vld [vmem:[%s1456_s13] ss:$0 sm:$0xff] }
 0x42e   :  { %957 = vrot.lane.b32.xlu0 %v952_v44, %s1832_s30  ;;  %s1841_s30 = smov 30  }
 0x42f   :  { %1740 = vmatpush3.bf16.msra.mxu1 %v1737_v59  ;;  %s1455_s9 = sld [smem:[%s2054_s0 + %s1841_s30]]  }
 0x430   :  { %1742 = vmatprep.subr.bf16.mxu1 %v1741_v62 }
 0x49c   :  { %v956_v50 = vpop.permute.xlu0 %955 }
 0x49d   :  { %v1980_v52 = vsel %vm297_vm1, %v579_v51, %v956_v50  ;;  %v197_v50 = vld [vmem:[%s1995_s12 + $0x30] sm:$0xff]  ;;  %v198_v51 = vld [vmem:[%s1995_s12 + $0x38] sm:$0xff] }
 0x49e   :  { %1637 = vmatprep.mubr.msk.f32.mxu0 %vm969_vm14, %v1980_v52 }
 0x4a0   :  { %v958_v55 = vpop.permute.xlu0 %957 }
 0x4a1   :  { %v1985_v35 = vsel %vm297_vm1, %v580_v36, %v958_v55  ;;  %v1753_v36 = vpack.c.bf16 %v198_v51, %v197_v50  ;;  %v1491_v55 = vld [vmem:[%s1452_s28] ss:$0 sm:$0xff] }
 0x4a2   :  { %1638 = vmatmul.mubr.msk.f32.vlgmr.msra.gmra.mrb[6].mxu0 %vm969_vm14, %v1985_v35 }
 0x575   :  { %v1639_v0 = vpop.f32.mrb[6].mxu0 }
 0x576   :  { %v1048_v2 = vadd.f32 %v1639_v0, %v1486_v63  ;;  %v1042_v3 = vpop.f32.mrb[7].mxu0  ;;  %v202_v0 = vld [vmem:[%s1457_s2] sm:$0xff] }
 0x577   :  { %v1043_v4 = vadd.f32 %v1486_v63, %v1042_v3  ;;  %v205_v3 = vld [vmem:[%s1457_s2 + $0x18] sm:$0xff] }
 0x578   :  { %v1052_v5 = vsel %vm297_vm1, %v1048_v2, 0.0 }
 0x579   :  { %v1051_v6 = vsel %vm297_vm1, %v1043_v4, 0.0 }
 0x57a   :  { %v1053_v7 = vadd.f32 %v1052_v5, %v1051_v6  ;;  %v1494_v5 = vld [vmem:[%s1454_s6] ss:$0 sm:$0xff] }
 0x57c   :  { %v1054_v8 = vrot.slane %v1053_v7, 4 }
 0x57e   :  { %v1055_v9 = vadd.f32 %v1054_v8, %v1053_v7 }
 0x580   :  { %v1056_v10 = vrot.slane %v1055_v9, 2 }
 0x582   :  { %v1057_v11 = vadd.f32 %v1056_v10, %v1055_v9 }
 0x584   :  { %v1058_v12 = vrot.slane %v1057_v11, 1 }
 0x586   :  { %v1059_v13 = vadd.f32 %v1058_v12, %v1057_v11 }
 0x588   :  { %v1060_v14 = vmul.f32 0.0625, %v1059_v13 }
 0x58a   :  { %v1061_v15 = vsub.f32 %v1043_v4, %v1060_v14  ;;  %v1062_v16 = vsub.f32 %v1048_v2, %v1060_v14  ;;  %v203_v2 = vld [vmem:[%s1457_s2 + $0x8] sm:$0xff] }
 0x58c   :  { %v1063_v17 = vmul.f32 %v1061_v15, %v1061_v15  ;;  %v1064_v18 = vmul.f32 %v1062_v16, %v1062_v16 }
 0x58e   :  { %v1065_v19 = vsel %vm297_vm1, %v1063_v17, 0.0  ;;  %v1066_v20 = vsel %vm297_vm1, %v1064_v18, 0.0 }
 0x58f   :  { %v1067_v21 = vadd.f32 %v1066_v20, %v1065_v19 }
 0x591   :  { %v1068_v22 = vrot.slane %v1067_v21, 4 }
 0x593   :  { %v1069_v23 = vadd.f32 %v1068_v22, %v1067_v21 }
 0x595   :  { %v1070_v24 = vrot.slane %v1069_v23, 2 }
 0x597   :  { %v1071_v25 = vadd.f32 %v1070_v24, %v1069_v23 }
 0x599   :  { %v1072_v26 = vrot.slane %v1071_v25, 1 }
 0x59b   :  { %v1073_v28 = vadd.f32 %v1072_v26, %v1071_v25 }
 0x59d   :  { %v1074_v1 = vmul.f32 0.0625, %v1073_v28 }
 0x59f   :  { %v1075_v30 = vadd.f32 1e-05, %v1074_v1 }
 0x5a1   :  { %1807 = vrsqrt.f32 %v1075_v30 }
 0x5ab   :  { %v1808_v31 = vpop.eup %1807 }
 0x5ac   :  { %v1077_v33 = vmul.f32 %v1808_v31, %v1061_v15  ;;  %v1078_v34 = vmul.f32 %v1808_v31, %v1062_v16 }
 0x5ae   :  { %v1085_v38 = vmul.f32 %v1489_v32, %v1077_v33  ;;  %v1086_v39 = vmul.f32 %v1489_v32, %v1078_v34 }
 0x5b0   :  { %v1093_v40 = vadd.f32 %v1490_v37, %v1085_v38  ;;  %v1094_v41 = vadd.f32 %v1490_v37, %v1086_v39  ;;  %v1497_v39 = vld [vmem:[%s1455_s9] ss:$0 sm:$0xff] }
 0x5b2   :  { %vm1095_vm0 = vcmp.ge.f32.partialorder %v1093_v40, 0.0  ;;  %v1097_v44 = vmul.f32 0.01, %v1093_v40  ;;  %vm1096_vm2 = vcmp.ge.f32.partialorder %v1094_v41, 0.0  ;;  %v1098_v45 = vmul.f32 0.01, %v1094_v41 }
 0x5b4   :  { %v1099_v29 = vsel %vm1095_vm0, %v1093_v40, %v1097_v44  ;;  %v1100_v27 = vsel %vm1096_vm2, %v1094_v41, %v1098_v45 }
 0x5b5   :  { %1648 = vmatprep.mubr.msk.f32.mxu1 %vm297_vm1, %v1099_v29 }
 0x5b6   :  { %1649 = vmatmul.mubr.msk.f32.vlgmr.msra.gmra.mrb[6].mxu1 %vm297_vm1, %v1100_v27 }
 0x5b7   :  { %1744 = vmatpush3.bf16.msra.mxu1 %v1741_v62 }
 0x5b8   :  { %1746 = vmatprep.subr.bf16.mxu1 %v1745_v46 }
 0x5bb   :  { %1748 = vmatpush3.bf16.msra.mxu1 %v1745_v46 }
 0x5bc   :  { %1750 = vmatprep.subr.bf16.mxu1 %v1749_v49 }
 0x5bf   :  { %1752 = vmatpush3.bf16.msra.mxu1 %v1749_v49  ;;  %v1499_v49 = vld [vmem:[%s1458_s17] ss:$0 sm:$0xff] }
 0x5c0   :  { %1754 = vmatprep.subr.bf16.mxu1 %v1753_v36 }
 0x5c3   :  { %1756 = vmatpush3.bf16.msra.mxu1 %v1753_v36 }
 0x689   :  { %v1650_v53 = vpop.f32.mrb[6].mxu1 }
 0x68a   :  { %v1185_v54 = vadd.f32 %v1650_v53, %v1491_v55  ;;  %v1179_v56 = vpop.f32.mrb[7].mxu1 }
 0x68b   :  { %v1180_v57 = vadd.f32 %v1491_v55, %v1179_v56 }
 0x68c   :  { %v1189_v58 = vadd.f32 %v1185_v54, %v1985_v35  ;;  %v1757_v35 = vpack.c.bf16 %v203_v2, %v202_v0 }
 0x68d   :  { %v1188_v59 = vadd.f32 %v1180_v57, %v1980_v52  ;;  %v204_v52 = vld [vmem:[%s1457_s2 + $0x10] sm:$0xff] }
 0x68e   :  { %v1193_v60 = vmul.f32 0.01, %v1189_v58  ;;  %vm1191_vm3 = vcmp.ge.f32.partialorder %v1189_v58, 0.0  ;;  %1758 = vmatprep.subr.bf16.mxu0 %v1757_v35  ;;  %v1761_v4 = vpack.c.bf16 %v205_v3, %v204_v52 }
 0x68f   :  { %v1192_v61 = vmul.f32 0.01, %v1188_v59  ;;  %vm1190_vm5 = vcmp.ge.f32.partialorder %v1188_v59, 0.0  ;;  %1760 = vmatpush3.bf16.msra.mxu0 %v1757_v35 }
 0x690   :  { %v1195_v63 = vsel %vm1191_vm3, %v1189_v58, %v1193_v60  ;;  %1762 = vmatprep.subr.bf16.mxu0 %v1761_v4 }
 0x691   :  { %v1194_v62 = vsel %vm1190_vm5, %v1188_v59, %v1192_v61 }
 0x692   :  { %1667 = vmatprep.mubr.msk.f32.mxu1 %vm969_vm14, %v1194_v62 }
 0x693   :  { %1668 = vmatmul.mubr.msk.f32.vlgmr.msra.gmra.mrb[8].mxu1 %vm969_vm14, %v1195_v63  ;;  %1764 = vmatpush3.bf16.msra.mxu0 %v1761_v4 }
 0x766   :  { %v1669_v6 = vpop.f32.mrb[8].mxu1 }
 0x767   :  { %v1280_v7 = vadd.f32 %v1669_v6, %v1494_v5  ;;  %v1274_v8 = vpop.f32.mrb[9].mxu1 }
 0x768   :  { %v1275_v9 = vadd.f32 %v1494_v5, %v1274_v8 }
 0x769   :  { %v1284_v10 = vsel %vm297_vm1, %v1280_v7, 0.0 }
 0x76a   :  { %v1283_v11 = vsel %vm297_vm1, %v1275_v9, 0.0 }
 0x76b   :  { %v1285_v12 = vadd.f32 %v1284_v10, %v1283_v11 }
 0x76d   :  { %v1286_v13 = vrot.slane %v1285_v12, 4 }
 0x76f   :  { %v1287_v14 = vadd.f32 %v1286_v13, %v1285_v12 }
 0x771   :  { %v1288_v15 = vrot.slane %v1287_v14, 2 }
 0x773   :  { %v1289_v16 = vadd.f32 %v1288_v15, %v1287_v14 }
 0x775   :  { %v1290_v17 = vrot.slane %v1289_v16, 1 }
 0x777   :  { %v1291_v18 = vadd.f32 %v1290_v17, %v1289_v16 }
 0x779   :  { %v1292_v19 = vmul.f32 0.0625, %v1291_v18 }
 0x77b   :  { %v1293_v20 = vsub.f32 %v1275_v9, %v1292_v19  ;;  %v1294_v21 = vsub.f32 %v1280_v7, %v1292_v19 }
 0x77d   :  { %v1295_v22 = vmul.f32 %v1293_v20, %v1293_v20  ;;  %v1296_v23 = vmul.f32 %v1294_v21, %v1294_v21 }
 0x77f   :  { %v1297_v24 = vsel %vm297_vm1, %v1295_v22, 0.0  ;;  %v1298_v25 = vsel %vm297_vm1, %v1296_v23, 0.0 }
 0x780   :  { %v1299_v26 = vadd.f32 %v1298_v25, %v1297_v24 }
 0x782   :  { %v1300_v28 = vrot.slane %v1299_v26, 4 }
 0x784   :  { %v1301_v1 = vadd.f32 %v1300_v28, %v1299_v26 }
 0x786   :  { %v1302_v30 = vrot.slane %v1301_v1, 2 }
 0x788   :  { %v1303_v31 = vadd.f32 %v1302_v30, %v1301_v1 }
 0x78a   :  { %v1304_v32 = vrot.slane %v1303_v31, 1 }
 0x78c   :  { %v1305_v33 = vadd.f32 %v1304_v32, %v1303_v31 }
 0x78e   :  { %v1306_v34 = vmul.f32 0.0625, %v1305_v33 }
 0x790   :  { %v1307_v37 = vadd.f32 1e-05, %v1306_v34 }
 0x792   :  { %1809 = vrsqrt.f32 %v1307_v37 }
 0x79c   :  { %v1810_v38 = vpop.eup %1809 }
 0x79d   :  { %v1309_v40 = vmul.f32 %v1810_v38, %v1293_v20  ;;  %v1310_v41 = vmul.f32 %v1810_v38, %v1294_v21 }
 0x79f   :  { %v1317_v43 = vmul.f32 %v1497_v39, %v1309_v40  ;;  %v1318_v44 = vmul.f32 %v1497_v39, %v1310_v41 }
 0x7a1   :  { %v1325_v45 = vadd.f32 %v1498_v42, %v1317_v43  ;;  %v1326_v29 = vadd.f32 %v1498_v42, %v1318_v44 }
 0x7a3   :  { %vm1327_vm6 = vcmp.ge.f32.partialorder %v1325_v45, 0.0  ;;  %v1329_v27 = vmul.f32 0.01, %v1325_v45  ;;  %vm1328_vm7 = vcmp.ge.f32.partialorder %v1326_v29, 0.0  ;;  %v1330_v46 = vmul.f32 0.01, %v1326_v29 }
 0x7a5   :  { %v1331_v47 = vsel %vm1327_vm6, %v1325_v45, %v1329_v27  ;;  %v1332_v48 = vsel %vm1328_vm7, %v1326_v29, %v1330_v46 }
 0x7a6   :  { %1678 = vmatprep.mubr.msk.f32.mxu0 %vm297_vm1, %v1331_v47 }
 0x7a7   :  { %1679 = vmatmul.mubr.msk.f32.vlgmr.msra.gmra.mrb[8].mxu0 %vm297_vm1, %v1332_v48 }
 0x87a   :  { %v1680_v50 = vpop.f32.mrb[8].mxu0 }
 0x87b   :  { %v1417_v51 = vadd.f32 %v1680_v50, %v1499_v49  ;;  %v1411_v36 = vpop.f32.mrb[9].mxu0 }
 0x87c   :  { %v1412_v55 = vadd.f32 %v1499_v49, %v1411_v36 }
 0x87d   :  { %1421 = vst.msk [vmem:[%s1459_s21 + $0x8] sm:$0xff] %vm589_vm4, %v1417_v51 }
 0x87e   :  { %1420 = vst.msk [vmem:[%s1459_s21] sm:$0xff] %vm589_vm4, %v1412_v55 }

</bundles_post_ra>
